<compile_context>
chip_gen: v6e
topology: v6e:2x2x1
jax: 0.10.0
libtpu: 0.0.40
codegen_flags: <defaults>
</compile_context>

<pallas_src>
import jax
import jax.numpy as jnp
from jax.experimental import pallas as pl
from jax.experimental.pallas import tpu as pltpu


def _up_conv_kernel(xm_ref, xh_ref, w_ref, shift_ref, o_ref, xs_ref):
    """One (batch, row-tile) grid step.

    xm_ref   : (1, tile_h, W+2, Cin)   main rows of the zero-padded input
    xh_ref   : (1, 2,      W+2, Cin)   2-row bottom halo
    w_ref    : (9, Cin, 4*Cout)        BN-scaled, parity-packed folded taps
    shift_ref: (1, 4*Cout) f32         fused conv-bias + BN shift (4x tiled)
    o_ref    : (1, tile_h, W, 4*Cout)  output, 4 parity classes on lane axis
    xs_ref   : (3, tile_h+2, W, Cin)   scratch: column-shifted halo windows
    """
    tile_h = xm_ref.shape[1]
    Cin = xm_ref.shape[3]
    W = o_ref.shape[2]
    n4 = o_ref.shape[3]
    M = tile_h * W

    # The only re-layout copies in the kernel: three column-shifted windows
    # (instead of nine per-tap patch materialisations), built directly from
    # the main block and the halo block (no intermediate xwin assembly).
    for co in range(3):
        xs_ref[co, 0:tile_h] = xm_ref[0, :, co:co + W, :]
        xs_ref[co, tile_h:tile_h + 2] = xh_ref[0, :, co:co + W, :]

    # Nine (M, Cin) @ (Cin, 4*Cout) matmuls accumulated back-to-back into one
    # traced f32 accumulator (MRB-friendly on v7x, no per-tap VMEM RMW).  The
    # row slices below are sublane-aligned whenever W % 8 == 0.
    acc = None
    for ro in range(3):
        for co in range(3):
            patch = xs_ref[co, ro:ro + tile_h].reshape(M, Cin)
            part = jnp.dot(patch, w_ref[ro * 3 + co],
                           preferred_element_type=jnp.float32)
            acc = part if acc is None else acc + part

    # Fused epilogue (BN scale already folded into the weights): shift + ReLU,
    # then one lane-dense store covering all four parity classes.
    y = jnp.maximum(acc + shift_ref[...], 0.0)
    o_ref[0] = y.astype(o_ref.dtype).reshape(tile_h, W, n4)


def _vmem_capacity_bytes():
    """Best-effort per-core VMEM capacity (defaults to the v7x 64 MiB floor)."""
    try:
        info = pltpu.get_tpu_info()
    except Exception:
        return 64 * 1024 * 1024
    for name in ("vmem_capacity_bytes", "vmem_size_bytes", "vmem_bytes"):
        val = getattr(info, name, None)
        if val:
            return int(val)
    return 64 * 1024 * 1024


def _vmem_estimate(tile_h, W, Cin, Cout, in_item, out_item):
    main = 2 * tile_h * (W + 2) * Cin * in_item          # double-buffered input
    halo = 2 * 2 * (W + 2) * Cin * in_item
    wts = 9 * Cin * 4 * Cout * in_item                   # single-buffered weights
    outb = 2 * tile_h * W * 4 * Cout * out_item          # double-buffered output
    xs = 3 * (tile_h + 2) * W * Cin * in_item            # shifted-window scratch
    acc = tile_h * W * 4 * Cout * 4                      # f32 accumulator
    return main + halo + wts + outb + xs + acc + (1 << 20)


def up_conv_forward(x_nchw, conv_w, conv_b, bn_gamma, bn_beta, bn_mean, bn_var,
                    eps=1e-5, *, compute_dtype=jnp.bfloat16, out_dtype=None,
                    tile_h=None):
    """Forward pass of up_conv.  x_nchw: (N, Cin, H, W) -> (N, Cout, 2H, 2W)."""
    if out_dtype is None:
        out_dtype = compute_dtype
    N, Cin, H, W = x_nchw.shape
    Cout = conv_w.shape[0]
    n4 = 4 * Cout

    in_item = jnp.dtype(compute_dtype).itemsize
    out_item = jnp.dtype(out_dtype).itemsize

    # Generation-aware VMEM budget: ~48 MiB on v7x (64 MiB/TC), ~96 MiB on
    # v5e/v6e (128 MiB/TC).
    cap = _vmem_capacity_bytes()
    budget = max(32 << 20, min(cap - (16 << 20), 96 << 20))

    # Row tile (even): target M = tile_h*W ~ 512-1024 MXU rows to amortise the
    # per-grid-step overhead, shrunk until the working set fits the budget.
    if tile_h is None:
        target_m = 1024 if budget > (64 << 20) else 512
        tile_h = max(2, min(H + (H % 2), (target_m // max(W, 1)) or 2))
    tile_h = max(2, int(tile_h))
    if tile_h % 2:
        tile_h += 1
    while tile_h > 2 and _vmem_estimate(tile_h, W, Cin, Cout, in_item,
                                        out_item) > 0.8 * budget:
        tile_h = max(2, (tile_h // 2 + 1) & ~1)

    num_h = -(-H // tile_h)                  # ceil(H / tile_h)
    rows_total = num_h * tile_h + 2          # exactly the rows + halo we touch
    half_th = tile_h // 2

    # --- glue at ORIGINAL resolution only: NCHW -> NHWC, 1-pixel zero pad ---
    x_nhwc = jnp.transpose(x_nchw.astype(compute_dtype), (0, 2, 3, 1))
    x_pad = jnp.pad(x_nhwc, ((0, 0), (1, rows_total - H - 1), (1, 1), (0, 0)))

    # --- fold "upsample x2 -> 3x3 conv -> BN scale" into 9 N-packed slabs ---
    # G[ro, pr, tap] sums the 3x3 row taps that land on padded-row offset `ro`
    # for output row parity `pr` (same matrix reused along columns).
    w4 = jnp.transpose(conv_w.astype(jnp.float32), (2, 3, 1, 0))   # (3,3,Cin,Cout)
    scale = bn_gamma.astype(jnp.float32) / jnp.sqrt(
        bn_var.astype(jnp.float32) + eps)
    w4 = w4 * scale                                 # fold BN scale into weights
    G = jnp.array([[[1., 0., 0.], [0., 0., 0.]],    # ro=0: even uses tap0
                   [[0., 1., 1.], [1., 1., 0.]],    # ro=1: even taps1+2 / odd 0+1
                   [[0., 0., 0.], [0., 0., 1.]]],   # ro=2: odd uses tap2
                  jnp.float32)                      # [ro, parity, tap]
    w9 = jnp.einsum('rpy,sqx,yxio->rsipqo', G, G, w4)   # (3,3,Cin,2,2,Cout)
    w_packed = w9.reshape(9, Cin, n4).astype(compute_dtype)

    shift = scale * (conv_b.astype(jnp.float32) - bn_mean.astype(jnp.float32)) \
        + bn_beta.astype(jnp.float32)
    shift4 = jnp.tile(shift, 4).reshape(1, n4).astype(jnp.float32)

    def build(single_buffer_consts):
        const_kw = {}
        if single_buffer_consts:
            const_kw = dict(pipeline_mode=pl.Buffered(1))
        return pl.pallas_call(
            _up_conv_kernel,
            out_shape=jax.ShapeDtypeStruct((N, num_h * tile_h, W, n4),
                                           out_dtype),
            grid=(N, num_h),
            in_specs=[
                # main rows of the zero-padded original-resolution input
                pl.BlockSpec((1, tile_h, W + 2, Cin), lambda n, h: (n, h, 0, 0)),
                # 2-row bottom halo (block index counted in units of 2 rows)
                pl.BlockSpec((1, 2, W + 2, Cin),
                             lambda n, h: (n, (h + 1) * half_th, 0, 0)),
                # constant weight / shift blocks: single-buffered
                pl.BlockSpec((9, Cin, n4), lambda n, h: (0, 0, 0), **const_kw),
                pl.BlockSpec((1, n4), lambda n, h: (0, 0), **const_kw),
            ],
            out_specs=pl.BlockSpec((1, tile_h, W, n4),
                                   lambda n, h: (n, h, 0, 0)),
            scratch_shapes=[pltpu.VMEM((3, tile_h + 2, W, Cin), compute_dtype)],
            compiler_params=pltpu.CompilerParams(
                dimension_semantics=("parallel", "parallel"),
                vmem_limit_bytes=int(budget)),
        )

    try:
        out_k = build(True)(x_pad, x_pad, w_packed, shift4)
    except Exception:
        # Fallback if pl.Buffered(1) is rejected by this jax version.
        out_k = build(False)(x_pad, x_pad, w_packed, shift4)

    # Un-interleave the parity classes while converting to PyTorch NCHW; the
    # transpose runs in the (bf16 by default) kernel output dtype.
    out = out_k[:, :H].reshape(N, H, W, 2, 2, Cout)    # [n, i, j, pr, pc, co]
    out = jnp.transpose(out, (0, 5, 1, 3, 2, 4))       # [n, co, i, pr, j, pc]
    return out.reshape(N, Cout, 2 * H, 2 * W)


def _reference(x_nchw, conv_w, conv_b, bn_gamma, bn_beta, bn_mean, bn_var,
               eps=1e-5):
    """Plain-JAX reference (upsample -> conv -> BN(eval) -> ReLU), f32."""
    x_up = jnp.repeat(jnp.repeat(x_nchw, 2, axis=2), 2, axis=3)
    y = jax.lax.conv_general_dilated(
        x_up, conv_w, window_strides=(1, 1), padding="SAME",
        dimension_numbers=("NCHW", "OIHW", "NCHW"))
    y = y + conv_b[None, :, None, None]
    y = (y - bn_mean[None, :, None, None]) / jnp.sqrt(
        bn_var[None, :, None, None] + eps)
    y = y * bn_gamma[None, :, None, None] + bn_beta[None, :, None, None]
    return jnp.maximum(y, 0.0)


if __name__ == "__main__":
    key = jax.random.PRNGKey(0)
    k_x, k_w, k_b = jax.random.split(key, 3)

    N, Cin, Cout, H, W = 2, 4, 8, 16, 16
    x = jax.random.normal(k_x, (N, Cin, H, W), dtype=jnp.float32)

    # Deterministic synthetic parameters (shapes from up_conv.__init__).
    conv_w = 0.1 * jax.random.normal(k_w, (Cout, Cin, 3, 3), dtype=jnp.float32)
    conv_b = 0.05 * jax.random.normal(k_b, (Cout,), dtype=jnp.float32)
    bn_gamma = jnp.linspace(0.8, 1.2, Cout, dtype=jnp.float32)
    bn_beta = jnp.linspace(-0.1, 0.1, Cout, dtype=jnp.float32)
    bn_mean = jnp.zeros((Cout,), jnp.float32)
    bn_var = jnp.ones((Cout,), jnp.float32)

    ref = _reference(x, conv_w, conv_b, bn_gamma, bn_beta, bn_mean, bn_var)

    # f32 compute path: tight correctness check.
    out_f32 = up_conv_forward(x, conv_w, conv_b, bn_gamma, bn_beta, bn_mean,
                              bn_var, compute_dtype=jnp.float32)
    out_f32 = jax.block_until_ready(out_f32)
    assert out_f32.shape == (N, Cout, 2 * H, 2 * W), out_f32.shape
    assert jnp.allclose(out_f32, ref, atol=1e-4, rtol=1e-4), \
        "f32 kernel mismatch vs reference"

    # Default bf16 MXU path (bf16 inputs/weights/output, f32 accumulation).
    out_bf16 = up_conv_forward(x, conv_w, conv_b, bn_gamma, bn_beta, bn_mean,
                               bn_var)
    out_bf16 = jax.block_until_ready(out_bf16)
    assert out_bf16.shape == (N, Cout, 2 * H, 2 * W), out_bf16.shape
    assert jnp.allclose(out_bf16.astype(jnp.float32), ref,
                        atol=5e-2, rtol=5e-2), \
        "bf16 kernel mismatch vs reference"

    print("KERNEL_OK")
</pallas_src>

<mosaic_0001>
module attributes {stable_mosaic.version = 11 : i64} {
  func.func @_up_conv_kernel(%arg0: i32, %arg1: i32, %arg2: memref<1x16x18x4xf32, #tpu.memory_space<vmem>>, %arg3: memref<1x2x18x4xf32, #tpu.memory_space<vmem>>, %arg4: memref<9x4x32xf32, #tpu.memory_space<vmem>>, %arg5: memref<1x32xf32, #tpu.memory_space<vmem>>, %arg6: memref<1x16x16x32xf32, #tpu.memory_space<vmem>>, %arg7: memref<3x18x16x4xf32, #tpu.memory_space<vmem>>) attributes {dimension_semantics = [#tpu.dimension_semantics<parallel>, #tpu.dimension_semantics<parallel>], iteration_bounds = array<i64: 2, 1>, scalar_prefetch = 0 : i64, scratch_operands = 1 : i64, tpu.core_type = #tpu.core_type<tc>, window_params = [{transform_indices = @transform_0, window_bounds = array<i64: 1, 16, 18, 4>}, {transform_indices = @transform_1, window_bounds = array<i64: 1, 2, 18, 4>}, {pipeline_mode = #tpu.pipeline_mode<synchronous>, transform_indices = @transform_2, window_bounds = array<i64: 9, 4, 32>}, {pipeline_mode = #tpu.pipeline_mode<synchronous>, transform_indices = @transform_3, window_bounds = array<i64: 1, 32>}, {transform_indices = @transform_4, window_bounds = array<i64: 1, 16, 16, 32>}]} {
    %c0 = arith.constant 0 : index
    %c0_0 = arith.constant 0 : index
    %c0_1 = arith.constant 0 : index
    %c0_2 = arith.constant 0 : index
    %0 = vector.load %arg2[%c0, %c0_0, %c0_1, %c0_2] : memref<1x16x18x4xf32, #tpu.memory_space<vmem>>, vector<1x16x16x4xf32>
    %1 = vector.shape_cast %0 : vector<1x16x16x4xf32> to vector<16x16x4xf32>
    %c0_3 = arith.constant 0 : index
    %c0_4 = arith.constant 0 : index
    %c0_5 = arith.constant 0 : index
    %c0_6 = arith.constant 0 : index
    %2 = vector.load %arg7[%c0_3, %c0_4, %c0_5, %c0_6] : memref<3x18x16x4xf32, #tpu.memory_space<vmem>>, vector<1x16x16x4xf32>
    %3 = vector.shape_cast %2 : vector<1x16x16x4xf32> to vector<16x16x4xf32>
    %4 = vector.shape_cast %1 : vector<16x16x4xf32> to vector<1x16x16x4xf32>
    tpu.vector_store %arg7[%c0_3, %c0_4, %c0_5, %c0_6], %4 {strides = array<i32>} : memref<3x18x16x4xf32, #tpu.memory_space<vmem>>, vector<1x16x16x4xf32>,
    %c0_7 = arith.constant 0 : index
    %c0_8 = arith.constant 0 : index
    %c0_9 = arith.constant 0 : index
    %c0_10 = arith.constant 0 : index
    %5 = vector.load %arg3[%c0_7, %c0_8, %c0_9, %c0_10] : memref<1x2x18x4xf32, #tpu.memory_space<vmem>>, vector<1x2x16x4xf32>
    %6 = vector.shape_cast %5 : vector<1x2x16x4xf32> to vector<2x16x4xf32>
    %c0_11 = arith.constant 0 : index
    %c16 = arith.constant 16 : index
    %c0_12 = arith.constant 0 : index
    %c0_13 = arith.constant 0 : index
    %7 = vector.load %arg7[%c0_11, %c16, %c0_12, %c0_13] : memref<3x18x16x4xf32, #tpu.memory_space<vmem>>, vector<1x2x16x4xf32>
    %8 = vector.shape_cast %7 : vector<1x2x16x4xf32> to vector<2x16x4xf32>
    %9 = vector.shape_cast %6 : vector<2x16x4xf32> to vector<1x2x16x4xf32>
    tpu.vector_store %arg7[%c0_11, %c16, %c0_12, %c0_13], %9 {strides = array<i32>} : memref<3x18x16x4xf32, #tpu.memory_space<vmem>>, vector<1x2x16x4xf32>,
    %c0_14 = arith.constant 0 : index
    %c0_15 = arith.constant 0 : index
    %c1 = arith.constant 1 : index
    %c0_16 = arith.constant 0 : index
    %10 = vector.load %arg2[%c0_14, %c0_15, %c1, %c0_16] : memref<1x16x18x4xf32, #tpu.memory_space<vmem>>, vector<1x16x16x4xf32>
    %11 = vector.shape_cast %10 : vector<1x16x16x4xf32> to vector<16x16x4xf32>
    %c1_17 = arith.constant 1 : index
    %c0_18 = arith.constant 0 : index
    %c0_19 = arith.constant 0 : index
    %c0_20 = arith.constant 0 : index
    %12 = vector.load %arg7[%c1_17, %c0_18, %c0_19, %c0_20] : memref<3x18x16x4xf32, #tpu.memory_space<vmem>>, vector<1x16x16x4xf32>
    %13 = vector.shape_cast %12 : vector<1x16x16x4xf32> to vector<16x16x4xf32>
    %14 = vector.shape_cast %11 : vector<16x16x4xf32> to vector<1x16x16x4xf32>
    tpu.vector_store %arg7[%c1_17, %c0_18, %c0_19, %c0_20], %14 {strides = array<i32>} : memref<3x18x16x4xf32, #tpu.memory_space<vmem>>, vector<1x16x16x4xf32>,
    %c0_21 = arith.constant 0 : index
    %c0_22 = arith.constant 0 : index
    %c1_23 = arith.constant 1 : index
    %c0_24 = arith.constant 0 : index
    %15 = vector.load %arg3[%c0_21, %c0_22, %c1_23, %c0_24] : memref<1x2x18x4xf32, #tpu.memory_space<vmem>>, vector<1x2x16x4xf32>
    %16 = vector.shape_cast %15 : vector<1x2x16x4xf32> to vector<2x16x4xf32>
    %c1_25 = arith.constant 1 : index
    %c16_26 = arith.constant 16 : index
    %c0_27 = arith.constant 0 : index
    %c0_28 = arith.constant 0 : index
    %17 = vector.load %arg7[%c1_25, %c16_26, %c0_27, %c0_28] : memref<3x18x16x4xf32, #tpu.memory_space<vmem>>, vector<1x2x16x4xf32>
    %18 = vector.shape_cast %17 : vector<1x2x16x4xf32> to vector<2x16x4xf32>
    %19 = vector.shape_cast %16 : vector<2x16x4xf32> to vector<1x2x16x4xf32>
    tpu.vector_store %arg7[%c1_25, %c16_26, %c0_27, %c0_28], %19 {strides = array<i32>} : memref<3x18x16x4xf32, #tpu.memory_space<vmem>>, vector<1x2x16x4xf32>,
    %c0_29 = arith.constant 0 : index
    %c0_30 = arith.constant 0 : index
    %c2 = arith.constant 2 : index
    %c0_31 = arith.constant 0 : index
    %20 = vector.load %arg2[%c0_29, %c0_30, %c2, %c0_31] : memref<1x16x18x4xf32, #tpu.memory_space<vmem>>, vector<1x16x16x4xf32>
    %21 = vector.shape_cast %20 : vector<1x16x16x4xf32> to vector<16x16x4xf32>
    %c2_32 = arith.constant 2 : index
    %c0_33 = arith.constant 0 : index
    %c0_34 = arith.constant 0 : index
    %c0_35 = arith.constant 0 : index
    %22 = vector.load %arg7[%c2_32, %c0_33, %c0_34, %c0_35] : memref<3x18x16x4xf32, #tpu.memory_space<vmem>>, vector<1x16x16x4xf32>
    %23 = vector.shape_cast %22 : vector<1x16x16x4xf32> to vector<16x16x4xf32>
    %24 = vector.shape_cast %21 : vector<16x16x4xf32> to vector<1x16x16x4xf32>
    tpu.vector_store %arg7[%c2_32, %c0_33, %c0_34, %c0_35], %24 {strides = array<i32>} : memref<3x18x16x4xf32, #tpu.memory_space<vmem>>, vector<1x16x16x4xf32>,
    %c0_36 = arith.constant 0 : index
    %c0_37 = arith.constant 0 : index
    %c2_38 = arith.constant 2 : index
    %c0_39 = arith.constant 0 : index
    %25 = vector.load %arg3[%c0_36, %c0_37, %c2_38, %c0_39] : memref<1x2x18x4xf32, #tpu.memory_space<vmem>>, vector<1x2x16x4xf32>
    %26 = vector.shape_cast %25 : vector<1x2x16x4xf32> to vector<2x16x4xf32>
    %c2_40 = arith.constant 2 : index
    %c16_41 = arith.constant 16 : index
    %c0_42 = arith.constant 0 : index
    %c0_43 = arith.constant 0 : index
    %27 = vector.load %arg7[%c2_40, %c16_41, %c0_42, %c0_43] : memref<3x18x16x4xf32, #tpu.memory_space<vmem>>, vector<1x2x16x4xf32>
    %28 = vector.shape_cast %27 : vector<1x2x16x4xf32> to vector<2x16x4xf32>
    %29 = vector.shape_cast %26 : vector<2x16x4xf32> to vector<1x2x16x4xf32>
    tpu.vector_store %arg7[%c2_40, %c16_41, %c0_42, %c0_43], %29 {strides = array<i32>} : memref<3x18x16x4xf32, #tpu.memory_space<vmem>>, vector<1x2x16x4xf32>,
    %c0_44 = arith.constant 0 : index
    %c0_45 = arith.constant 0 : index
    %c0_46 = arith.constant 0 : index
    %c0_47 = arith.constant 0 : index
    %30 = vector.load %arg7[%c0_44, %c0_45, %c0_46, %c0_47] : memref<3x18x16x4xf32, #tpu.memory_space<vmem>>, vector<1x16x16x4xf32>
    %31 = vector.shape_cast %30 : vector<1x16x16x4xf32> to vector<16x16x4xf32>
    %32 = vector.shape_cast %31 : vector<16x16x4xf32> to vector<256x4xf32>
    %c0_48 = arith.constant 0 : index
    %c0_49 = arith.constant 0 : index
    %c0_50 = arith.constant 0 : index
    %33 = vector.load %arg4[%c0_48, %c0_49, %c0_50] : memref<9x4x32xf32, #tpu.memory_space<vmem>>, vector<1x4x32xf32>
    %34 = vector.shape_cast %33 : vector<1x4x32xf32> to vector<4x32xf32>
    %cst = arith.constant dense<0.000000e+00> : vector<256x32xf32>
    %35 = tpu.matmul %32, %34, %cst {dimension_numbers = #tpu.dot_dimension_numbers<[1], [0], [0], [1], [0, 0, 1, 1], [], []>} : vector<256x4xf32>, vector<4x32xf32>, vector<256x32xf32> -> vector<256x32xf32>
    %c1_51 = arith.constant 1 : index
    %c0_52 = arith.constant 0 : index
    %c0_53 = arith.constant 0 : index
    %c0_54 = arith.constant 0 : index
    %36 = vector.load %arg7[%c1_51, %c0_52, %c0_53, %c0_54] : memref<3x18x16x4xf32, #tpu.memory_space<vmem>>, vector<1x16x16x4xf32>
    %37 = vector.shape_cast %36 : vector<1x16x16x4xf32> to vector<16x16x4xf32>
    %38 = vector.shape_cast %37 : vector<16x16x4xf32> to vector<256x4xf32>
    %c1_55 = arith.constant 1 : index
    %c0_56 = arith.constant 0 : index
    %c0_57 = arith.constant 0 : index
    %39 = vector.load %arg4[%c1_55, %c0_56, %c0_57] : memref<9x4x32xf32, #tpu.memory_space<vmem>>, vector<1x4x32xf32>
    %40 = vector.shape_cast %39 : vector<1x4x32xf32> to vector<4x32xf32>
    %cst_58 = arith.constant dense<0.000000e+00> : vector<256x32xf32>
    %41 = tpu.matmul %38, %40, %cst_58 {dimension_numbers = #tpu.dot_dimension_numbers<[1], [0], [0], [1], [0, 0, 1, 1], [], []>} : vector<256x4xf32>, vector<4x32xf32>, vector<256x32xf32> -> vector<256x32xf32>
    %42 = arith.addf %35, %41 : vector<256x32xf32>
    %c2_59 = arith.constant 2 : index
    %c0_60 = arith.constant 0 : index
    %c0_61 = arith.constant 0 : index
    %c0_62 = arith.constant 0 : index
    %43 = vector.load %arg7[%c2_59, %c0_60, %c0_61, %c0_62] : memref<3x18x16x4xf32, #tpu.memory_space<vmem>>, vector<1x16x16x4xf32>
    %44 = vector.shape_cast %43 : vector<1x16x16x4xf32> to vector<16x16x4xf32>
    %45 = vector.shape_cast %44 : vector<16x16x4xf32> to vector<256x4xf32>
    %c2_63 = arith.constant 2 : index
    %c0_64 = arith.constant 0 : index
    %c0_65 = arith.constant 0 : index
    %46 = vector.load %arg4[%c2_63, %c0_64, %c0_65] : memref<9x4x32xf32, #tpu.memory_space<vmem>>, vector<1x4x32xf32>
    %47 = vector.shape_cast %46 : vector<1x4x32xf32> to vector<4x32xf32>
    %cst_66 = arith.constant dense<0.000000e+00> : vector<256x32xf32>
    %48 = tpu.matmul %45, %47, %cst_66 {dimension_numbers = #tpu.dot_dimension_numbers<[1], [0], [0], [1], [0, 0, 1, 1], [], []>} : vector<256x4xf32>, vector<4x32xf32>, vector<256x32xf32> -> vector<256x32xf32>
    %49 = arith.addf %42, %48 : vector<256x32xf32>
    %c0_67 = arith.constant 0 : index
    %c1_68 = arith.constant 1 : index
    %c0_69 = arith.constant 0 : index
    %c0_70 = arith.constant 0 : index
    %50 = vector.load %arg7[%c0_67, %c1_68, %c0_69, %c0_70] : memref<3x18x16x4xf32, #tpu.memory_space<vmem>>, vector<1x16x16x4xf32>
    %51 = vector.shape_cast %50 : vector<1x16x16x4xf32> to vector<16x16x4xf32>
    %52 = vector.shape_cast %51 : vector<16x16x4xf32> to vector<256x4xf32>
    %c3 = arith.constant 3 : index
    %c0_71 = arith.constant 0 : index
    %c0_72 = arith.constant 0 : index
    %53 = vector.load %arg4[%c3, %c0_71, %c0_72] : memref<9x4x32xf32, #tpu.memory_space<vmem>>, vector<1x4x32xf32>
    %54 = vector.shape_cast %53 : vector<1x4x32xf32> to vector<4x32xf32>
    %cst_73 = arith.constant dense<0.000000e+00> : vector<256x32xf32>
    %55 = tpu.matmul %52, %54, %cst_73 {dimension_numbers = #tpu.dot_dimension_numbers<[1], [0], [0], [1], [0, 0, 1, 1], [], []>} : vector<256x4xf32>, vector<4x32xf32>, vector<256x32xf32> -> vector<256x32xf32>
    %56 = arith.addf %49, %55 : vector<256x32xf32>
    %c1_74 = arith.constant 1 : index
    %c1_75 = arith.constant 1 : index
    %c0_76 = arith.constant 0 : index
    %c0_77 = arith.constant 0 : index
    %57 = vector.load %arg7[%c1_74, %c1_75, %c0_76, %c0_77] : memref<3x18x16x4xf32, #tpu.memory_space<vmem>>, vector<1x16x16x4xf32>
    %58 = vector.shape_cast %57 : vector<1x16x16x4xf32> to vector<16x16x4xf32>
    %59 = vector.shape_cast %58 : vector<16x16x4xf32> to vector<256x4xf32>
    %c4 = arith.constant 4 : index
    %c0_78 = arith.constant 0 : index
    %c0_79 = arith.constant 0 : index
    %60 = vector.load %arg4[%c4, %c0_78, %c0_79] : memref<9x4x32xf32, #tpu.memory_space<vmem>>, vector<1x4x32xf32>
    %61 = vector.shape_cast %60 : vector<1x4x32xf32> to vector<4x32xf32>
    %cst_80 = arith.constant dense<0.000000e+00> : vector<256x32xf32>
    %62 = tpu.matmul %59, %61, %cst_80 {dimension_numbers = #tpu.dot_dimension_numbers<[1], [0], [0], [1], [0, 0, 1, 1], [], []>} : vector<256x4xf32>, vector<4x32xf32>, vector<256x32xf32> -> vector<256x32xf32>
    %63 = arith.addf %56, %62 : vector<256x32xf32>
    %c2_81 = arith.constant 2 : index
    %c1_82 = arith.constant 1 : index
    %c0_83 = arith.constant 0 : index
    %c0_84 = arith.constant 0 : index
    %64 = vector.load %arg7[%c2_81, %c1_82, %c0_83, %c0_84] : memref<3x18x16x4xf32, #tpu.memory_space<vmem>>, vector<1x16x16x4xf32>
    %65 = vector.shape_cast %64 : vector<1x16x16x4xf32> to vector<16x16x4xf32>
    %66 = vector.shape_cast %65 : vector<16x16x4xf32> to vector<256x4xf32>
    %c5 = arith.constant 5 : index
    %c0_85 = arith.constant 0 : index
    %c0_86 = arith.constant 0 : index
    %67 = vector.load %arg4[%c5, %c0_85, %c0_86] : memref<9x4x32xf32, #tpu.memory_space<vmem>>, vector<1x4x32xf32>
    %68 = vector.shape_cast %67 : vector<1x4x32xf32> to vector<4x32xf32>
    %cst_87 = arith.constant dense<0.000000e+00> : vector<256x32xf32>
    %69 = tpu.matmul %66, %68, %cst_87 {dimension_numbers = #tpu.dot_dimension_numbers<[1], [0], [0], [1], [0, 0, 1, 1], [], []>} : vector<256x4xf32>, vector<4x32xf32>, vector<256x32xf32> -> vector<256x32xf32>
    %70 = arith.addf %63, %69 : vector<256x32xf32>
    %c0_88 = arith.constant 0 : index
    %c2_89 = arith.constant 2 : index
    %c0_90 = arith.constant 0 : index
    %c0_91 = arith.constant 0 : index
    %71 = vector.load %arg7[%c0_88, %c2_89, %c0_90, %c0_91] : memref<3x18x16x4xf32, #tpu.memory_space<vmem>>, vector<1x16x16x4xf32>
    %72 = vector.shape_cast %71 : vector<1x16x16x4xf32> to vector<16x16x4xf32>
    %73 = vector.shape_cast %72 : vector<16x16x4xf32> to vector<256x4xf32>
    %c6 = arith.constant 6 : index
    %c0_92 = arith.constant 0 : index
    %c0_93 = arith.constant 0 : index
    %74 = vector.load %arg4[%c6, %c0_92, %c0_93] : memref<9x4x32xf32, #tpu.memory_space<vmem>>, vector<1x4x32xf32>
    %75 = vector.shape_cast %74 : vector<1x4x32xf32> to vector<4x32xf32>
    %cst_94 = arith.constant dense<0.000000e+00> : vector<256x32xf32>
    %76 = tpu.matmul %73, %75, %cst_94 {dimension_numbers = #tpu.dot_dimension_numbers<[1], [0], [0], [1], [0, 0, 1, 1], [], []>} : vector<256x4xf32>, vector<4x32xf32>, vector<256x32xf32> -> vector<256x32xf32>
    %77 = arith.addf %70, %76 : vector<256x32xf32>
    %c1_95 = arith.constant 1 : index
    %c2_96 = arith.constant 2 : index
    %c0_97 = arith.constant 0 : index
    %c0_98 = arith.constant 0 : index
    %78 = vector.load %arg7[%c1_95, %c2_96, %c0_97, %c0_98] : memref<3x18x16x4xf32, #tpu.memory_space<vmem>>, vector<1x16x16x4xf32>
    %79 = vector.shape_cast %78 : vector<1x16x16x4xf32> to vector<16x16x4xf32>
    %80 = vector.shape_cast %79 : vector<16x16x4xf32> to vector<256x4xf32>
    %c7 = arith.constant 7 : index
    %c0_99 = arith.constant 0 : index
    %c0_100 = arith.constant 0 : index
    %81 = vector.load %arg4[%c7, %c0_99, %c0_100] : memref<9x4x32xf32, #tpu.memory_space<vmem>>, vector<1x4x32xf32>
    %82 = vector.shape_cast %81 : vector<1x4x32xf32> to vector<4x32xf32>
    %cst_101 = arith.constant dense<0.000000e+00> : vector<256x32xf32>
    %83 = tpu.matmul %80, %82, %cst_101 {dimension_numbers = #tpu.dot_dimension_numbers<[1], [0], [0], [1], [0, 0, 1, 1], [], []>} : vector<256x4xf32>, vector<4x32xf32>, vector<256x32xf32> -> vector<256x32xf32>
    %84 = arith.addf %77, %83 : vector<256x32xf32>
    %c2_102 = arith.constant 2 : index
    %c2_103 = arith.constant 2 : index
    %c0_104 = arith.constant 0 : index
    %c0_105 = arith.constant 0 : index
    %85 = vector.load %arg7[%c2_102, %c2_103, %c0_104, %c0_105] : memref<3x18x16x4xf32, #tpu.memory_space<vmem>>, vector<1x16x16x4xf32>
    %86 = vector.shape_cast %85 : vector<1x16x16x4xf32> to vector<16x16x4xf32>
    %87 = vector.shape_cast %86 : vector<16x16x4xf32> to vector<256x4xf32>
    %c8 = arith.constant 8 : index
    %c0_106 = arith.constant 0 : index
    %c0_107 = arith.constant 0 : index
    %88 = vector.load %arg4[%c8, %c0_106, %c0_107] : memref<9x4x32xf32, #tpu.memory_space<vmem>>, vector<1x4x32xf32>
    %89 = vector.shape_cast %88 : vector<1x4x32xf32> to vector<4x32xf32>
    %cst_108 = arith.constant dense<0.000000e+00> : vector<256x32xf32>
    %90 = tpu.matmul %87, %89, %cst_108 {dimension_numbers = #tpu.dot_dimension_numbers<[1], [0], [0], [1], [0, 0, 1, 1], [], []>} : vector<256x4xf32>, vector<4x32xf32>, vector<256x32xf32> -> vector<256x32xf32>
    %91 = arith.addf %84, %90 : vector<256x32xf32>
    %c0_109 = arith.constant 0 : index
    %c0_110 = arith.constant 0 : index
    %92 = vector.load %arg5[%c0_109, %c0_110] : memref<1x32xf32, #tpu.memory_space<vmem>>, vector<1x32xf32>
    %93 = vector.broadcast %92 : vector<1x32xf32> to vector<256x32xf32>
    %94 = arith.addf %91, %93 : vector<256x32xf32>
    %cst_111 = arith.constant 0.000000e+00 : f32
    %95 = vector.broadcast %cst_111 : f32 to vector<256x32xf32>
    %96 = arith.maximumf %94, %95 : vector<256x32xf32>
    %97 = vector.shape_cast %96 : vector<256x32xf32> to vector<16x16x32xf32>
    %c0_112 = arith.constant 0 : index
    %c0_113 = arith.constant 0 : index
    %c0_114 = arith.constant 0 : index
    %c0_115 = arith.constant 0 : index
    %98 = vector.load %arg6[%c0_112, %c0_113, %c0_114, %c0_115] : memref<1x16x16x32xf32, #tpu.memory_space<vmem>>, vector<1x16x16x32xf32>
    %99 = vector.shape_cast %98 : vector<1x16x16x32xf32> to vector<16x16x32xf32>
    %100 = vector.shape_cast %97 : vector<16x16x32xf32> to vector<1x16x16x32xf32>
    tpu.vector_store %arg6[%c0_112, %c0_113, %c0_114, %c0_115], %100 {strides = array<i32>} : memref<1x16x16x32xf32, #tpu.memory_space<vmem>>, vector<1x16x16x32xf32>,
    return
  }
  func.func @transform_0(%arg0: i32, %arg1: i32) -> (i32, i32, i32, i32) {
    %c0_i32 = arith.constant 0 : i32
    %c0_i32_0 = arith.constant 0 : i32
    %c0_i32_1 = arith.constant 0 : i32
    return %arg0, %arg1, %c0_i32, %c0_i32_0 : i32, i32, i32, i32
  }
  func.func @transform_1(%arg0: i32, %arg1: i32) -> (i32, i32, i32, i32) {
    %c1_i32 = arith.constant 1 : i32
    %0 = arith.addi %arg1, %c1_i32 : i32
    %c8_i32 = arith.constant 8 : i32
    %1 = arith.muli %0, %c8_i32 : i32
    %c0_i32 = arith.constant 0 : i32
    %c0_i32_0 = arith.constant 0 : i32
    %c0_i32_1 = arith.constant 0 : i32
    return %arg0, %1, %c0_i32, %c0_i32_0 : i32, i32, i32, i32
  }
  func.func @transform_2(%arg0: i32, %arg1: i32) -> (i32, i32, i32) {
    %c0_i32 = arith.constant 0 : i32
    %c0_i32_0 = arith.constant 0 : i32
    %c0_i32_1 = arith.constant 0 : i32
    %c0_i32_2 = arith.constant 0 : i32
    return %c0_i32, %c0_i32_0, %c0_i32_1 : i32, i32, i32
  }
  func.func @transform_3(%arg0: i32, %arg1: i32) -> (i32, i32) {
    %c0_i32 = arith.constant 0 : i32
    %c0_i32_0 = arith.constant 0 : i32
    %c0_i32_1 = arith.constant 0 : i32
    return %c0_i32, %c0_i32_0 : i32, i32
  }
  func.func @transform_4(%arg0: i32, %arg1: i32) -> (i32, i32, i32, i32) {
    %c0_i32 = arith.constant 0 : i32
    %c0_i32_0 = arith.constant 0 : i32
    %c0_i32_1 = arith.constant 0 : i32
    return %arg0, %arg1, %c0_i32, %c0_i32_0 : i32, i32, i32, i32
  }
}

module attributes {stable_mosaic.version = 11 : i64} {
  func.func @_up_conv_kernel(%arg0: i32, %arg1: i32, %arg2: memref<1x16x18x4xf32, #tpu.memory_space<vmem>>, %arg3: memref<1x2x18x4xf32, #tpu.memory_space<vmem>>, %arg4: memref<9x4x32xf32, #tpu.memory_space<vmem>>, %arg5: memref<1x32xf32, #tpu.memory_space<vmem>>, %arg6: memref<1x16x16x32xf32, #tpu.memory_space<vmem>>, %arg7: memref<3x18x16x4xf32, #tpu.memory_space<vmem>>) attributes {dimension_semantics = [#tpu.dimension_semantics<parallel>, #tpu.dimension_semantics<parallel>], iteration_bounds = array<i64: 2, 1>, scalar_prefetch = 0 : i64, scratch_operands = 1 : i64, tpu.core_type = #tpu.core_type<tc>, window_params = [{transform_indices = @transform_0, window_bounds = array<i64: 1, 16, 18, 4>}, {transform_indices = @transform_1, window_bounds = array<i64: 1, 2, 18, 4>}, {pipeline_mode = #tpu.pipeline_mode<synchronous>, transform_indices = @transform_2, window_bounds = array<i64: 9, 4, 32>}, {pipeline_mode = #tpu.pipeline_mode<synchronous>, transform_indices = @transform_3, window_bounds = array<i64: 1, 32>}, {transform_indices = @transform_4, window_bounds = array<i64: 1, 16, 16, 32>}]} {
    %c0 = arith.constant 0 : index
    %c0_0 = arith.constant 0 : index
    %c0_1 = arith.constant 0 : index
    %c0_2 = arith.constant 0 : index
    %0 = vector.load %arg2[%c0, %c0_0, %c0_1, %c0_2] : memref<1x16x18x4xf32, #tpu.memory_space<vmem>>, vector<1x16x16x4xf32>
    %1 = vector.shape_cast %0 : vector<1x16x16x4xf32> to vector<16x16x4xf32>
    %c0_3 = arith.constant 0 : index
    %c0_4 = arith.constant 0 : index
    %c0_5 = arith.constant 0 : index
    %c0_6 = arith.constant 0 : index
    %2 = vector.load %arg7[%c0_3, %c0_4, %c0_5, %c0_6] : memref<3x18x16x4xf32, #tpu.memory_space<vmem>>, vector<1x16x16x4xf32>
    %3 = vector.shape_cast %2 : vector<1x16x16x4xf32> to vector<16x16x4xf32>
    %4 = vector.shape_cast %1 : vector<16x16x4xf32> to vector<1x16x16x4xf32>
    tpu.vector_store %arg7[%c0_3, %c0_4, %c0_5, %c0_6], %4 {strides = array<i32>} : memref<3x18x16x4xf32, #tpu.memory_space<vmem>>, vector<1x16x16x4xf32>,
    %c0_7 = arith.constant 0 : index
    %c0_8 = arith.constant 0 : index
    %c0_9 = arith.constant 0 : index
    %c0_10 = arith.constant 0 : index
    %5 = vector.load %arg3[%c0_7, %c0_8, %c0_9, %c0_10] : memref<1x2x18x4xf32, #tpu.memory_space<vmem>>, vector<1x2x16x4xf32>
    %6 = vector.shape_cast %5 : vector<1x2x16x4xf32> to vector<2x16x4xf32>
    %c0_11 = arith.constant 0 : index
    %c16 = arith.constant 16 : index
    %c0_12 = arith.constant 0 : index
    %c0_13 = arith.constant 0 : index
    %7 = vector.load %arg7[%c0_11, %c16, %c0_12, %c0_13] : memref<3x18x16x4xf32, #tpu.memory_space<vmem>>, vector<1x2x16x4xf32>
    %8 = vector.shape_cast %7 : vector<1x2x16x4xf32> to vector<2x16x4xf32>
    %9 = vector.shape_cast %6 : vector<2x16x4xf32> to vector<1x2x16x4xf32>
    tpu.vector_store %arg7[%c0_11, %c16, %c0_12, %c0_13], %9 {strides = array<i32>} : memref<3x18x16x4xf32, #tpu.memory_space<vmem>>, vector<1x2x16x4xf32>,
    %c0_14 = arith.constant 0 : index
    %c0_15 = arith.constant 0 : index
    %c1 = arith.constant 1 : index
    %c0_16 = arith.constant 0 : index
    %10 = vector.load %arg2[%c0_14, %c0_15, %c1, %c0_16] : memref<1x16x18x4xf32, #tpu.memory_space<vmem>>, vector<1x16x16x4xf32>
    %11 = vector.shape_cast %10 : vector<1x16x16x4xf32> to vector<16x16x4xf32>
    %c1_17 = arith.constant 1 : index
    %c0_18 = arith.constant 0 : index
    %c0_19 = arith.constant 0 : index
    %c0_20 = arith.constant 0 : index
    %12 = vector.load %arg7[%c1_17, %c0_18, %c0_19, %c0_20] : memref<3x18x16x4xf32, #tpu.memory_space<vmem>>, vector<1x16x16x4xf32>
    %13 = vector.shape_cast %12 : vector<1x16x16x4xf32> to vector<16x16x4xf32>
    %14 = vector.shape_cast %11 : vector<16x16x4xf32> to vector<1x16x16x4xf32>
    tpu.vector_store %arg7[%c1_17, %c0_18, %c0_19, %c0_20], %14 {strides = array<i32>} : memref<3x18x16x4xf32, #tpu.memory_space<vmem>>, vector<1x16x16x4xf32>,
    %c0_21 = arith.constant 0 : index
    %c0_22 = arith.constant 0 : index
    %c1_23 = arith.constant 1 : index
    %c0_24 = arith.constant 0 : index
    %15 = vector.load %arg3[%c0_21, %c0_22, %c1_23, %c0_24] : memref<1x2x18x4xf32, #tpu.memory_space<vmem>>, vector<1x2x16x4xf32>
    %16 = vector.shape_cast %15 : vector<1x2x16x4xf32> to vector<2x16x4xf32>
    %c1_25 = arith.constant 1 : index
    %c16_26 = arith.constant 16 : index
    %c0_27 = arith.constant 0 : index
    %c0_28 = arith.constant 0 : index
    %17 = vector.load %arg7[%c1_25, %c16_26, %c0_27, %c0_28] : memref<3x18x16x4xf32, #tpu.memory_space<vmem>>, vector<1x2x16x4xf32>
    %18 = vector.shape_cast %17 : vector<1x2x16x4xf32> to vector<2x16x4xf32>
    %19 = vector.shape_cast %16 : vector<2x16x4xf32> to vector<1x2x16x4xf32>
    tpu.vector_store %arg7[%c1_25, %c16_26, %c0_27, %c0_28], %19 {strides = array<i32>} : memref<3x18x16x4xf32, #tpu.memory_space<vmem>>, vector<1x2x16x4xf32>,
    %c0_29 = arith.constant 0 : index
    %c0_30 = arith.constant 0 : index
    %c2 = arith.constant 2 : index
    %c0_31 = arith.constant 0 : index
    %20 = vector.load %arg2[%c0_29, %c0_30, %c2, %c0_31] : memref<1x16x18x4xf32, #tpu.memory_space<vmem>>, vector<1x16x16x4xf32>
    %21 = vector.shape_cast %20 : vector<1x16x16x4xf32> to vector<16x16x4xf32>
    %c2_32 = arith.constant 2 : index
    %c0_33 = arith.constant 0 : index
    %c0_34 = arith.constant 0 : index
    %c0_35 = arith.constant 0 : index
    %22 = vector.load %arg7[%c2_32, %c0_33, %c0_34, %c0_35] : memref<3x18x16x4xf32, #tpu.memory_space<vmem>>, vector<1x16x16x4xf32>
    %23 = vector.shape_cast %22 : vector<1x16x16x4xf32> to vector<16x16x4xf32>
    %24 = vector.shape_cast %21 : vector<16x16x4xf32> to vector<1x16x16x4xf32>
    tpu.vector_store %arg7[%c2_32, %c0_33, %c0_34, %c0_35], %24 {strides = array<i32>} : memref<3x18x16x4xf32, #tpu.memory_space<vmem>>, vector<1x16x16x4xf32>,
    %c0_36 = arith.constant 0 : index
    %c0_37 = arith.constant 0 : index
    %c2_38 = arith.constant 2 : index
    %c0_39 = arith.constant 0 : index
    %25 = vector.load %arg3[%c0_36, %c0_37, %c2_38, %c0_39] : memref<1x2x18x4xf32, #tpu.memory_space<vmem>>, vector<1x2x16x4xf32>
    %26 = vector.shape_cast %25 : vector<1x2x16x4xf32> to vector<2x16x4xf32>
    %c2_40 = arith.constant 2 : index
    %c16_41 = arith.constant 16 : index
    %c0_42 = arith.constant 0 : index
    %c0_43 = arith.constant 0 : index
    %27 = vector.load %arg7[%c2_40, %c16_41, %c0_42, %c0_43] : memref<3x18x16x4xf32, #tpu.memory_space<vmem>>, vector<1x2x16x4xf32>
    %28 = vector.shape_cast %27 : vector<1x2x16x4xf32> to vector<2x16x4xf32>
    %29 = vector.shape_cast %26 : vector<2x16x4xf32> to vector<1x2x16x4xf32>
    tpu.vector_store %arg7[%c2_40, %c16_41, %c0_42, %c0_43], %29 {strides = array<i32>} : memref<3x18x16x4xf32, #tpu.memory_space<vmem>>, vector<1x2x16x4xf32>,
    %c0_44 = arith.constant 0 : index
    %c0_45 = arith.constant 0 : index
    %c0_46 = arith.constant 0 : index
    %c0_47 = arith.constant 0 : index
    %30 = vector.load %arg7[%c0_44, %c0_45, %c0_46, %c0_47] : memref<3x18x16x4xf32, #tpu.memory_space<vmem>>, vector<1x16x16x4xf32>
    %31 = vector.shape_cast %30 : vector<1x16x16x4xf32> to vector<16x16x4xf32>
    %32 = vector.shape_cast %31 : vector<16x16x4xf32> to vector<256x4xf32>
    %c0_48 = arith.constant 0 : index
    %c0_49 = arith.constant 0 : index
    %c0_50 = arith.constant 0 : index
    %33 = vector.load %arg4[%c0_48, %c0_49, %c0_50] : memref<9x4x32xf32, #tpu.memory_space<vmem>>, vector<1x4x32xf32>
    %34 = vector.shape_cast %33 : vector<1x4x32xf32> to vector<4x32xf32>
    %cst = arith.constant dense<0.000000e+00> : vector<256x32xf32>
    %35 = tpu.matmul %32, %34, %cst {dimension_numbers = #tpu.dot_dimension_numbers<[1], [0], [0], [1], [0, 0, 1, 1], [], []>} : vector<256x4xf32>, vector<4x32xf32>, vector<256x32xf32> -> vector<256x32xf32>
    %c1_51 = arith.constant 1 : index
    %c0_52 = arith.constant 0 : index
    %c0_53 = arith.constant 0 : index
    %c0_54 = arith.constant 0 : index
    %36 = vector.load %arg7[%c1_51, %c0_52, %c0_53, %c0_54] : memref<3x18x16x4xf32, #tpu.memory_space<vmem>>, vector<1x16x16x4xf32>
    %37 = vector.shape_cast %36 : vector<1x16x16x4xf32> to vector<16x16x4xf32>
    %38 = vector.shape_cast %37 : vector<16x16x4xf32> to vector<256x4xf32>
    %c1_55 = arith.constant 1 : index
    %c0_56 = arith.constant 0 : index
    %c0_57 = arith.constant 0 : index
    %39 = vector.load %arg4[%c1_55, %c0_56, %c0_57] : memref<9x4x32xf32, #tpu.memory_space<vmem>>, vector<1x4x32xf32>
    %40 = vector.shape_cast %39 : vector<1x4x32xf32> to vector<4x32xf32>
    %cst_58 = arith.constant dense<0.000000e+00> : vector<256x32xf32>
    %41 = tpu.matmul %38, %40, %cst_58 {dimension_numbers = #tpu.dot_dimension_numbers<[1], [0], [0], [1], [0, 0, 1, 1], [], []>} : vector<256x4xf32>, vector<4x32xf32>, vector<256x32xf32> -> vector<256x32xf32>
    %42 = arith.addf %35, %41 : vector<256x32xf32>
    %c2_59 = arith.constant 2 : index
    %c0_60 = arith.constant 0 : index
    %c0_61 = arith.constant 0 : index
    %c0_62 = arith.constant 0 : index
    %43 = vector.load %arg7[%c2_59, %c0_60, %c0_61, %c0_62] : memref<3x18x16x4xf32, #tpu.memory_space<vmem>>, vector<1x16x16x4xf32>
    %44 = vector.shape_cast %43 : vector<1x16x16x4xf32> to vector<16x16x4xf32>
    %45 = vector.shape_cast %44 : vector<16x16x4xf32> to vector<256x4xf32>
    %c2_63 = arith.constant 2 : index
    %c0_64 = arith.constant 0 : index
    %c0_65 = arith.constant 0 : index
    %46 = vector.load %arg4[%c2_63, %c0_64, %c0_65] : memref<9x4x32xf32, #tpu.memory_space<vmem>>, vector<1x4x32xf32>
    %47 = vector.shape_cast %46 : vector<1x4x32xf32> to vector<4x32xf32>
    %cst_66 = arith.constant dense<0.000000e+00> : vector<256x32xf32>
    %48 = tpu.matmul %45, %47, %cst_66 {dimension_numbers = #tpu.dot_dimension_numbers<[1], [0], [0], [1], [0, 0, 1, 1], [], []>} : vector<256x4xf32>, vector<4x32xf32>, vector<256x32xf32> -> vector<256x32xf32>
    %49 = arith.addf %42, %48 : vector<256x32xf32>
    %c0_67 = arith.constant 0 : index
    %c1_68 = arith.constant 1 : index
    %c0_69 = arith.constant 0 : index
    %c0_70 = arith.constant 0 : index
    %50 = vector.load %arg7[%c0_67, %c1_68, %c0_69, %c0_70] : memref<3x18x16x4xf32, #tpu.memory_space<vmem>>, vector<1x16x16x4xf32>
    %51 = vector.shape_cast %50 : vector<1x16x16x4xf32> to vector<16x16x4xf32>
    %52 = vector.shape_cast %51 : vector<16x16x4xf32> to vector<256x4xf32>
    %c3 = arith.constant 3 : index
    %c0_71 = arith.constant 0 : index
    %c0_72 = arith.constant 0 : index
    %53 = vector.load %arg4[%c3, %c0_71, %c0_72] : memref<9x4x32xf32, #tpu.memory_space<vmem>>, vector<1x4x32xf32>
    %54 = vector.shape_cast %53 : vector<1x4x32xf32> to vector<4x32xf32>
    %cst_73 = arith.constant dense<0.000000e+00> : vector<256x32xf32>
    %55 = tpu.matmul %52, %54, %cst_73 {dimension_numbers = #tpu.dot_dimension_numbers<[1], [0], [0], [1], [0, 0, 1, 1], [], []>} : vector<256x4xf32>, vector<4x32xf32>, vector<256x32xf32> -> vector<256x32xf32>
    %56 = arith.addf %49, %55 : vector<256x32xf32>
    %c1_74 = arith.constant 1 : index
    %c1_75 = arith.constant 1 : index
    %c0_76 = arith.constant 0 : index
    %c0_77 = arith.constant 0 : index
    %57 = vector.load %arg7[%c1_74, %c1_75, %c0_76, %c0_77] : memref<3x18x16x4xf32, #tpu.memory_space<vmem>>, vector<1x16x16x4xf32>
    %58 = vector.shape_cast %57 : vector<1x16x16x4xf32> to vector<16x16x4xf32>
    %59 = vector.shape_cast %58 : vector<16x16x4xf32> to vector<256x4xf32>
    %c4 = arith.constant 4 : index
    %c0_78 = arith.constant 0 : index
    %c0_79 = arith.constant 0 : index
    %60 = vector.load %arg4[%c4, %c0_78, %c0_79] : memref<9x4x32xf32, #tpu.memory_space<vmem>>, vector<1x4x32xf32>
    %61 = vector.shape_cast %60 : vector<1x4x32xf32> to vector<4x32xf32>
    %cst_80 = arith.constant dense<0.000000e+00> : vector<256x32xf32>
    %62 = tpu.matmul %59, %61, %cst_80 {dimension_numbers = #tpu.dot_dimension_numbers<[1], [0], [0], [1], [0, 0, 1, 1], [], []>} : vector<256x4xf32>, vector<4x32xf32>, vector<256x32xf32> -> vector<256x32xf32>
    %63 = arith.addf %56, %62 : vector<256x32xf32>
    %c2_81 = arith.constant 2 : index
    %c1_82 = arith.constant 1 : index
    %c0_83 = arith.constant 0 : index
    %c0_84 = arith.constant 0 : index
    %64 = vector.load %arg7[%c2_81, %c1_82, %c0_83, %c0_84] : memref<3x18x16x4xf32, #tpu.memory_space<vmem>>, vector<1x16x16x4xf32>
    %65 = vector.shape_cast %64 : vector<1x16x16x4xf32> to vector<16x16x4xf32>
    %66 = vector.shape_cast %65 : vector<16x16x4xf32> to vector<256x4xf32>
    %c5 = arith.constant 5 : index
    %c0_85 = arith.constant 0 : index
    %c0_86 = arith.constant 0 : index
    %67 = vector.load %arg4[%c5, %c0_85, %c0_86] : memref<9x4x32xf32, #tpu.memory_space<vmem>>, vector<1x4x32xf32>
    %68 = vector.shape_cast %67 : vector<1x4x32xf32> to vector<4x32xf32>
    %cst_87 = arith.constant dense<0.000000e+00> : vector<256x32xf32>
    %69 = tpu.matmul %66, %68, %cst_87 {dimension_numbers = #tpu.dot_dimension_numbers<[1], [0], [0], [1], [0, 0, 1, 1], [], []>} : vector<256x4xf32>, vector<4x32xf32>, vector<256x32xf32> -> vector<256x32xf32>
    %70 = arith.addf %63, %69 : vector<256x32xf32>
    %c0_88 = arith.constant 0 : index
    %c2_89 = arith.constant 2 : index
    %c0_90 = arith.constant 0 : index
    %c0_91 = arith.constant 0 : index
    %71 = vector.load %arg7[%c0_88, %c2_89, %c0_90, %c0_91] : memref<3x18x16x4xf32, #tpu.memory_space<vmem>>, vector<1x16x16x4xf32>
    %72 = vector.shape_cast %71 : vector<1x16x16x4xf32> to vector<16x16x4xf32>
    %73 = vector.shape_cast %72 : vector<16x16x4xf32> to vector<256x4xf32>
    %c6 = arith.constant 6 : index
    %c0_92 = arith.constant 0 : index
    %c0_93 = arith.constant 0 : index
    %74 = vector.load %arg4[%c6, %c0_92, %c0_93] : memref<9x4x32xf32, #tpu.memory_space<vmem>>, vector<1x4x32xf32>
    %75 = vector.shape_cast %74 : vector<1x4x32xf32> to vector<4x32xf32>
    %cst_94 = arith.constant dense<0.000000e+00> : vector<256x32xf32>
    %76 = tpu.matmul %73, %75, %cst_94 {dimension_numbers = #tpu.dot_dimension_numbers<[1], [0], [0], [1], [0, 0, 1, 1], [], []>} : vector<256x4xf32>, vector<4x32xf32>, vector<256x32xf32> -> vector<256x32xf32>
    %77 = arith.addf %70, %76 : vector<256x32xf32>
    %c1_95 = arith.constant 1 : index
    %c2_96 = arith.constant 2 : index
    %c0_97 = arith.constant 0 : index
    %c0_98 = arith.constant 0 : index
    %78 = vector.load %arg7[%c1_95, %c2_96, %c0_97, %c0_98] : memref<3x18x16x4xf32, #tpu.memory_space<vmem>>, vector<1x16x16x4xf32>
    %79 = vector.shape_cast %78 : vector<1x16x16x4xf32> to vector<16x16x4xf32>
    %80 = vector.shape_cast %79 : vector<16x16x4xf32> to vector<256x4xf32>
    %c7 = arith.constant 7 : index
    %c0_99 = arith.constant 0 : index
    %c0_100 = arith.constant 0 : index
    %81 = vector.load %arg4[%c7, %c0_99, %c0_100] : memref<9x4x32xf32, #tpu.memory_space<vmem>>, vector<1x4x32xf32>
    %82 = vector.shape_cast %81 : vector<1x4x32xf32> to vector<4x32xf32>
    %cst_101 = arith.constant dense<0.000000e+00> : vector<256x32xf32>
    %83 = tpu.matmul %80, %82, %cst_101 {dimension_numbers = #tpu.dot_dimension_numbers<[1], [0], [0], [1], [0, 0, 1, 1], [], []>} : vector<256x4xf32>, vector<4x32xf32>, vector<256x32xf32> -> vector<256x32xf32>
    %84 = arith.addf %77, %83 : vector<256x32xf32>
    %c2_102 = arith.constant 2 : index
    %c2_103 = arith.constant 2 : index
    %c0_104 = arith.constant 0 : index
    %c0_105 = arith.constant 0 : index
    %85 = vector.load %arg7[%c2_102, %c2_103, %c0_104, %c0_105] : memref<3x18x16x4xf32, #tpu.memory_space<vmem>>, vector<1x16x16x4xf32>
    %86 = vector.shape_cast %85 : vector<1x16x16x4xf32> to vector<16x16x4xf32>
    %87 = vector.shape_cast %86 : vector<16x16x4xf32> to vector<256x4xf32>
    %c8 = arith.constant 8 : index
    %c0_106 = arith.constant 0 : index
    %c0_107 = arith.constant 0 : index
    %88 = vector.load %arg4[%c8, %c0_106, %c0_107] : memref<9x4x32xf32, #tpu.memory_space<vmem>>, vector<1x4x32xf32>
    %89 = vector.shape_cast %88 : vector<1x4x32xf32> to vector<4x32xf32>
    %cst_108 = arith.constant dense<0.000000e+00> : vector<256x32xf32>
    %90 = tpu.matmul %87, %89, %cst_108 {dimension_numbers = #tpu.dot_dimension_numbers<[1], [0], [0], [1], [0, 0, 1, 1], [], []>} : vector<256x4xf32>, vector<4x32xf32>, vector<256x32xf32> -> vector<256x32xf32>
    %91 = arith.addf %84, %90 : vector<256x32xf32>
    %c0_109 = arith.constant 0 : index
    %c0_110 = arith.constant 0 : index
    %92 = vector.load %arg5[%c0_109, %c0_110] : memref<1x32xf32, #tpu.memory_space<vmem>>, vector<1x32xf32>
    %93 = vector.broadcast %92 : vector<1x32xf32> to vector<256x32xf32>
    %94 = arith.addf %91, %93 : vector<256x32xf32>
    %cst_111 = arith.constant 0.000000e+00 : f32
    %95 = vector.broadcast %cst_111 : f32 to vector<256x32xf32>
    %96 = arith.maximumf %94, %95 : vector<256x32xf32>
    %97 = vector.shape_cast %96 : vector<256x32xf32> to vector<16x16x32xf32>
    %c0_112 = arith.constant 0 : index
    %c0_113 = arith.constant 0 : index
    %c0_114 = arith.constant 0 : index
    %c0_115 = arith.constant 0 : index
    %98 = vector.load %arg6[%c0_112, %c0_113, %c0_114, %c0_115] : memref<1x16x16x32xf32, #tpu.memory_space<vmem>>, vector<1x16x16x32xf32>
    %99 = vector.shape_cast %98 : vector<1x16x16x32xf32> to vector<16x16x32xf32>
    %100 = vector.shape_cast %97 : vector<16x16x32xf32> to vector<1x16x16x32xf32>
    tpu.vector_store %arg6[%c0_112, %c0_113, %c0_114, %c0_115], %100 {strides = array<i32>} : memref<1x16x16x32xf32, #tpu.memory_space<vmem>>, vector<1x16x16x32xf32>,
    return
  }
  func.func @transform_0(%arg0: i32, %arg1: i32) -> (i32, i32, i32, i32) {
    %c0_i32 = arith.constant 0 : i32
    %c0_i32_0 = arith.constant 0 : i32
    %c0_i32_1 = arith.constant 0 : i32
    return %arg0, %arg1, %c0_i32, %c0_i32_0 : i32, i32, i32, i32
  }
  func.func @transform_1(%arg0: i32, %arg1: i32) -> (i32, i32, i32, i32) {
    %c1_i32 = arith.constant 1 : i32
    %0 = arith.addi %arg1, %c1_i32 : i32
    %c8_i32 = arith.constant 8 : i32
    %1 = arith.muli %0, %c8_i32 : i32
    %c0_i32 = arith.constant 0 : i32
    %c0_i32_0 = arith.constant 0 : i32
    %c0_i32_1 = arith.constant 0 : i32
    return %arg0, %1, %c0_i32, %c0_i32_0 : i32, i32, i32, i32
  }
  func.func @transform_2(%arg0: i32, %arg1: i32) -> (i32, i32, i32) {
    %c0_i32 = arith.constant 0 : i32
    %c0_i32_0 = arith.constant 0 : i32
    %c0_i32_1 = arith.constant 0 : i32
    %c0_i32_2 = arith.constant 0 : i32
    return %c0_i32, %c0_i32_0, %c0_i32_1 : i32, i32, i32
  }
  func.func @transform_3(%arg0: i32, %arg1: i32) -> (i32, i32) {
    %c0_i32 = arith.constant 0 : i32
    %c0_i32_0 = arith.constant 0 : i32
    %c0_i32_1 = arith.constant 0 : i32
    return %c0_i32, %c0_i32_0 : i32, i32
  }
  func.func @transform_4(%arg0: i32, %arg1: i32) -> (i32, i32, i32, i32) {
    %c0_i32 = arith.constant 0 : i32
    %c0_i32_0 = arith.constant 0 : i32
    %c0_i32_1 = arith.constant 0 : i32
    return %arg0, %arg1, %c0_i32, %c0_i32_0 : i32, i32, i32, i32
  }
}

</mosaic_0001>

<bundles_post_ra>
// kernel: tpu_custom_call.1
= control target key start
LH: loop header
LB: loop body
LE: loop exit
PB: predicated region body
PF: predicated region fallthrough
CT: control target
= control target key end

     0   :  { %9 = vsyncpa [#allocation4], 0  ;;  %s7148_s0 = inlined_call_operand.vmem [shape: f32[2,18,18,4], index: 0, kind: input, shape index: {}]   ;;  %s7149_s1 = inlined_call_operand.vmem [shape: f32[2,18,18,4], index: 1, kind: input, shape index: {}]   ;;  %s7150_s2 = inlined_call_operand.vmem [shape: f32[9,4,32], index: 2, kind: input, shape index: {}]   ;;  %s7151_s3 = inlined_call_operand.vmem [shape: f32[1,32], index: 3, kind: input, shape index: {}]   ;;  %s7152_s4 = inlined_call_operand.hbm [shape: f32[2,16,16,32], index: 4, kind: output, shape index: {}]  }
   0x1   :  { %11 = vsyncpa [#allocation4 + $0x1], 0  ;;  %s5443_s15 = smov 0   ;;  %s5445_s16 = smov 0  }
   0x2   :  { %s5447_s17 = smov 0   ;;  %s5449_s18 = smov 0  }
   0x3   :  { %s5451_s19 = smov 0   ;;  %s5453_s20 = smov 0  }
   0x4 LB: > { %s4206_s21 = sadd.s32 4294967295, %s5413_s20   ;;  %s4207_s22 = sadd.s32 4294967294, %s5413_s20   ;;  %s5413_s20 = sphi %s5453_s20, %s17_s20   ;;  %s5409_s19 = sphi %s5451_s19, %s7329_s19   ;;  %s5405_s18 = sphi %s5449_s18, %s7328_s18   ;;  %s5401_s17 = sphi %s5447_s17, %s7327_s17   ;;  %s5397_s16 = sphi %s5445_s16, %s7326_s16   ;;  %s5393_s15 = sphi %s5443_s15, %s7325_s15  }
   0x5   : > { %s29_s23 = sadd.s32 1, %s5409_s19  ;;  %s140_s24 = sadd.s32 1, %s5401_s17 }
   0x6   : > { %p31_p0 = scmp.ge.s32.totalorder %s29_s23, 2  ;;  %p150_p1 = scmp.ne.s32.totalorder %s5401_s17, %s5397_s16 }
   0x7   : > { %p151_p2 = scmp.eq.s32.totalorder %s4206_s21, 1  ;;  %p156_p3 = scmp.ne.s32.totalorder %s5397_s16, %s5393_s15 }
   0x8   : > { %s7331_s23 = smov (%p31_p0, %s29_s23), 0  ;;  %p157_p5 = scmp.eq.s32.totalorder %s4207_s22, 1 }
   0x9   : > { %p5483_p4 = por %p151_p2, %p150_p1  ;;  %s135_s26 = ssub.s32 %s5409_s19, %s7331_s23 }
   0xa   : > { %p4210_p6 = scmp.ge.s32.totalorder %s5413_s20, 1  ;;  %p138_p7 = scmp.eq.s32.totalorder %s135_s26, 0 }
   0xb   : > { %p5490_p8 = por %p157_p5, %p156_p3  ;;  %p223_p9 = scmp.lt.s32.totalorder %s5413_s20, 3 }
   0xc   : > { %s5496_s28 = scalar_select %p138_p7, %s5401_s17, %s140_s24  }
   0xd   : > { %p224_p10 = pnand %p4210_p6, %p223_p9 }
   0xf   : > { %227 = sbr.rel (%p224_p10) target bundleno = 544 (0x220), region = 36 }
  0x14   : > { %v4214_v0 = vld [vmem:[%s7150_s2 + $0x4] sm:$0xf]  ;;  %vm693_vm0 = vcmask 1043456   ;;  %p277_p11 = scmp.lt.s32.totalorder %s5405_s18, 1  ;;  %v5507_v1 = vld [vmem:[%s7150_s2] sm:$0xf] }
  0x15   : > { %5275 = vmatprep.subr.msk.mxu1 %vm693_vm0, %v4214_v0  ;;  %4825 = vmatprep.subr.msk.mxu0 %vm693_vm0, %v4214_v0  ;;  %v5512_v2 = vld [vmem:[%s7150_s2 + $0x8] sm:$0xf]  ;;  %vm340_vm1 = vcmask 31744   ;;  %v5596_v33 = vld [vmem:[%s7150_s2 + $0xc] sm:$0xf]  ;;  %s268_s14 = sand.u32 1, %s5397_s16  }
  0x16   : > { %5276 = vmatpush3.msk.msra.mxu1 %vm693_vm0, %v4214_v0  ;;  %4826 = vmatpush3.msk.msra.mxu0 %vm693_vm0, %v4214_v0  ;;  %s5517_s9 = scalar_select %p277_p11, %s5405_s18, 1  ;;  %v5601_v34 = vld [vmem:[%s7150_s2 + $0x10] sm:$0xf]  ;;  %vm4053_vm2 = vcmask 261120  }
  0x17   : > { %4875 = vmatprep.subr.msk.mxu1 %vm693_vm0, %v5507_v1  ;;  %4925 = vmatprep.subr.msk.mxu0 %vm693_vm0, %v5512_v2  ;;  %s4211_s24 = sshll.u32 %s268_s14, 8  ;;  %s4527_s29 = sshll.u32 %s5405_s18, 12 }
  0x18   : > { %s5277_s10 = smul.u32 432, %s5517_s9  ;;  %s6922_s26 = scalar_lea.vmem [#allocation3], %s4211_s24 }
  0x19   : > { %s4103_s30 = sshll.u32 %s6922_s26, 4  ;;  %s7093_s7 = scalar_lea.hbm %s7152_s4, %s4527_s29  ;;  %s7095_s30 = int_to_ptr.vmem [resolvable:$true] %s4103_s30 }
  0x1a   : > { %s5529_s13 = scalar_lea.vmem %s7148_s0, %s5277_s10  ;;  %s4526_s6 = sadd.s32 384, %s5277_s10 }
  0x1b   : > { %v382_v3 = vld [vmem:[%s5529_s13 + $0x1] sm:$0xff]  ;;  %v383_v5 = vld [vmem:[%s5529_s13 + $0x9] sm:$0xff]  ;;  %v384_v7 = vld [vmem:[%s5529_s13 + $0x19] sm:$0xff]  ;;  %s5970_s11 = scalar_lea.vmem %s7149_s1, %s4526_s6  ;;  %s7103_s18 = scalar_lea.sflag [#allocation4], %s268_s14 }
  0x1c   : > { %v398_v4 = vld [vmem:[%s5529_s13 + $0xc1] sm:$0xff]  ;;  %415 = vst.msk [vmem:[#allocation2 + $0x120] sm:$0xff] %vm340_vm1, %v382_v3  ;;  %416 = vst.msk [vmem:[#allocation2 + $0x128] sm:$0xff] %vm340_vm1, %v383_v5  ;;  %v399_v6 = vld [vmem:[%s5529_s13 + $0xc9] sm:$0xff]  ;;  %s5337_s8 = scalar_lea.vmem %s7095_s30, 4096 }
  0x1d   : > { %431 = vst.msk [vmem:[#allocation2 + $0x1a0] sm:$0xff] %vm340_vm1, %v398_v4  ;;  %v400_v8 = vld [vmem:[%s5529_s13 + $0xd9] sm:$0xff]  ;;  %432 = vst.msk [vmem:[#allocation2 + $0x1a8] sm:$0xff] %vm340_vm1, %v399_v6  ;;  %v385_v9 = vld [vmem:[%s5529_s13 + $0x21] sm:$0xff]  ;;  %p5338_p12 = scmp.ne.s32.totalorder %s7095_s30, %s5337_s8 }
  0x1e   : > { %417 = vst.msk [vmem:[#allocation2 + $0x130] sm:$0xff] %vm340_vm1, %v384_v7  ;;  %433 = vst.msk [vmem:[#allocation2 + $0x1b0] sm:$0xff] %vm340_vm1, %v400_v8  ;;  %v401_v10 = vld [vmem:[%s5529_s13 + $0xe1] sm:$0xff]  ;;  %v386_v11 = vld [vmem:[%s5529_s13 + $0x31] sm:$0xff] }
  0x1f   : > { %418 = vst.msk [vmem:[#allocation2 + $0x138] sm:$0xff] %vm340_vm1, %v385_v9  ;;  %434 = vst.msk [vmem:[#allocation2 + $0x1b8] sm:$0xff] %vm340_vm1, %v401_v10  ;;  %v402_v12 = vld [vmem:[%s5529_s13 + $0xf1] sm:$0xff]  ;;  %v387_v13 = vld [vmem:[%s5529_s13 + $0x39] sm:$0xff]  ;;  %p5339_p13 = pnand %p5338_p12, %p5483_p4 }
  0x20   : > { %419 = vst.msk [vmem:[#allocation2 + $0x140] sm:$0xff] %vm340_vm1, %v386_v11  ;;  %v403_v14 = vld [vmem:[%s5529_s13 + $0xf9] sm:$0xff]  ;;  %435 = vst.msk [vmem:[#allocation2 + $0x1c0] sm:$0xff] %vm340_vm1, %v402_v12  ;;  %v388_v15 = vld [vmem:[%s5529_s13 + $0x49] sm:$0xff] }
  0x21   : > { %420 = vst.msk [vmem:[#allocation2 + $0x148] sm:$0xff] %vm340_vm1, %v387_v13  ;;  %436 = vst.msk [vmem:[#allocation2 + $0x1c8] sm:$0xff] %vm340_vm1, %v403_v14  ;;  %v404_v16 = vld [vmem:[%s5529_s13 + $0x109] sm:$0xff]  ;;  %v389_v17 = vld [vmem:[%s5529_s13 + $0x51] sm:$0xff]  ;;  %p5340_p0 = pneg %p5339_p13 }
  0x22   : > { %421 = vst.msk [vmem:[#allocation2 + $0x150] sm:$0xff] %vm340_vm1, %v388_v15  ;;  %437 = vst.msk [vmem:[#allocation2 + $0x1d0] sm:$0xff] %vm340_vm1, %v404_v16  ;;  %v405_v18 = vld [vmem:[%s5529_s13 + $0x111] sm:$0xff]  ;;  %v390_v19 = vld [vmem:[%s5529_s13 + $0x61] sm:$0xff] }
  0x23   : > { %422 = vst.msk [vmem:[#allocation2 + $0x158] sm:$0xff] %vm340_vm1, %v389_v17  ;;  %v406_v20 = vld [vmem:[%s5529_s13 + $0x121] sm:$0xff]  ;;  %438 = vst.msk [vmem:[#allocation2 + $0x1d8] sm:$0xff] %vm340_vm1, %v405_v18  ;;  %v391_v21 = vld [vmem:[%s5529_s13 + $0x69] sm:$0xff] }
  0x24   : > { %423 = vst.msk [vmem:[#allocation2 + $0x160] sm:$0xff] %vm340_vm1, %v390_v19  ;;  %439 = vst.msk [vmem:[#allocation2 + $0x1e0] sm:$0xff] %vm340_vm1, %v406_v20  ;;  %v407_v22 = vld [vmem:[%s5529_s13 + $0x129] sm:$0xff]  ;;  %v392_v23 = vld [vmem:[%s5529_s13 + $0x79] sm:$0xff] }
  0x25   : > { %424 = vst.msk [vmem:[#allocation2 + $0x168] sm:$0xff] %vm340_vm1, %v391_v21  ;;  %440 = vst.msk [vmem:[#allocation2 + $0x1e8] sm:$0xff] %vm340_vm1, %v407_v22  ;;  %v408_v24 = vld [vmem:[%s5529_s13 + $0x139] sm:$0xff]  ;;  %v393_v25 = vld [vmem:[%s5529_s13 + $0x81] sm:$0xff] }
  0x26   : > { %425 = vst.msk [vmem:[#allocation2 + $0x170] sm:$0xff] %vm340_vm1, %v392_v23  ;;  %v409_v26 = vld [vmem:[%s5529_s13 + $0x141] sm:$0xff]  ;;  %441 = vst.msk [vmem:[#allocation2 + $0x1f0] sm:$0xff] %vm340_vm1, %v408_v24  ;;  %v5586_v31 = vld [vmem:[#allocation2 + $0x130] sm:$0xff] }
  0x27   : > { %v563_v27 = vld [vmem:[#allocation2 + $0x120] sm:$0xff]  ;;  %v564_v29 = vld [vmem:[#allocation2 + $0x128] sm:$0xff]  ;;  %426 = vst.msk [vmem:[#allocation2 + $0x178] sm:$0xff] %vm340_vm1, %v393_v25  ;;  %442 = vst.msk [vmem:[#allocation2 + $0x1f8] sm:$0xff] %vm340_vm1, %v409_v26 }
  0x28   : > { %v5576_v28 = vld [vmem:[#allocation2 + $0x1a0] sm:$0xff]  ;;  %4827 = vmatprep.mubr.msk.f32.mxu0 %vm340_vm1, %v563_v27  ;;  %v5584_v30 = vld [vmem:[#allocation2 + $0x1a8] sm:$0xff]  ;;  %v5588_v32 = vld [vmem:[#allocation2 + $0x1b0] sm:$0xff] }
  0x29   : > { %4851 = vmatprep.mubr.msk.f32.mxu1 %vm340_vm1, %v5576_v28  ;;  %4828 = vmatmul.mubr.msk.f32.vlgmr.msra.gmra.mxu0 %vm340_vm1, %v564_v29  ;;  %v5607_v35 = vld [vmem:[#allocation2 + $0x138] sm:$0xff]  ;;  %v5615_v37 = vld [vmem:[#allocation2 + $0x140] sm:$0xff]  ;;  %v5627_v39 = vld [vmem:[#allocation2 + $0x148] sm:$0xff] }
  0x2a   : > { %4852 = vmatmul.mubr.msk.f32.vlgmr.msra.gmra.mxu1 %vm340_vm1, %v5584_v30  ;;  %4926 = vmatpush3.msk.msra.mxu0 %vm693_vm0, %v5512_v2  ;;  %v5609_v36 = vld [vmem:[#allocation2 + $0x1b8] sm:$0xff]  ;;  %v5617_v38 = vld [vmem:[#allocation2 + $0x1c0] sm:$0xff]  ;;  %v5633_v40 = vld [vmem:[#allocation2 + $0x1c8] sm:$0xff] }
  0x2b   : > { %4876 = vmatpush3.msk.msra.mxu1 %vm693_vm0, %v5507_v1  ;;  %4830 = vmatprep.mubr.msk.f32.mxu0 %vm340_vm1, %v5586_v31  ;;  %v5635_v41 = vld [vmem:[#allocation2 + $0x150] sm:$0xff]  ;;  %v395_v45 = vld [vmem:[%s5529_s13 + $0x99] sm:$0xff]  ;;  %v456_v56 = vld [vmem:[%s5529_s13 + $0x2] sm:$0xff] }
  0x2c   : > { %4854 = vmatprep.mubr.msk.f32.mxu1 %vm340_vm1, %v5588_v32  ;;  %4975 = vmatprep.subr.msk.mxu1 %vm693_vm0, %v5596_v33  ;;  %v5637_v42 = vld [vmem:[#allocation2 + $0x1d0] sm:$0xff]  ;;  %v5642_v46 = vld [vmem:[#allocation2 + $0x158] sm:$0xff]  ;;  %428 = vst.msk [vmem:[#allocation2 + $0x188] sm:$0xff] %vm340_vm1, %v395_v45  ;;  %v5656_v51 = vld [vmem:[#allocation2 + $0x160] sm:$0xff] }
  0x2d   : > { %5025 = vmatprep.subr.msk.mxu0 %vm693_vm0, %v5601_v34  ;;  %4831 = vmatmul.mubr.msk.f32.gmra.mxu0 %vm340_vm1, %v5607_v35  ;;  %v394_v43 = vld [vmem:[%s5529_s13 + $0x91] sm:$0xff]  ;;  %v411_v48 = vld [vmem:[%s5529_s13 + $0x159] sm:$0xff]  ;;  %v396_v49 = vld [vmem:[%s5529_s13 + $0xa9] sm:$0xff]  ;;  %489 = vst.msk [vmem:[#allocation2 + $0x240] sm:$0xff] %vm340_vm1, %v456_v56 }
  0x2e   : > { %4855 = vmatmul.mubr.msk.f32.gmra.mxu1 %vm340_vm1, %v5609_v36  ;;  %4833 = vmatprep.mubr.msk.f32.mxu0 %vm340_vm1, %v5615_v37  ;;  %v410_v44 = vld [vmem:[%s5529_s13 + $0x151] sm:$0xff]  ;;  %427 = vst.msk [vmem:[#allocation2 + $0x180] sm:$0xff] %vm340_vm1, %v394_v43  ;;  %v412_v50 = vld [vmem:[%s5529_s13 + $0x169] sm:$0xff]  ;;  %v5658_v52 = vld [vmem:[#allocation2 + $0x1e0] sm:$0xff] }
  0x2f   : > { %4857 = vmatprep.mubr.msk.f32.mxu1 %vm340_vm1, %v5617_v38  ;;  %v5644_v47 = vld [vmem:[#allocation2 + $0x1d8] sm:$0xff]  ;;  %443 = vst.msk [vmem:[#allocation2 + $0x200] sm:$0xff] %vm340_vm1, %v410_v44  ;;  %444 = vst.msk [vmem:[#allocation2 + $0x208] sm:$0xff] %vm340_vm1, %v411_v48  ;;  %v308_v55 = vld [vmem:[%s5529_s13] sm:$0xff] }
  0x30   : > { %429 = vst.msk [vmem:[#allocation2 + $0x190] sm:$0xff] %vm340_vm1, %v396_v49  ;;  %445 = vst.msk [vmem:[#allocation2 + $0x210] sm:$0xff] %vm340_vm1, %v412_v50  ;;  %v397_v53 = vld [vmem:[%s5529_s13 + $0xb1] sm:$0xff]  ;;  %v309_v57 = vld [vmem:[%s5529_s13 + $0x8] sm:$0xff] }
  0x31   : > { %4834 = vmatmul.mubr.msk.f32.gmra.mxu0 %vm340_vm1, %v5627_v39  ;;  %v413_v54 = vld [vmem:[%s5529_s13 + $0x171] sm:$0xff]  ;;  %430 = vst.msk [vmem:[#allocation2 + $0x198] sm:$0xff] %vm340_vm1, %v397_v53  ;;  %341 = vst.msk [vmem:[#allocation2] sm:$0xff] %vm340_vm1, %v308_v55  ;;  %v458_v60 = vld [vmem:[%s5529_s13 + $0x1a] sm:$0xff] }
  0x32   : > { %4858 = vmatmul.mubr.msk.f32.gmra.mxu1 %vm340_vm1, %v5633_v40  ;;  %4836 = vmatprep.mubr.msk.f32.mxu0 %vm340_vm1, %v5635_v41  ;;  %446 = vst.msk [vmem:[#allocation2 + $0x218] sm:$0xff] %vm340_vm1, %v413_v54  ;;  %v457_v58 = vld [vmem:[%s5529_s13 + $0xa] sm:$0xff]  ;;  %342 = vst.msk [vmem:[#allocation2 + $0x8] sm:$0xff] %vm340_vm1, %v309_v57  ;;  %v310_v59 = vld [vmem:[%s5529_s13 + $0x18] sm:$0xff] }
  0x33   : > { %4860 = vmatprep.mubr.msk.f32.mxu1 %vm340_vm1, %v5637_v42  ;;  %490 = vst.msk [vmem:[#allocation2 + $0x248] sm:$0xff] %vm340_vm1, %v457_v58  ;;  %v311_v61 = vld [vmem:[%s5529_s13 + $0x20] sm:$0xff]  ;;  %v5682_v62 = vld [vmem:[#allocation2 + $0x168] sm:$0xff]  ;;  %343 = vst.msk [vmem:[#allocation2 + $0x10] sm:$0xff] %vm340_vm1, %v310_v59 }
  0x34   : > { %v5684_v63 = vld [vmem:[#allocation2 + $0x1e8] sm:$0xff]  ;;  %491 = vst.msk [vmem:[#allocation2 + $0x250] sm:$0xff] %vm340_vm1, %v458_v60  ;;  %344 = vst.msk [vmem:[#allocation2 + $0x18] sm:$0xff] %vm340_vm1, %v311_v61  ;;  %v312_v1 = vld [vmem:[%s5529_s13 + $0x30] sm:$0xff] }
  0x35   : > { %v459_v0 = vld [vmem:[%s5529_s13 + $0x22] sm:$0xff]  ;;  %v460_v2 = vld [vmem:[%s5529_s13 + $0x32] sm:$0xff]  ;;  %4837 = vmatmul.mubr.msk.f32.gmra.mxu0 %vm340_vm1, %v5642_v46  ;;  %345 = vst.msk [vmem:[#allocation2 + $0x20] sm:$0xff] %vm340_vm1, %v312_v1  ;;  %v461_v4 = vld [vmem:[%s5529_s13 + $0x3a] sm:$0xff] }
  0x36   : > { %4861 = vmatmul.mubr.msk.f32.gmra.mxu1 %vm340_vm1, %v5644_v47  ;;  %492 = vst.msk [vmem:[#allocation2 + $0x258] sm:$0xff] %vm340_vm1, %v459_v0  ;;  %493 = vst.msk [vmem:[#allocation2 + $0x260] sm:$0xff] %vm340_vm1, %v460_v2  ;;  %v313_v3 = vld [vmem:[%s5529_s13 + $0x38] sm:$0xff]  ;;  %v314_v5 = vld [vmem:[%s5529_s13 + $0x48] sm:$0xff]  ;;  %4839 = vmatprep.mubr.msk.f32.mxu0 %vm340_vm1, %v5656_v51 }
  0x37   : > { %4863 = vmatprep.mubr.msk.f32.mxu1 %vm340_vm1, %v5658_v52  ;;  %346 = vst.msk [vmem:[#allocation2 + $0x28] sm:$0xff] %vm340_vm1, %v313_v3  ;;  %494 = vst.msk [vmem:[#allocation2 + $0x268] sm:$0xff] %vm340_vm1, %v461_v4  ;;  %v462_v6 = vld [vmem:[%s5529_s13 + $0x4a] sm:$0xff]  ;;  %v463_v8 = vld [vmem:[%s5529_s13 + $0x52] sm:$0xff] }
  0x38   : > { %347 = vst.msk [vmem:[#allocation2 + $0x30] sm:$0xff] %vm340_vm1, %v314_v5  ;;  %v315_v7 = vld [vmem:[%s5529_s13 + $0x50] sm:$0xff]  ;;  %495 = vst.msk [vmem:[#allocation2 + $0x270] sm:$0xff] %vm340_vm1, %v462_v6  ;;  %v5727_v11 = vld [vmem:[#allocation2 + $0x178] sm:$0xff] }
  0x39   : > { %v5712_v9 = vld [vmem:[#allocation2 + $0x170] sm:$0xff]  ;;  %348 = vst.msk [vmem:[#allocation2 + $0x38] sm:$0xff] %vm340_vm1, %v315_v7  ;;  %496 = vst.msk [vmem:[#allocation2 + $0x278] sm:$0xff] %vm340_vm1, %v463_v8  ;;  %4840 = vmatmul.mubr.msk.f32.gmra.mxu0 %vm340_vm1, %v5682_v62  ;;  %v5729_v12 = vld [vmem:[#allocation2 + $0x1f8] sm:$0xff] }
  0x3a   : > { %v5714_v10 = vld [vmem:[#allocation2 + $0x1f0] sm:$0xff]  ;;  %4864 = vmatmul.mubr.msk.f32.gmra.mxu1 %vm340_vm1, %v5684_v63  ;;  %4842 = vmatprep.mubr.msk.f32.mxu0 %vm340_vm1, %v5712_v9  ;;  %v5731_v13 = vld [vmem:[#allocation2 + $0x180] sm:$0xff]  ;;  %v5739_v15 = vld [vmem:[#allocation2 + $0x188] sm:$0xff] }
  0x3b   : > { %4866 = vmatprep.mubr.msk.f32.mxu1 %vm340_vm1, %v5714_v10  ;;  %v5733_v14 = vld [vmem:[#allocation2 + $0x200] sm:$0xff]  ;;  %v5745_v16 = vld [vmem:[#allocation2 + $0x208] sm:$0xff]  ;;  %v5747_v17 = vld [vmem:[#allocation2 + $0x190] sm:$0xff] }
  0x3c   : > { %7185 = vst [vmem:[#allocation6_spill] sm:$0xff] %v5745_v16  ;;  %v5749_v18 = vld [vmem:[#allocation2 + $0x210] sm:$0xff]  ;;  %v316_v19 = vld [vmem:[%s5529_s13 + $0x60] sm:$0xff]  ;;  %v317_v21 = vld [vmem:[%s5529_s13 + $0x68] sm:$0xff] }
  0x3d   : > { %4843 = vmatmul.mubr.msk.f32.gmra.mxu0 %vm340_vm1, %v5727_v11  ;;  %7186 = vst [vmem:[#allocation7_spill] sm:$0xff] %v5749_v18  ;;  %v464_v20 = vld [vmem:[%s5529_s13 + $0x62] sm:$0xff]  ;;  %v5754_v22 = vld [vmem:[#allocation2 + $0x198] sm:$0xff]  ;;  %349 = vst.msk [vmem:[#allocation2 + $0x40] sm:$0xff] %vm340_vm1, %v316_v19 }
  0x3e   : > { %4867 = vmatmul.mubr.msk.f32.gmra.mxu1 %vm340_vm1, %v5729_v12  ;;  %4845 = vmatprep.mubr.msk.f32.mxu0 %vm340_vm1, %v5731_v13  ;;  %v5756_v23 = vld [vmem:[#allocation2 + $0x218] sm:$0xff]  ;;  %497 = vst.msk [vmem:[#allocation2 + $0x280] sm:$0xff] %vm340_vm1, %v464_v20  ;;  %350 = vst.msk [vmem:[#allocation2 + $0x48] sm:$0xff] %vm340_vm1, %v317_v21  ;;  %v465_v24 = vld [vmem:[%s5529_s13 + $0x6a] sm:$0xff] }
  0x3f   : > { %4869 = vmatprep.mubr.msk.f32.mxu1 %vm340_vm1, %v5733_v14  ;;  %7187 = vst [vmem:[#allocation8_spill] sm:$0xff] %v5756_v23  ;;  %v318_v25 = vld [vmem:[%s5529_s13 + $0x78] sm:$0xff]  ;;  %v530_v27 = vld [vmem:[#allocation2] sm:$0xff]  ;;  %498 = vst.msk [vmem:[#allocation2 + $0x288] sm:$0xff] %vm340_vm1, %v465_v24 }
  0x40   : > { %v466_v26 = vld [vmem:[%s5529_s13 + $0x7a] sm:$0xff]  ;;  %351 = vst.msk [vmem:[#allocation2 + $0x50] sm:$0xff] %vm340_vm1, %v318_v25  ;;  %v467_v44 = vld [vmem:[%s5529_s13 + $0x82] sm:$0xff]  ;;  %v320_v45 = vld [vmem:[%s5529_s13 + $0x90] sm:$0xff] }
  0x41   : > { %4846 = vmatmul.mubr.msk.f32.gmra.mxu0 %vm340_vm1, %v5739_v15  ;;  %v1246_v29 = vld [vmem:[#allocation2 + $0x240] sm:$0xff]  ;;  %499 = vst.msk [vmem:[#allocation2 + $0x290] sm:$0xff] %vm340_vm1, %v466_v26  ;;  %500 = vst.msk [vmem:[#allocation2 + $0x298] sm:$0xff] %vm340_vm1, %v467_v44  ;;  %v468_v48 = vld [vmem:[%s5529_s13 + $0x92] sm:$0xff] }
  0x42   : > { %4870 = vmatmul.mubr.msk.f32.gmra.mxu1 %vm340_vm1, %v5745_v16  ;;  %v319_v43 = vld [vmem:[%s5529_s13 + $0x80] sm:$0xff]  ;;  %4848 = vmatprep.mubr.msk.f32.mxu0 %vm340_vm1, %v5747_v17  ;;  %353 = vst.msk [vmem:[#allocation2 + $0x60] sm:$0xff] %vm340_vm1, %v320_v45  ;;  %v321_v49 = vld [vmem:[%s5529_s13 + $0x98] sm:$0xff]  ;;  %501 = vst.msk [vmem:[#allocation2 + $0x2a0] sm:$0xff] %vm340_vm1, %v468_v48 }
  0x43   : > { %4872 = vmatprep.mubr.msk.f32.mxu1 %vm340_vm1, %v5749_v18  ;;  %352 = vst.msk [vmem:[#allocation2 + $0x58] sm:$0xff] %vm340_vm1, %v319_v43  ;;  %v469_v50 = vld [vmem:[%s5529_s13 + $0x9a] sm:$0xff]  ;;  %354 = vst.msk [vmem:[#allocation2 + $0x68] sm:$0xff] %vm340_vm1, %v321_v49  ;;  %v322_v53 = vld [vmem:[%s5529_s13 + $0xa8] sm:$0xff] }
  0x44   : > { %502 = vst.msk [vmem:[#allocation2 + $0x2a8] sm:$0xff] %vm340_vm1, %v469_v50  ;;  %v470_v54 = vld [vmem:[%s5529_s13 + $0xaa] sm:$0xff]  ;;  %355 = vst.msk [vmem:[#allocation2 + $0x70] sm:$0xff] %vm340_vm1, %v322_v53  ;;  %v471_v58 = vld [vmem:[%s5529_s13 + $0xb2] sm:$0xff] }
  0x45   : > { %v323_v55 = vld [vmem:[%s5529_s13 + $0xb0] sm:$0xff]  ;;  %v531_v56 = vld [vmem:[#allocation2 + $0x8] sm:$0xff]  ;;  %503 = vst.msk [vmem:[#allocation2 + $0x2b0] sm:$0xff] %vm340_vm1, %v470_v54  ;;  %v324_v59 = vld [vmem:[%s5529_s13 + $0xc0] sm:$0xff]  ;;  %4849 = vmatmul.mubr.msk.f32.gmra.mxu0 %vm340_vm1, %v5754_v22 }
  0x46   : > { %v1247_v57 = vld [vmem:[#allocation2 + $0x248] sm:$0xff]  ;;  %356 = vst.msk [vmem:[#allocation2 + $0x78] sm:$0xff] %vm340_vm1, %v323_v55  ;;  %4873 = vmatmul.mubr.msk.f32.gmra.mxu1 %vm340_vm1, %v5756_v23  ;;  %504 = vst.msk [vmem:[#allocation2 + $0x2b8] sm:$0xff] %vm340_vm1, %v471_v58  ;;  %v326_v1 = vld [vmem:[%s5529_s13 + $0xd8] sm:$0xff]  ;;  %4927 = vmatprep.mubr.msk.f32.mxu0 %vm340_vm1, %v1246_v29 }
  0x47   : > { %v472_v60 = vld [vmem:[%s5529_s13 + $0xc2] sm:$0xff]  ;;  %357 = vst.msk [vmem:[#allocation2 + $0x80] sm:$0xff] %vm340_vm1, %v324_v59  ;;  %v473_v0 = vld [vmem:[%s5529_s13 + $0xca] sm:$0xff]  ;;  %4877 = vmatprep.mubr.msk.f32.mxu1 %vm340_vm1, %v530_v27  ;;  %359 = vst.msk [vmem:[#allocation2 + $0x90] sm:$0xff] %vm340_vm1, %v326_v1 }
  0x48   : > { %505 = vst.msk [vmem:[#allocation2 + $0x2c0] sm:$0xff] %vm340_vm1, %v472_v60  ;;  %v325_v61 = vld [vmem:[%s5529_s13 + $0xc8] sm:$0xff]  ;;  %506 = vst.msk [vmem:[#allocation2 + $0x2c8] sm:$0xff] %vm340_vm1, %v473_v0  ;;  %v474_v2 = vld [vmem:[%s5529_s13 + $0xda] sm:$0xff] }
  0x49   : > { %358 = vst.msk [vmem:[#allocation2 + $0x88] sm:$0xff] %vm340_vm1, %v325_v61  ;;  %v327_v3 = vld [vmem:[%s5529_s13 + $0xe0] sm:$0xff]  ;;  %507 = vst.msk [vmem:[#allocation2 + $0x2d0] sm:$0xff] %vm340_vm1, %v474_v2  ;;  %v5817_v5 = vld [vmem:[#allocation2 + $0x10] sm:$0xff]  ;;  %4928 = vmatmul.mubr.msk.f32.vlgmr.msra.gmra.mxu0 %vm340_vm1, %v1247_v57 }
  0x4a   : > { %v475_v4 = vld [vmem:[%s5529_s13 + $0xe2] sm:$0xff]  ;;  %360 = vst.msk [vmem:[#allocation2 + $0x98] sm:$0xff] %vm340_vm1, %v327_v3  ;;  %v5819_v6 = vld [vmem:[#allocation2 + $0x250] sm:$0xff]  ;;  %4878 = vmatmul.mubr.msk.f32.vlgmr.msra.gmra.mxu1 %vm340_vm1, %v531_v56  ;;  %v5831_v8 = vld [vmem:[%s7150_s2 + $0x18] sm:$0xf]  ;;  %5026 = vmatpush3.msk.msra.mxu0 %vm693_vm0, %v5601_v34 }
  0x4b   : > { %508 = vst.msk [vmem:[#allocation2 + $0x2d8] sm:$0xff] %vm340_vm1, %v475_v4  ;;  %7188 = vst [vmem:[#allocation9_spill] sm:$0xff] %v5819_v6  ;;  %v5826_v7 = vld [vmem:[%s7150_s2 + $0x14] sm:$0xf]  ;;  %4976 = vmatpush3.msk.msra.mxu1 %vm693_vm0, %v5596_v33  ;;  %v5837_v19 = vld [vmem:[#allocation2 + $0x18] sm:$0xff]  ;;  %4880 = vmatprep.mubr.msk.f32.mxu1 %vm340_vm1, %v5817_v5 }
  0x4c   : > { %v5839_v20 = vld [vmem:[#allocation2 + $0x258] sm:$0xff]  ;;  %4930 = vmatprep.mubr.msk.f32.mxu0 %vm340_vm1, %v5819_v6  ;;  %v5845_v21 = vld [vmem:[#allocation2 + $0x20] sm:$0xff]  ;;  %5075 = vmatprep.subr.msk.mxu1 %vm693_vm0, %v5826_v7  ;;  %v5857_v33 = vld [vmem:[#allocation2 + $0x28] sm:$0xff] }
  0x4d   : > { %7189 = vst [vmem:[#allocation10_spill] sm:$0xff] %v5839_v20  ;;  %v5847_v24 = vld [vmem:[#allocation2 + $0x260] sm:$0xff]  ;;  %5125 = vmatprep.subr.msk.mxu0 %vm693_vm0, %v5831_v8  ;;  %4931 = vmatmul.mubr.msk.f32.gmra.mxu0 %vm340_vm1, %v5839_v20  ;;  %v5863_v34 = vld [vmem:[#allocation2 + $0x268] sm:$0xff]  ;;  %v5865_v25 = vld [vmem:[#allocation2 + $0x30] sm:$0xff] }
  0x4e   : > { %7190 = vst [vmem:[#allocation11_spill] sm:$0xff] %v5847_v24  ;;  %4881 = vmatmul.mubr.msk.f32.gmra.mxu1 %vm340_vm1, %v5837_v19  ;;  %4933 = vmatprep.mubr.msk.f32.mxu0 %vm340_vm1, %v5847_v24  ;;  %7191 = vst [vmem:[#allocation12_spill] sm:$0xff] %v5863_v34  ;;  %v5867_v26 = vld [vmem:[#allocation2 + $0x270] sm:$0xff]  ;;  %v329_v43 = vld [vmem:[%s5529_s13 + $0xf8] sm:$0xff] }
  0x4f   : > { %4883 = vmatprep.mubr.msk.f32.mxu1 %vm340_vm1, %v5845_v21  ;;  %7192 = vst [vmem:[#allocation13_spill] sm:$0xff] %v5867_v26  ;;  %v328_v27 = vld [vmem:[%s5529_s13 + $0xf0] sm:$0xff]  ;;  %v5872_v44 = vld [vmem:[#allocation2 + $0x38] sm:$0xff]  ;;  %362 = vst.msk [vmem:[#allocation2 + $0xa8] sm:$0xff] %vm340_vm1, %v329_v43 }
  0x50   : > { %v476_v29 = vld [vmem:[%s5529_s13 + $0xf2] sm:$0xff]  ;;  %361 = vst.msk [vmem:[#allocation2 + $0xa0] sm:$0xff] %vm340_vm1, %v328_v27  ;;  %v477_v48 = vld [vmem:[%s5529_s13 + $0xfa] sm:$0xff]  ;;  %v330_v49 = vld [vmem:[%s5529_s13 + $0x108] sm:$0xff] }
  0x51   : > { %v5874_v45 = vld [vmem:[#allocation2 + $0x278] sm:$0xff]  ;;  %509 = vst.msk [vmem:[#allocation2 + $0x2e0] sm:$0xff] %vm340_vm1, %v476_v29  ;;  %v478_v50 = vld [vmem:[%s5529_s13 + $0x10a] sm:$0xff]  ;;  %4934 = vmatmul.mubr.msk.f32.gmra.mxu0 %vm340_vm1, %v5863_v34  ;;  %v5886_v53 = vld [vmem:[#allocation2 + $0x40] sm:$0xff] }
  0x52   : > { %7193 = vst [vmem:[#allocation14_spill] sm:$0xff] %v5874_v45  ;;  %4884 = vmatmul.mubr.msk.f32.gmra.mxu1 %vm340_vm1, %v5857_v33  ;;  %v5888_v54 = vld [vmem:[#allocation2 + $0x280] sm:$0xff]  ;;  %510 = vst.msk [vmem:[#allocation2 + $0x2e8] sm:$0xff] %vm340_vm1, %v477_v48  ;;  %v331_v55 = vld [vmem:[%s5529_s13 + $0x110] sm:$0xff]  ;;  %4936 = vmatprep.mubr.msk.f32.mxu0 %vm340_vm1, %v5867_v26 }
  0x53   : > { %7194 = vst [vmem:[#allocation15_spill] sm:$0xff] %v5888_v54  ;;  %363 = vst.msk [vmem:[#allocation2 + $0xb0] sm:$0xff] %vm340_vm1, %v330_v49  ;;  %v479_v56 = vld [vmem:[%s5529_s13 + $0x112] sm:$0xff]  ;;  %v332_v57 = vld [vmem:[%s5529_s13 + $0x120] sm:$0xff]  ;;  %4886 = vmatprep.mubr.msk.f32.mxu1 %vm340_vm1, %v5865_v25 }
  0x54   : > { %511 = vst.msk [vmem:[#allocation2 + $0x2f0] sm:$0xff] %vm340_vm1, %v478_v50  ;;  %364 = vst.msk [vmem:[#allocation2 + $0xb8] sm:$0xff] %vm340_vm1, %v331_v55  ;;  %v480_v58 = vld [vmem:[%s5529_s13 + $0x122] sm:$0xff]  ;;  %v481_v60 = vld [vmem:[%s5529_s13 + $0x12a] sm:$0xff] }
  0x55   : > { %512 = vst.msk [vmem:[#allocation2 + $0x2f8] sm:$0xff] %vm340_vm1, %v479_v56  ;;  %365 = vst.msk [vmem:[#allocation2 + $0xc0] sm:$0xff] %vm340_vm1, %v332_v57  ;;  %v333_v59 = vld [vmem:[%s5529_s13 + $0x128] sm:$0xff]  ;;  %v334_v61 = vld [vmem:[%s5529_s13 + $0x138] sm:$0xff]  ;;  %4937 = vmatmul.mubr.msk.f32.gmra.mxu0 %vm340_vm1, %v5874_v45 }
  0x56   : > { %513 = vst.msk [vmem:[#allocation2 + $0x300] sm:$0xff] %vm340_vm1, %v480_v58  ;;  %366 = vst.msk [vmem:[#allocation2 + $0xc8] sm:$0xff] %vm340_vm1, %v333_v59  ;;  %v482_v0 = vld [vmem:[%s5529_s13 + $0x13a] sm:$0xff]  ;;  %v5912_v2 = vld [vmem:[#allocation2 + $0x48] sm:$0xff]  ;;  %4887 = vmatmul.mubr.msk.f32.gmra.mxu1 %vm340_vm1, %v5872_v44  ;;  %4939 = vmatprep.mubr.msk.f32.mxu0 %vm340_vm1, %v5888_v54 }
  0x57   : > { %514 = vst.msk [vmem:[#allocation2 + $0x308] sm:$0xff] %vm340_vm1, %v481_v60  ;;  %v335_v1 = vld [vmem:[%s5529_s13 + $0x140] sm:$0xff]  ;;  %v5914_v3 = vld [vmem:[#allocation2 + $0x288] sm:$0xff]  ;;  %367 = vst.msk [vmem:[#allocation2 + $0xd0] sm:$0xff] %vm340_vm1, %v334_v61  ;;  %4889 = vmatprep.mubr.msk.f32.mxu1 %vm340_vm1, %v5886_v53 }
  0x58   : > { %7195 = vst [vmem:[#allocation16_spill] sm:$0xff] %v5914_v3  ;;  %515 = vst.msk [vmem:[#allocation2 + $0x310] sm:$0xff] %vm340_vm1, %v482_v0  ;;  %v483_v4 = vld [vmem:[%s5529_s13 + $0x142] sm:$0xff]  ;;  %v336_v27 = vld [vmem:[%s5529_s13 + $0x150] sm:$0xff] }
  0x59   : > { %368 = vst.msk [vmem:[#allocation2 + $0xd8] sm:$0xff] %vm340_vm1, %v335_v1  ;;  %v484_v29 = vld [vmem:[%s5529_s13 + $0x152] sm:$0xff]  ;;  %516 = vst.msk [vmem:[#allocation2 + $0x318] sm:$0xff] %vm340_vm1, %v483_v4  ;;  %v485_v48 = vld [vmem:[%s5529_s13 + $0x15a] sm:$0xff]  ;;  %4940 = vmatmul.mubr.msk.f32.gmra.mxu0 %vm340_vm1, %v5914_v3 }
  0x5a   : > { %369 = vst.msk [vmem:[#allocation2 + $0xe0] sm:$0xff] %vm340_vm1, %v336_v27  ;;  %517 = vst.msk [vmem:[#allocation2 + $0x320] sm:$0xff] %vm340_vm1, %v484_v29  ;;  %v337_v43 = vld [vmem:[%s5529_s13 + $0x158] sm:$0xff]  ;;  %v338_v49 = vld [vmem:[%s5529_s13 + $0x168] sm:$0xff]  ;;  %4890 = vmatmul.mubr.msk.f32.gmra.mxu1 %vm340_vm1, %v5912_v2 }
  0x5b   : > { %370 = vst.msk [vmem:[#allocation2 + $0xe8] sm:$0xff] %vm340_vm1, %v337_v43  ;;  %518 = vst.msk [vmem:[#allocation2 + $0x328] sm:$0xff] %vm340_vm1, %v485_v48  ;;  %v486_v50 = vld [vmem:[%s5529_s13 + $0x16a] sm:$0xff]  ;;  %v487_v56 = vld [vmem:[%s5529_s13 + $0x172] sm:$0xff] }
  0x5c   : > { %371 = vst.msk [vmem:[#allocation2 + $0xf0] sm:$0xff] %vm340_vm1, %v338_v49  ;;  %v339_v55 = vld [vmem:[%s5529_s13 + $0x170] sm:$0xff]  ;;  %519 = vst.msk [vmem:[#allocation2 + $0x330] sm:$0xff] %vm340_vm1, %v486_v50  ;;  %v5959_v59 = vld [vmem:[#allocation2 + $0x58] sm:$0xff] }
  0x5d   : > { %v5942_v57 = vld [vmem:[#allocation2 + $0x50] sm:$0xff]  ;;  %372 = vst.msk [vmem:[#allocation2 + $0xf8] sm:$0xff] %vm340_vm1, %v339_v55  ;;  %520 = vst.msk [vmem:[#allocation2 + $0x338] sm:$0xff] %vm340_vm1, %v487_v56  ;;  %v5961_v60 = vld [vmem:[#allocation2 + $0x298] sm:$0xff] }
  0x5e   : > { %v5944_v58 = vld [vmem:[#allocation2 + $0x290] sm:$0xff]  ;;  %4892 = vmatprep.mubr.msk.f32.mxu1 %vm340_vm1, %v5942_v57  ;;  %7197 = vst [vmem:[#allocation18_spill] sm:$0xff] %v5961_v60  ;;  %v5963_v61 = vld [vmem:[#allocation2 + $0x60] sm:$0xff]  ;;  %v5976_v1 = vld [vmem:[#allocation2 + $0x68] sm:$0xff] }
  0x5f   : > { %7196 = vst [vmem:[#allocation17_spill] sm:$0xff] %v5944_v58  ;;  %4942 = vmatprep.mubr.msk.f32.mxu0 %vm340_vm1, %v5944_v58  ;;  %v5965_v0 = vld [vmem:[#allocation2 + $0x2a0] sm:$0xff]  ;;  %4893 = vmatmul.mubr.msk.f32.gmra.mxu1 %vm340_vm1, %v5959_v59  ;;  %v5982_v4 = vld [vmem:[#allocation2 + $0x2a8] sm:$0xff]  ;;  %v5984_v27 = vld [vmem:[#allocation2 + $0x70] sm:$0xff] }
  0x60   : > { %7198 = vst [vmem:[#allocation19_spill] sm:$0xff] %v5965_v0  ;;  %4943 = vmatmul.mubr.msk.f32.gmra.mxu0 %vm340_vm1, %v5961_v60  ;;  %4895 = vmatprep.mubr.msk.f32.mxu1 %vm340_vm1, %v5963_v61  ;;  %7199 = vst [vmem:[#allocation20_spill] sm:$0xff] %v5982_v4  ;;  %v5986_v29 = vld [vmem:[#allocation2 + $0x2b0] sm:$0xff]  ;;  %v373_v43 = vld [vmem:[%s5970_s11] sm:$0xff] }
  0x61   : > { %4945 = vmatprep.mubr.msk.f32.mxu0 %vm340_vm1, %v5965_v0  ;;  %7200 = vst [vmem:[#allocation21_spill] sm:$0xff] %v5986_v29  ;;  %v447_v48 = vld [vmem:[%s5970_s11 + $0x1] sm:$0xff]  ;;  %378 = vst.msk [vmem:[#allocation2 + $0x100] sm:$0xff] %vm340_vm1, %v373_v43  ;;  %v448_v50 = vld [vmem:[%s5970_s11 + $0x9] sm:$0xff] }
  0x62   : > { %v374_v49 = vld [vmem:[%s5970_s11 + $0x8] sm:$0xff]  ;;  %452 = vst.msk [vmem:[#allocation2 + $0x220] sm:$0xff] %vm340_vm1, %v447_v48  ;;  %453 = vst.msk [vmem:[#allocation2 + $0x228] sm:$0xff] %vm340_vm1, %v448_v50  ;;  %v6004_v55 = vld [vmem:[#allocation2 + $0x78] sm:$0xff] }
  0x63   : > { %379 = vst.msk [vmem:[#allocation2 + $0x108] sm:$0xff] %vm340_vm1, %v374_v49  ;;  %4896 = vmatmul.mubr.msk.f32.gmra.mxu1 %vm340_vm1, %v5976_v1  ;;  %v6006_v56 = vld [vmem:[#allocation2 + $0x2b8] sm:$0xff]  ;;  %v6008_v43 = vld [vmem:[#allocation2 + $0x80] sm:$0xff]  ;;  %v6020_v49 = vld [vmem:[#allocation2 + $0x88] sm:$0xff] }
  0x64   : > { %4946 = vmatmul.mubr.msk.f32.gmra.mxu0 %vm340_vm1, %v5982_v4  ;;  %4898 = vmatprep.mubr.msk.f32.mxu1 %vm340_vm1, %v5984_v27  ;;  %7201 = vst [vmem:[#allocation22_spill] sm:$0xff] %v6006_v56  ;;  %v6010_v48 = vld [vmem:[#allocation2 + $0x2c0] sm:$0xff]  ;;  %v6022_v50 = vld [vmem:[#allocation2 + $0x2c8] sm:$0xff]  ;;  %v6026_v4 = vld [vmem:[#allocation2 + $0x2d0] sm:$0xff] }
  0x65   : > { %4948 = vmatprep.mubr.msk.f32.mxu0 %vm340_vm1, %v5986_v29  ;;  %7202 = vst [vmem:[#allocation23_spill] sm:$0xff] %v6010_v48  ;;  %7203 = vst [vmem:[#allocation24_spill] sm:$0xff] %v6022_v50  ;;  %v6024_v29 = vld [vmem:[#allocation2 + $0x90] sm:$0xff]  ;;  %v6040_v0 = vld [vmem:[#allocation2 + $0xa0] sm:$0xff] }
  0x66   : > { %7204 = vst [vmem:[#allocation25_spill] sm:$0xff] %v6026_v4  ;;  %v6042_v60 = vld [vmem:[#allocation2 + $0x2e0] sm:$0xff]  ;;  %v6056_v58 = vld [vmem:[#allocation2 + $0xb0] sm:$0xff]  ;;  %v375_v23 = vld [vmem:[%s5970_s11 + $0x18] sm:$0xff] }
  0x67   : > { %4899 = vmatmul.mubr.msk.f32.gmra.mxu1 %vm340_vm1, %v6004_v55  ;;  %7206 = vst [vmem:[#allocation27_spill] sm:$0xff] %v6042_v60  ;;  %v6058_v3 = vld [vmem:[#allocation2 + $0x2f0] sm:$0xff]  ;;  %v6072_v54 = vld [vmem:[#allocation2 + $0xc0] sm:$0xff]  ;;  %380 = vst.msk [vmem:[#allocation2 + $0x110] sm:$0xff] %vm340_vm1, %v375_v23 }
  0x68   : > { %4949 = vmatmul.mubr.msk.f32.gmra.mxu0 %vm340_vm1, %v6006_v56  ;;  %4901 = vmatprep.mubr.msk.f32.mxu1 %vm340_vm1, %v6008_v43  ;;  %v6038_v56 = vld [vmem:[#allocation2 + $0x2d8] sm:$0xff]  ;;  %7208 = vst [vmem:[#allocation29_spill] sm:$0xff] %v6058_v3  ;;  %v6074_v45 = vld [vmem:[#allocation2 + $0x300] sm:$0xff]  ;;  %v6088_v26 = vld [vmem:[#allocation2 + $0xd0] sm:$0xff] }
  0x69   : > { %4951 = vmatprep.mubr.msk.f32.mxu0 %vm340_vm1, %v6010_v48  ;;  %v6036_v48 = vld [vmem:[#allocation2 + $0x98] sm:$0xff]  ;;  %7205 = vst [vmem:[#allocation26_spill] sm:$0xff] %v6038_v56  ;;  %7210 = vst [vmem:[#allocation31_spill] sm:$0xff] %v6074_v45  ;;  %v6090_v34 = vld [vmem:[#allocation2 + $0x310] sm:$0xff] }
  0x6a   : > { %7212 = vst [vmem:[#allocation33_spill] sm:$0xff] %v6090_v34  ;;  %v6104_v24 = vld [vmem:[#allocation2 + $0xe0] sm:$0xff]  ;;  %v6126_v23 = vld [vmem:[#allocation2 + $0x328] sm:$0xff]  ;;  %v6130_v16 = vld [vmem:[#allocation2 + $0x330] sm:$0xff] }
  0x6b   : > { %4902 = vmatmul.mubr.msk.f32.gmra.mxu1 %vm340_vm1, %v6020_v49  ;;  %v6106_v20 = vld [vmem:[#allocation2 + $0x320] sm:$0xff]  ;;  %7213 = vst [vmem:[#allocation34_spill] sm:$0xff] %v6130_v16 }
  0x6c   : > { %4952 = vmatmul.mubr.msk.f32.gmra.mxu0 %vm340_vm1, %v6022_v50  ;;  %4904 = vmatprep.mubr.msk.f32.mxu1 %vm340_vm1, %v6024_v29  ;;  %v6054_v50 = vld [vmem:[#allocation2 + $0x2e8] sm:$0xff]  ;;  %v376_v18 = vld [vmem:[%s5970_s11 + $0x20] sm:$0xff] }
  0x6d   : > { %4954 = vmatprep.mubr.msk.f32.mxu0 %vm340_vm1, %v6026_v4  ;;  %v6052_v4 = vld [vmem:[#allocation2 + $0xa8] sm:$0xff]  ;;  %7207 = vst [vmem:[#allocation28_spill] sm:$0xff] %v6054_v50  ;;  %381 = vst.msk [vmem:[#allocation2 + $0x118] sm:$0xff] %vm340_vm1, %v376_v18  ;;  %v6140_v18 = vld [vmem:[#allocation2 + $0xf8] sm:$0xff] }
  0x6e   : > { %v521_v6 = vld [vmem:[%s5970_s11 + $0x2] sm:$0xff] }
  0x6f   : > { %4905 = vmatmul.mubr.msk.f32.gmra.mxu1 %vm340_vm1, %v6036_v48  ;;  %526 = vst.msk [vmem:[#allocation2 + $0x340] sm:$0xff] %vm340_vm1, %v521_v6  ;;  %v6124_v6 = vld [vmem:[#allocation2 + $0xe8] sm:$0xff] }
  0x70   : > { %4955 = vmatmul.mubr.msk.f32.gmra.mxu0 %vm340_vm1, %v6038_v56  ;;  %4907 = vmatprep.mubr.msk.f32.mxu1 %vm340_vm1, %v6040_v0  ;;  %v6070_v56 = vld [vmem:[#allocation2 + $0x2f8] sm:$0xff] }
  0x71   : > { %4957 = vmatprep.mubr.msk.f32.mxu0 %vm340_vm1, %v6042_v60  ;;  %v6068_v60 = vld [vmem:[#allocation2 + $0xb8] sm:$0xff]  ;;  %7209 = vst [vmem:[#allocation30_spill] sm:$0xff] %v6070_v56 }
  0x73   : > { %4908 = vmatmul.mubr.msk.f32.gmra.mxu1 %vm340_vm1, %v6052_v4 }
  0x74   : > { %4958 = vmatmul.mubr.msk.f32.gmra.mxu0 %vm340_vm1, %v6054_v50  ;;  %4910 = vmatprep.mubr.msk.f32.mxu1 %vm340_vm1, %v6056_v58  ;;  %v6086_v50 = vld [vmem:[#allocation2 + $0x308] sm:$0xff] }
  0x75   : > { %4960 = vmatprep.mubr.msk.f32.mxu0 %vm340_vm1, %v6058_v3  ;;  %v6084_v3 = vld [vmem:[#allocation2 + $0xc8] sm:$0xff]  ;;  %7211 = vst [vmem:[#allocation32_spill] sm:$0xff] %v6086_v50 }
  0x77   : > { %4911 = vmatmul.mubr.msk.f32.gmra.mxu1 %vm340_vm1, %v6068_v60 }
  0x78   : > { %4961 = vmatmul.mubr.msk.f32.gmra.mxu0 %vm340_vm1, %v6070_v56  ;;  %4913 = vmatprep.mubr.msk.f32.mxu1 %vm340_vm1, %v6072_v54  ;;  %v6102_v56 = vld [vmem:[#allocation2 + $0x318] sm:$0xff] }
  0x79   : > { %4963 = vmatprep.mubr.msk.f32.mxu0 %vm340_vm1, %v6074_v45  ;;  %v6100_v45 = vld [vmem:[#allocation2 + $0xd8] sm:$0xff] }
  0x7b   : > { %4914 = vmatmul.mubr.msk.f32.gmra.mxu1 %vm340_vm1, %v6084_v3 }
  0x7c   : > { %4964 = vmatmul.mubr.msk.f32.gmra.mxu0 %vm340_vm1, %v6086_v50  ;;  %4916 = vmatprep.mubr.msk.f32.mxu1 %vm340_vm1, %v6088_v26  ;;  %v522_v50 = vld [vmem:[%s5970_s11 + $0xa] sm:$0xff] }
  0x7d   : > { %4966 = vmatprep.mubr.msk.f32.mxu0 %vm340_vm1, %v6090_v34  ;;  %527 = vst.msk [vmem:[#allocation2 + $0x348] sm:$0xff] %vm340_vm1, %v522_v50  ;;  %v6128_v34 = vld [vmem:[#allocation2 + $0xf0] sm:$0xff]  ;;  %v6142_v50 = vld [vmem:[#allocation2 + $0x338] sm:$0xff] }
  0x7e   : > { %7214 = vst [vmem:[#allocation35_spill] sm:$0xff] %v6142_v50 }
  0x7f   : > { %4917 = vmatmul.mubr.msk.f32.gmra.mxu1 %vm340_vm1, %v6100_v45 }
  0x80   : > { %4967 = vmatmul.mubr.msk.f32.gmra.mxu0 %vm340_vm1, %v6102_v56  ;;  %4919 = vmatprep.mubr.msk.f32.mxu1 %vm340_vm1, %v6104_v24 }
  0x81   : > { %4969 = vmatprep.mubr.msk.f32.mxu0 %vm340_vm1, %v6106_v20 }
  0x83   : > { %4920 = vmatmul.mubr.msk.f32.gmra.mxu1 %vm340_vm1, %v6124_v6 }
  0x84   : > { %4970 = vmatmul.mubr.msk.f32.gmra.mxu0 %vm340_vm1, %v6126_v23  ;;  %4922 = vmatprep.mubr.msk.f32.mxu1 %vm340_vm1, %v6128_v34 }
  0x85   : > { %4972 = vmatprep.mubr.msk.f32.mxu0 %vm340_vm1, %v6130_v16  ;;  %v6159_v16 = vld [vmem:[%s7150_s2 + $0x1c] sm:$0xf] }
  0x87   : > { %4923 = vmatmul.mubr.msk.f32.gmra.mxu1 %vm340_vm1, %v6140_v18 }
  0x88   : > { %4973 = vmatmul.mubr.msk.f32.gmra.mxu0 %vm340_vm1, %v6142_v50  ;;  %4977 = vmatprep.mubr.msk.f32.mxu1 %vm340_vm1, %v5817_v5  ;;  %v6164_v50 = vld [vmem:[%s7150_s2 + $0x20] sm:$0xf] }
  0x89   : > { %5027 = vmatprep.mubr.msk.f32.mxu0 %vm340_vm1, %v5586_v31  ;;  %v7215_v31 = vld [vmem:[#allocation6_spill] sm:$0xff] }
  0x8b   : > { %4978 = vmatmul.mubr.msk.f32.vlgmr.msra.gmra.mxu1 %vm340_vm1, %v5837_v19  ;;  %v7236_v19 = vld [vmem:[#allocation27_spill] sm:$0xff] }
  0x8c   : > { %5028 = vmatmul.mubr.msk.f32.vlgmr.msra.gmra.mxu0 %vm340_vm1, %v5607_v35  ;;  %5076 = vmatpush3.msk.msra.mxu1 %vm693_vm0, %v5826_v7  ;;  %v524_v35 = vld [vmem:[%s5970_s11 + $0x22] sm:$0xff] }
  0x8d   : > { %5126 = vmatpush3.msk.msra.mxu0 %vm693_vm0, %v5831_v8  ;;  %4980 = vmatprep.mubr.msk.f32.mxu1 %vm340_vm1, %v5845_v21  ;;  %529 = vst.msk [vmem:[#allocation2 + $0x358] sm:$0xff] %vm340_vm1, %v524_v35  ;;  %v7235_v8 = vld [vmem:[#allocation26_spill] sm:$0xff] }
  0x8e   : > { %5030 = vmatprep.mubr.msk.f32.mxu0 %vm340_vm1, %v5615_v37  ;;  %5175 = vmatprep.subr.msk.mxu1 %vm693_vm0, %v6159_v16  ;;  %v6290_v37 = vld [vmem:[#allocation2 + $0x100] sm:$0xff] }
  0x8f   : > { %5225 = vmatprep.subr.msk.mxu0 %vm693_vm0, %v6164_v50  ;;  %4981 = vmatmul.mubr.msk.f32.gmra.mxu1 %vm340_vm1, %v5857_v33 }
  0x90   : > { %5031 = vmatmul.mubr.msk.f32.gmra.mxu0 %vm340_vm1, %v5627_v39  ;;  %4983 = vmatprep.mubr.msk.f32.mxu1 %vm340_vm1, %v5865_v25  ;;  %v7217_v39 = vld [vmem:[#allocation8_spill] sm:$0xff] }
  0x91   : > { %5033 = vmatprep.mubr.msk.f32.mxu0 %vm340_vm1, %v5635_v41  ;;  %v6304_v41 = vld [vmem:[#allocation2 + $0x228] sm:$0xff] }
  0x93   : > { %4984 = vmatmul.mubr.msk.f32.gmra.mxu1 %vm340_vm1, %v5872_v44 }
  0x94   : > { %5034 = vmatmul.mubr.msk.f32.gmra.mxu0 %vm340_vm1, %v5642_v46  ;;  %4986 = vmatprep.mubr.msk.f32.mxu1 %vm340_vm1, %v5886_v53  ;;  %v7219_v46 = vld [vmem:[#allocation10_spill] sm:$0xff] }
  0x95   : > { %5036 = vmatprep.mubr.msk.f32.mxu0 %vm340_vm1, %v5656_v51  ;;  %v7221_v51 = vld [vmem:[#allocation12_spill] sm:$0xff] }
  0x97   : > { %4987 = vmatmul.mubr.msk.f32.gmra.mxu1 %vm340_vm1, %v5912_v2 }
  0x98   : > { %5037 = vmatmul.mubr.msk.f32.gmra.mxu0 %vm340_vm1, %v5682_v62  ;;  %4989 = vmatprep.mubr.msk.f32.mxu1 %vm340_vm1, %v5942_v57  ;;  %v7223_v62 = vld [vmem:[#allocation14_spill] sm:$0xff] }
  0x99   : > { %5039 = vmatprep.mubr.msk.f32.mxu0 %vm340_vm1, %v5712_v9  ;;  %v7225_v9 = vld [vmem:[#allocation16_spill] sm:$0xff] }
  0x9b   : > { %4990 = vmatmul.mubr.msk.f32.gmra.mxu1 %vm340_vm1, %v5959_v59 }
  0x9c   : > { %5040 = vmatmul.mubr.msk.f32.gmra.mxu0 %vm340_vm1, %v5727_v11  ;;  %4992 = vmatprep.mubr.msk.f32.mxu1 %vm340_vm1, %v5963_v61  ;;  %v7227_v11 = vld [vmem:[#allocation18_spill] sm:$0xff] }
  0x9d   : > { %5042 = vmatprep.mubr.msk.f32.mxu0 %vm340_vm1, %v5731_v13  ;;  %v7229_v13 = vld [vmem:[#allocation20_spill] sm:$0xff] }
  0x9f   : > { %4993 = vmatmul.mubr.msk.f32.gmra.mxu1 %vm340_vm1, %v5976_v1 }
  0xa0   : > { %5043 = vmatmul.mubr.msk.f32.gmra.mxu0 %vm340_vm1, %v5739_v15  ;;  %4995 = vmatprep.mubr.msk.f32.mxu1 %vm340_vm1, %v5984_v27  ;;  %v7231_v15 = vld [vmem:[#allocation22_spill] sm:$0xff] }
  0xa1   : > { %5045 = vmatprep.mubr.msk.f32.mxu0 %vm340_vm1, %v5747_v17  ;;  %v7233_v17 = vld [vmem:[#allocation24_spill] sm:$0xff] }
  0xa3   : > { %4996 = vmatmul.mubr.msk.f32.gmra.mxu1 %vm340_vm1, %v6004_v55 }
  0xa4   : > { %5046 = vmatmul.mubr.msk.f32.gmra.mxu0 %vm340_vm1, %v5754_v22  ;;  %4998 = vmatprep.mubr.msk.f32.mxu1 %vm340_vm1, %v6008_v43  ;;  %v7234_v22 = vld [vmem:[#allocation25_spill] sm:$0xff] }
  0xa5   : > { %5048 = vmatprep.mubr.msk.f32.mxu0 %vm340_vm1, %v5576_v28  ;;  %v449_v28 = vld [vmem:[%s5970_s11 + $0x19] sm:$0xff] }
  0xa6   : > { %454 = vst.msk [vmem:[#allocation2 + $0x230] sm:$0xff] %vm340_vm1, %v449_v28  ;;  %v2840_v28 = vld [vmem:[#allocation2 + $0x110] sm:$0xff] }
  0xa7   : > { %4999 = vmatmul.mubr.msk.f32.gmra.mxu1 %vm340_vm1, %v6020_v49 }
  0xa8   : > { %5049 = vmatmul.mubr.msk.f32.gmra.mxu0 %vm340_vm1, %v5584_v30  ;;  %5001 = vmatprep.mubr.msk.f32.mxu1 %vm340_vm1, %v6024_v29  ;;  %v523_v30 = vld [vmem:[%s5970_s11 + $0x1a] sm:$0xff] }
  0xa9   : > { %5051 = vmatprep.mubr.msk.f32.mxu0 %vm340_vm1, %v5588_v32  ;;  %528 = vst.msk [vmem:[#allocation2 + $0x350] sm:$0xff] %vm340_vm1, %v523_v30  ;;  %v450_v32 = vld [vmem:[%s5970_s11 + $0x21] sm:$0xff]  ;;  %s5415_s11 = smov [#allocation3]  }
  0xaa   : > { %455 = vst.msk [vmem:[#allocation2 + $0x238] sm:$0xff] %vm340_vm1, %v450_v32  ;;  %v2841_v32 = vld [vmem:[#allocation2 + $0x118] sm:$0xff]  ;;  %s5341_s9 = sshll.u32 %s5415_s11, 4  ;;  %s5342_s9 = int_to_ptr.vmem [resolvable:$false] %s5341_s9 }
  0xab   : > { %5002 = vmatmul.mubr.msk.f32.gmra.mxu1 %vm340_vm1, %v6036_v48  ;;  %s5343_s10 = scalar_lea.vmem %s5342_s9, 8192  ;;  %p5344_p1 = scmp.lt.s32.totalorder %s7095_s30, %s5342_s9 }
  0xac   : > { %5052 = vmatmul.mubr.msk.f32.gmra.mxu0 %vm340_vm1, %v5609_v36  ;;  %5004 = vmatprep.mubr.msk.f32.mxu1 %vm340_vm1, %v6040_v0  ;;  %v7216_v36 = vld [vmem:[#allocation7_spill] sm:$0xff]  ;;  %p5345_p2 = scmp.lt.s32.totalorder %s5343_s10, %s5337_s8 }
  0xad   : > { %5054 = vmatprep.mubr.msk.f32.mxu0 %vm340_vm1, %v5617_v38  ;;  %v6292_v38 = vld [vmem:[#allocation2 + $0x220] sm:$0xff] }
  0xae   : > { %p5346_p3 = por %p5345_p2, %p5344_p1 }
  0xaf   : > { %5005 = vmatmul.mubr.msk.f32.gmra.mxu1 %vm340_vm1, %v6052_v4 }
  0xb0   : > { %5055 = vmatmul.mubr.msk.f32.gmra.mxu0 %vm340_vm1, %v5633_v40  ;;  %5007 = vmatprep.mubr.msk.f32.mxu1 %vm340_vm1, %v6056_v58  ;;  %v6302_v40 = vld [vmem:[#allocation2 + $0x108] sm:$0xff]  ;;  %p5347_p5 = pnand %p5346_p3, %p5340_p0 }
  0xb1   : > { %5057 = vmatprep.mubr.msk.f32.mxu0 %vm340_vm1, %v5637_v42  ;;  %v7218_v42 = vld [vmem:[#allocation9_spill] sm:$0xff] }
  0xb3   : > { %5008 = vmatmul.mubr.msk.f32.gmra.mxu1 %vm340_vm1, %v6068_v60 }
  0xb4   : > { %5058 = vmatmul.mubr.msk.f32.gmra.mxu0 %vm340_vm1, %v5644_v47  ;;  %5010 = vmatprep.mubr.msk.f32.mxu1 %vm340_vm1, %v6072_v54  ;;  %v7220_v47 = vld [vmem:[#allocation11_spill] sm:$0xff] }
  0xb5   : > { %5060 = vmatprep.mubr.msk.f32.mxu0 %vm340_vm1, %v5658_v52  ;;  %v7222_v52 = vld [vmem:[#allocation13_spill] sm:$0xff] }
  0xb7   : > { %5011 = vmatmul.mubr.msk.f32.gmra.mxu1 %vm340_vm1, %v6084_v3 }
  0xb8   : > { %5061 = vmatmul.mubr.msk.f32.gmra.mxu0 %vm340_vm1, %v5684_v63  ;;  %5013 = vmatprep.mubr.msk.f32.mxu1 %vm340_vm1, %v6088_v26  ;;  %v7224_v63 = vld [vmem:[#allocation15_spill] sm:$0xff] }
  0xb9   : > { %5063 = vmatprep.mubr.msk.f32.mxu0 %vm340_vm1, %v5714_v10  ;;  %v7226_v10 = vld [vmem:[#allocation17_spill] sm:$0xff] }
  0xbb   : > { %5014 = vmatmul.mubr.msk.f32.gmra.mxu1 %vm340_vm1, %v6100_v45 }
  0xbc   : > { %5064 = vmatmul.mubr.msk.f32.gmra.mxu0 %vm340_vm1, %v5729_v12  ;;  %5016 = vmatprep.mubr.msk.f32.mxu1 %vm340_vm1, %v6104_v24  ;;  %v7228_v12 = vld [vmem:[#allocation19_spill] sm:$0xff] }
  0xbd   : > { %5066 = vmatprep.mubr.msk.f32.mxu0 %vm340_vm1, %v5733_v14  ;;  %v7230_v14 = vld [vmem:[#allocation21_spill] sm:$0xff] }
  0xbf   : > { %5017 = vmatmul.mubr.msk.f32.gmra.mxu1 %vm340_vm1, %v6124_v6 }
  0xc0   : > { %5067 = vmatmul.mubr.msk.f32.gmra.mxu0 %vm340_vm1, %v7215_v31  ;;  %5019 = vmatprep.mubr.msk.f32.mxu1 %vm340_vm1, %v6128_v34 }
  0xc1   : > { %5069 = vmatprep.mubr.msk.f32.mxu0 %vm340_vm1, %v7216_v36 }
  0xc3   : > { %5020 = vmatmul.mubr.msk.f32.gmra.mxu1 %vm340_vm1, %v6140_v18 }
  0xc4   : > { %5070 = vmatmul.mubr.msk.f32.gmra.mxu0 %vm340_vm1, %v7217_v39  ;;  %5022 = vmatprep.mubr.msk.f32.mxu1 %vm340_vm1, %v6290_v37  ;;  %v3592_v39 = vld [vmem:[#allocation2 + $0x260] sm:$0xff] }
  0xc5   : > { %5072 = vmatprep.mubr.msk.f32.mxu0 %vm340_vm1, %v6292_v38 }
  0xc7   : > { %5023 = vmatmul.mubr.msk.f32.gmra.mxu1 %vm340_vm1, %v6302_v40 }
  0xc8   : > { %5073 = vmatmul.mubr.msk.f32.gmra.mxu0 %vm340_vm1, %v6304_v41  ;;  %5077 = vmatprep.mubr.msk.f32.mxu1 %vm340_vm1, %v7218_v42 }
  0xc9   : > { %5127 = vmatprep.mubr.msk.f32.mxu0 %vm340_vm1, %v5845_v21 }
  0xcb   : > { %5078 = vmatmul.mubr.msk.f32.vlgmr.msra.gmra.mxu1 %vm340_vm1, %v7219_v46 }
  0xcc   : > { %5128 = vmatmul.mubr.msk.f32.vlgmr.msra.gmra.mxu0 %vm340_vm1, %v5857_v33  ;;  %5176 = vmatpush3.msk.msra.mxu1 %vm693_vm0, %v6159_v16  ;;  %v7232_v16 = vld [vmem:[#allocation23_spill] sm:$0xff] }
  0xcd   : > { %5226 = vmatpush3.msk.msra.mxu0 %vm693_vm0, %v6164_v50  ;;  %5080 = vmatprep.mubr.msk.f32.mxu1 %vm340_vm1, %v7220_v47  ;;  %v3593_v47 = vld [vmem:[#allocation2 + $0x268] sm:$0xff] }
  0xce   : > { %5130 = vmatprep.mubr.msk.f32.mxu0 %vm340_vm1, %v5865_v25 }
  0xcf   : > { %5081 = vmatmul.mubr.msk.f32.gmra.mxu1 %vm340_vm1, %v7221_v51 }
  0xd0   : > { %5131 = vmatmul.mubr.msk.f32.gmra.mxu0 %vm340_vm1, %v5872_v44  ;;  %5083 = vmatprep.mubr.msk.f32.mxu1 %vm340_vm1, %v7222_v52 }
  0xd1   : > { %5133 = vmatprep.mubr.msk.f32.mxu0 %vm340_vm1, %v5886_v53  ;;  %v7237_v53 = vld [vmem:[#allocation28_spill] sm:$0xff] }
  0xd3   : > { %5084 = vmatmul.mubr.msk.f32.gmra.mxu1 %vm340_vm1, %v7223_v62  ;;  %v3203_v62 = vld [vmem:[#allocation2 + $0x150] sm:$0xff] }
  0xd4   : > { %5134 = vmatmul.mubr.msk.f32.gmra.mxu0 %vm340_vm1, %v5912_v2  ;;  %5086 = vmatprep.mubr.msk.f32.mxu1 %vm340_vm1, %v7224_v63  ;;  %v7238_v2 = vld [vmem:[#allocation29_spill] sm:$0xff]  ;;  %v3594_v63 = vld [vmem:[#allocation2 + $0x270] sm:$0xff] }
  0xd5   : > { %5136 = vmatprep.mubr.msk.f32.mxu0 %vm340_vm1, %v5942_v57 }
  0xd7   : > { %5087 = vmatmul.mubr.msk.f32.gmra.mxu1 %vm340_vm1, %v7225_v9 }
  0xd8   : > { %5137 = vmatmul.mubr.msk.f32.gmra.mxu0 %vm340_vm1, %v5959_v59  ;;  %5089 = vmatprep.mubr.msk.f32.mxu1 %vm340_vm1, %v7226_v10 }
  0xd9   : > { %5139 = vmatprep.mubr.msk.f32.mxu0 %vm340_vm1, %v5963_v61 }
  0xdb   : > { %5090 = vmatmul.mubr.msk.f32.gmra.mxu1 %vm340_vm1, %v7227_v11 }
  0xdc   : > { %5140 = vmatmul.mubr.msk.f32.gmra.mxu0 %vm340_vm1, %v5976_v1  ;;  %5092 = vmatprep.mubr.msk.f32.mxu1 %vm340_vm1, %v7228_v12  ;;  %v3204_v12 = vld [vmem:[#allocation2 + $0x158] sm:$0xff] }
  0xdd   : > { %5142 = vmatprep.mubr.msk.f32.mxu0 %vm340_vm1, %v5984_v27 }
  0xdf   : > { %5093 = vmatmul.mubr.msk.f32.gmra.mxu1 %vm340_vm1, %v7229_v13  ;;  %v3595_v13 = vld [vmem:[#allocation2 + $0x278] sm:$0xff] }
  0xe0   : > { %5143 = vmatmul.mubr.msk.f32.gmra.mxu0 %vm340_vm1, %v6004_v55  ;;  %5095 = vmatprep.mubr.msk.f32.mxu1 %vm340_vm1, %v7230_v14 }
  0xe1   : > { %5145 = vmatprep.mubr.msk.f32.mxu0 %vm340_vm1, %v6008_v43 }
  0xe3   : > { %5096 = vmatmul.mubr.msk.f32.gmra.mxu1 %vm340_vm1, %v7231_v15 }
  0xe4   : > { %5146 = vmatmul.mubr.msk.f32.gmra.mxu0 %vm340_vm1, %v6020_v49  ;;  %5098 = vmatprep.mubr.msk.f32.mxu1 %vm340_vm1, %v7232_v16  ;;  %v3205_v16 = vld [vmem:[#allocation2 + $0x160] sm:$0xff] }
  0xe5   : > { %5148 = vmatprep.mubr.msk.f32.mxu0 %vm340_vm1, %v6024_v29  ;;  %v7241_v29 = vld [vmem:[#allocation32_spill] sm:$0xff] }
  0xe7   : > { %5099 = vmatmul.mubr.msk.f32.gmra.mxu1 %vm340_vm1, %v7233_v17  ;;  %v3596_v17 = vld [vmem:[#allocation2 + $0x280] sm:$0xff] }
  0xe8   : > { %5149 = vmatmul.mubr.msk.f32.gmra.mxu0 %vm340_vm1, %v6036_v48  ;;  %5101 = vmatprep.mubr.msk.f32.mxu1 %vm340_vm1, %v7234_v22 }
  0xe9   : > { %5151 = vmatprep.mubr.msk.f32.mxu0 %vm340_vm1, %v6040_v0  ;;  %v6382_v5 = vpop.f32.mrf.mxu0  ;;  %v7239_v0 = vld [vmem:[#allocation30_spill] sm:$0xff] }
  0xea   : > { %v6384_v7 = vpop.f32.mrf.mxu1 }
  0xeb   : > { %5102 = vmatmul.mubr.msk.f32.gmra.mxu1 %vm340_vm1, %v7235_v8  ;;  %v6394_v21 = vpop.f32.mrf.mxu0 }
  0xec   : > { %5152 = vmatmul.mubr.msk.f32.gmra.mxu0 %vm340_vm1, %v6052_v4  ;;  %5104 = vmatprep.mubr.msk.f32.mxu1 %vm340_vm1, %v7236_v19  ;;  %v6396_v33 = vpop.f32.mrf.mxu1 }
  0xed   : > { %5154 = vmatprep.mubr.msk.f32.mxu0 %vm340_vm1, %v6056_v58  ;;  %v6398_v25 = vpop.f32.mrf.mxu0 }
  0xee   : > { %v6400_v44 = vpop.f32.mrf.mxu1 }
  0xef   : > { %5105 = vmatmul.mubr.msk.f32.gmra.mxu1 %vm340_vm1, %v7237_v53  ;;  %v6410_v57 = vpop.f32.mrf.mxu0 }
  0xf0   : > { %5155 = vmatmul.mubr.msk.f32.gmra.mxu0 %vm340_vm1, %v6068_v60  ;;  %5107 = vmatprep.mubr.msk.f32.mxu1 %vm340_vm1, %v7238_v2  ;;  %v6412_v58 = vpop.f32.mrf.mxu1  ;;  %v7240_v60 = vld [vmem:[#allocation31_spill] sm:$0xff] }
  0xf1   : > { %5157 = vmatprep.mubr.msk.f32.mxu0 %vm340_vm1, %v6072_v54  ;;  %v6414_v59 = vpop.f32.mrf.mxu0 }
  0xf2   : > { %v6416_v61 = vpop.f32.mrf.mxu1 }
  0xf3   : > { %5108 = vmatmul.mubr.msk.f32.gmra.mxu1 %vm340_vm1, %v7239_v0  ;;  %v6426_v54 = vpop.f32.mrf.mxu0  ;;  %v3206_v0 = vld [vmem:[#allocation2 + $0x168] sm:$0xff] }
  0xf4   : > { %5158 = vmatmul.mubr.msk.f32.gmra.mxu0 %vm340_vm1, %v6084_v3  ;;  %5110 = vmatprep.mubr.msk.f32.mxu1 %vm340_vm1, %v7240_v60  ;;  %v6428_v1 = vpop.f32.mrf.mxu1  ;;  %v7242_v3 = vld [vmem:[#allocation33_spill] sm:$0xff]  ;;  %v3597_v60 = vld [vmem:[#allocation2 + $0x288] sm:$0xff] }
  0xf5   : > { %5160 = vmatprep.mubr.msk.f32.mxu0 %vm340_vm1, %v6088_v26  ;;  %v6430_v4 = vpop.f32.mrf.mxu0 }
  0xf6   : > { %v6432_v27 = vpop.f32.mrf.mxu1 }
  0xf7   : > { %5111 = vmatmul.mubr.msk.f32.gmra.mxu1 %vm340_vm1, %v7241_v29  ;;  %v6442_v26 = vpop.f32.mrf.mxu0 }
  0xf8   : > { %5161 = vmatmul.mubr.msk.f32.gmra.mxu0 %vm340_vm1, %v6100_v45  ;;  %5113 = vmatprep.mubr.msk.f32.mxu1 %vm340_vm1, %v7242_v3  ;;  %v6444_v55 = vpop.f32.mrf.mxu1 }
  0xf9   : > { %5163 = vmatprep.mubr.msk.f32.mxu0 %vm340_vm1, %v6104_v24  ;;  %v6446_v43 = vpop.f32.mrf.mxu0 }
  0xfa   : > { %v6448_v48 = vpop.f32.mrf.mxu1 }
  0xfb   : > { %5114 = vmatmul.mubr.msk.f32.gmra.mxu1 %vm340_vm1, %v6102_v56  ;;  %v6458_v24 = vpop.f32.mrf.mxu0  ;;  %v7243_v56 = vld [vmem:[#allocation34_spill] sm:$0xff] }
  0xfc   : > { %5164 = vmatmul.mubr.msk.f32.gmra.mxu0 %vm340_vm1, %v6124_v6  ;;  %5116 = vmatprep.mubr.msk.f32.mxu1 %vm340_vm1, %v6106_v20  ;;  %v6460_v45 = vpop.f32.mrf.mxu1  ;;  %v6478_v6 = vld [vmem:[#allocation2 + $0x340] sm:$0xff] }
  0xfd   : > { %5166 = vmatprep.mubr.msk.f32.mxu0 %vm340_vm1, %v6128_v34  ;;  %v6462_v49 = vpop.f32.mrf.mxu0 }
  0xfe   : > { %v6464_v50 = vpop.f32.mrf.mxu1 }
  0xff   : > { %5117 = vmatmul.mubr.msk.f32.gmra.mxu1 %vm340_vm1, %v6126_v23  ;;  %v6474_v20 = vpop.f32.mrf.mxu0  ;;  %v7244_v23 = vld [vmem:[#allocation35_spill] sm:$0xff] }
 0x100   : > { %5167 = vmatmul.mubr.msk.f32.gmra.mxu0 %vm340_vm1, %v6140_v18  ;;  %5119 = vmatprep.mubr.msk.f32.mxu1 %vm340_vm1, %v7243_v56  ;;  %v6476_v34 = vpop.f32.mrf.mxu1  ;;  %v6491_v18 = vld [vmem:[#allocation2 + $0x348] sm:$0xff]  ;;  %v3207_v56 = vld [vmem:[#allocation2 + $0x170] sm:$0xff] }
 0x101   : > { %5169 = vmatprep.mubr.msk.f32.mxu0 %vm340_vm1, %v6290_v37  ;;  %v6480_v30 = vpop.f32.mrf.mxu0  ;;  %v3201_v37 = vld [vmem:[#allocation2 + $0x140] sm:$0xff] }
 0x102   : > { %v6482_v31 = vpop.f32.mrf.mxu1 }
 0x103   : > { %5120 = vmatmul.mubr.msk.f32.gmra.mxu1 %vm340_vm1, %v7244_v23  ;;  %v6493_v35 = vpop.f32.mrf.mxu0 }
 0x104   : > { %5170 = vmatmul.mubr.msk.f32.gmra.mxu0 %vm340_vm1, %v6302_v40  ;;  %5122 = vmatprep.mubr.msk.f32.mxu1 %vm340_vm1, %v6478_v6  ;;  %v6495_v36 = vpop.f32.mrf.mxu1  ;;  %v3202_v40 = vld [vmem:[#allocation2 + $0x148] sm:$0xff] }
 0x105   : > { %5172 = vmatprep.mubr.msk.f32.mxu0 %vm340_vm1, %v2840_v28  ;;  %v6497_v42 = vpop.f32.mrf.mxu0 }
 0x106   : > { %v6499_v46 = vpop.f32.mrf.mxu1 }
 0x107   : > { %5123 = vmatmul.mubr.msk.f32.gmra.mxu1 %vm340_vm1, %v6491_v18  ;;  %v6506_v51 = vpop.f32.mrf.mxu0 }
 0x108   : > { %5173 = vmatmul.mubr.msk.f32.gmra.mxu0 %vm340_vm1, %v2841_v32  ;;  %5177 = vmatprep.mubr.msk.f32.mxu1 %vm340_vm1, %v3201_v37  ;;  %v6508_v52 = vpop.f32.mrf.mxu1 }
 0x109   : > { %5227 = vmatprep.mubr.msk.f32.mxu0 %vm340_vm1, %v3592_v39  ;;  %v4929_v10 = vpop.f32.mrf.mxu0 }
 0x10a   : > { %v4879_v9 = vpop.f32.mrf.mxu1 }
 0x10b   : > { %5178 = vmatmul.mubr.msk.f32.vlgmr.msra.gmra.mxu1 %vm340_vm1, %v3202_v40  ;;  %v1093_v11 = vadd.f32 %v4879_v9, %v6382_v5  ;;  %v1445_v15 = vpop.f32.mrf.mxu0  ;;  %v3208_v40 = vld [vmem:[#allocation2 + $0x178] sm:$0xff]  ;;  %v3209_v9 = vld [vmem:[#allocation2 + $0x180] sm:$0xff] }
 0x10c   : > { %5228 = vmatmul.mubr.msk.f32.vlgmr.msra.gmra.mxu0 %vm340_vm1, %v3593_v47  ;;  %5180 = vmatprep.mubr.msk.f32.mxu1 %vm340_vm1, %v3203_v62  ;;  %v1087_v14 = vpop.f32.mrf.mxu1  ;;  %v3599_v47 = vld [vmem:[#allocation2 + $0x298] sm:$0xff] }
 0x10d   : > { %5230 = vmatprep.mubr.msk.f32.mxu0 %vm340_vm1, %v3594_v63  ;;  %v6515_v22 = vadd.f32 %v4929_v10, %v1093_v11  ;;  %v1088_v8 = vadd.f32 %v1087_v14, %v6394_v21  ;;  %v4932_v53 = vpop.f32.mrf.mxu0  ;;  %v3598_v21 = vld [vmem:[#allocation2 + $0x290] sm:$0xff] }
 0x10e   : > { %v4882_v19 = vpop.f32.mrf.mxu1 }
 0x10f   : > { %5181 = vmatmul.mubr.msk.f32.gmra.mxu1 %vm340_vm1, %v3204_v12  ;;  %v6520_v5 = vadd.f32 %v1445_v15, %v1088_v8  ;;  %v1103_v2 = vadd.f32 %v4882_v19, %v6398_v25  ;;  %v1455_v3 = vpop.f32.mrf.mxu0  ;;  %v3210_v15 = vld [vmem:[#allocation2 + $0x188] sm:$0xff]  ;;  %v3211_v19 = vld [vmem:[#allocation2 + $0x190] sm:$0xff] }
 0x110   : > { %5231 = vmatmul.mubr.msk.f32.gmra.mxu0 %vm340_vm1, %v3595_v13  ;;  %5183 = vmatprep.mubr.msk.f32.mxu1 %vm340_vm1, %v3205_v16  ;;  %v1097_v29 = vpop.f32.mrf.mxu1  ;;  %v3601_v16 = vld [vmem:[#allocation2 + $0x2a8] sm:$0xff] }
 0x111   : > { %5233 = vmatprep.mubr.msk.f32.mxu0 %vm340_vm1, %v3596_v17  ;;  %v6525_v28 = vadd.f32 %v4932_v53, %v1103_v2  ;;  %v1098_v23 = vadd.f32 %v1097_v29, %v6410_v57  ;;  %v4935_v37 = vpop.f32.mrf.mxu0  ;;  %v3600_v57 = vld [vmem:[#allocation2 + $0x2a0] sm:$0xff] }
 0x112   : > { %v4885_v32 = vpop.f32.mrf.mxu1 }
 0x113   : > { %5184 = vmatmul.mubr.msk.f32.gmra.mxu1 %vm340_vm1, %v3206_v0  ;;  %v6530_v25 = vadd.f32 %v1455_v3, %v1098_v23  ;;  %v1113_v39 = vadd.f32 %v4885_v32, %v6414_v59  ;;  %v1465_v63 = vpop.f32.mrf.mxu0  ;;  %v3212_v3 = vld [vmem:[#allocation2 + $0x198] sm:$0xff]  ;;  %v3213_v32 = vld [vmem:[#allocation2 + $0x1a0] sm:$0xff] }
 0x114   : > { %5234 = vmatmul.mubr.msk.f32.gmra.mxu0 %vm340_vm1, %v3597_v60  ;;  %5186 = vmatprep.mubr.msk.f32.mxu1 %vm340_vm1, %v3207_v56  ;;  %v1107_v62 = vpop.f32.mrf.mxu1  ;;  %v3603_v56 = vld [vmem:[#allocation2 + $0x2b8] sm:$0xff] }
 0x115   : > { %5236 = vmatprep.mubr.msk.f32.mxu0 %vm340_vm1, %v3598_v21  ;;  %v6535_v10 = vadd.f32 %v4935_v37, %v1113_v39  ;;  %v1108_v11 = vadd.f32 %v1107_v62, %v6426_v54  ;;  %v4938_v13 = vpop.f32.mrf.mxu0  ;;  %v3602_v54 = vld [vmem:[#allocation2 + $0x2b0] sm:$0xff] }
 0x116   : > { %v4888_v12 = vpop.f32.mrf.mxu1 }
 0x117   : > { %5187 = vmatmul.mubr.msk.f32.gmra.mxu1 %vm340_vm1, %v3208_v40  ;;  %v6540_v59 = vadd.f32 %v1465_v63, %v1108_v11  ;;  %v1123_v14 = vadd.f32 %v4888_v12, %v6430_v4  ;;  %v1475_v8 = vpop.f32.mrf.mxu0  ;;  %v3214_v63 = vld [vmem:[#allocation2 + $0x1a8] sm:$0xff]  ;;  %v3215_v12 = vld [vmem:[#allocation2 + $0x1b0] sm:$0xff] }
 0x118   : > { %5237 = vmatmul.mubr.msk.f32.gmra.mxu0 %vm340_vm1, %v3599_v47  ;;  %5189 = vmatprep.mubr.msk.f32.mxu1 %vm340_vm1, %v3209_v9  ;;  %v1117_v17 = vpop.f32.mrf.mxu1  ;;  %v3605_v9 = vld [vmem:[#allocation2 + $0x2c8] sm:$0xff] }
 0x119   : > { %5239 = vmatprep.mubr.msk.f32.mxu0 %vm340_vm1, %v3600_v57  ;;  %v6545_v53 = vadd.f32 %v4938_v13, %v1123_v14  ;;  %v1118_v2 = vadd.f32 %v1117_v17, %v6442_v26  ;;  %v4941_v60 = vpop.f32.mrf.mxu0  ;;  %v3604_v26 = vld [vmem:[#allocation2 + $0x2c0] sm:$0xff] }
 0x11a   : > { %v4891_v0 = vpop.f32.mrf.mxu1 }
 0x11b   : > { %5190 = vmatmul.mubr.msk.f32.gmra.mxu1 %vm340_vm1, %v3210_v15  ;;  %v6550_v4 = vadd.f32 %v1475_v8, %v1118_v2  ;;  %v1133_v29 = vadd.f32 %v4891_v0, %v6446_v43  ;;  %v1485_v23 = vpop.f32.mrf.mxu0  ;;  %v3216_v8 = vld [vmem:[#allocation2 + $0x1b8] sm:$0xff]  ;;  %v3217_v0 = vld [vmem:[#allocation2 + $0x1c0] sm:$0xff] }
 0x11c   : > { %5240 = vmatmul.mubr.msk.f32.gmra.mxu0 %vm340_vm1, %v3601_v16  ;;  %5192 = vmatprep.mubr.msk.f32.mxu1 %vm340_vm1, %v3211_v19  ;;  %v1127_v21 = vpop.f32.mrf.mxu1  ;;  %v3607_v19 = vld [vmem:[#allocation2 + $0x2d8] sm:$0xff] }
 0x11d   : > { %5242 = vmatprep.mubr.msk.f32.mxu0 %vm340_vm1, %v3602_v54  ;;  %v6555_v37 = vadd.f32 %v4941_v60, %v1133_v29  ;;  %v1128_v39 = vadd.f32 %v1127_v21, %v6458_v24  ;;  %v3606_v24 = vld [vmem:[#allocation2 + $0x2d0] sm:$0xff] }
 0x11f   : > { %v4894_v40 = vpop.f32.mrf.mxu1  ;;  %5193 = vmatmul.mubr.msk.f32.gmra.mxu1 %vm340_vm1, %v3212_v3  ;;  %v6560_v43 = vadd.f32 %v1485_v23, %v1128_v39  ;;  %v3218_v23 = vld [vmem:[#allocation2 + $0x1c8] sm:$0xff] }
 0x120   : > { %v4944_v47 = vpop.f32.mrf.mxu0  ;;  %5243 = vmatmul.mubr.msk.f32.gmra.mxu0 %vm340_vm1, %v3603_v56  ;;  %v1143_v62 = vadd.f32 %v4894_v40, %v6462_v49  ;;  %5195 = vmatprep.mubr.msk.f32.mxu1 %vm340_vm1, %v3213_v32  ;;  %v3609_v32 = vld [vmem:[#allocation2 + $0x2e8] sm:$0xff]  ;;  %v3219_v40 = vld [vmem:[#allocation2 + $0x1d0] sm:$0xff] }
 0x121   : > { %5245 = vmatprep.mubr.msk.f32.mxu0 %vm340_vm1, %v3604_v26  ;;  %v1137_v57 = vpop.f32.mrf.mxu1 }
 0x122   : > { %v1495_v11 = vpop.f32.mrf.mxu0  ;;  %v6565_v13 = vadd.f32 %v4944_v47, %v1143_v62  ;;  %v1138_v14 = vadd.f32 %v1137_v57, %v6474_v20  ;;  %v3608_v20 = vld [vmem:[#allocation2 + $0x2e0] sm:$0xff] }
 0x123   : > { %v4897_v15 = vpop.f32.mrf.mxu1  ;;  %5196 = vmatmul.mubr.msk.f32.gmra.mxu1 %vm340_vm1, %v3214_v63 }
 0x124   : > { %v4947_v16 = vpop.f32.mrf.mxu0  ;;  %5246 = vmatmul.mubr.msk.f32.gmra.mxu0 %vm340_vm1, %v3605_v9  ;;  %v6570_v49 = vadd.f32 %v1495_v11, %v1138_v14  ;;  %v1153_v17 = vadd.f32 %v4897_v15, %v6480_v30  ;;  %5198 = vmatprep.mubr.msk.f32.mxu1 %vm340_vm1, %v3215_v12  ;;  %v3220_v11 = vld [vmem:[#allocation2 + $0x1d8] sm:$0xff]  ;;  %v3221_v15 = vld [vmem:[#allocation2 + $0x1e0] sm:$0xff] }
 0x125   : > { %5248 = vmatprep.mubr.msk.f32.mxu0 %vm340_vm1, %v3606_v24  ;;  %v1147_v54 = vpop.f32.mrf.mxu1  ;;  %v3611_v12 = vld [vmem:[#allocation2 + $0x2f8] sm:$0xff] }
 0x126   : > { %v1505_v2 = vpop.f32.mrf.mxu0  ;;  %v6575_v60 = vadd.f32 %v4947_v16, %v1153_v17  ;;  %v1148_v29 = vadd.f32 %v1147_v54, %v6493_v35  ;;  %v3610_v35 = vld [vmem:[#allocation2 + $0x2f0] sm:$0xff] }
 0x127   : > { %v4900_v3 = vpop.f32.mrf.mxu1  ;;  %5199 = vmatmul.mubr.msk.f32.gmra.mxu1 %vm340_vm1, %v3216_v8 }
 0x128   : > { %v4950_v56 = vpop.f32.mrf.mxu0  ;;  %5249 = vmatmul.mubr.msk.f32.gmra.mxu0 %vm340_vm1, %v3607_v19  ;;  %v6580_v30 = vadd.f32 %v1505_v2, %v1148_v29  ;;  %v1163_v21 = vadd.f32 %v4900_v3, %v6497_v42  ;;  %5201 = vmatprep.mubr.msk.f32.mxu1 %vm340_vm1, %v3217_v0  ;;  %v3222_v2 = vld [vmem:[#allocation2 + $0x1e8] sm:$0xff]  ;;  %v3223_v3 = vld [vmem:[#allocation2 + $0x1f0] sm:$0xff] }
 0x129   : > { %5251 = vmatprep.mubr.msk.f32.mxu0 %vm340_vm1, %v3608_v20  ;;  %v1157_v26 = vpop.f32.mrf.mxu1  ;;  %v3613_v0 = vld [vmem:[#allocation2 + $0x308] sm:$0xff] }
 0x12a   : > { %v1515_v39 = vpop.f32.mrf.mxu0  ;;  %v6585_v47 = vadd.f32 %v4950_v56, %v1163_v21  ;;  %v1158_v62 = vadd.f32 %v1157_v26, %v6506_v51  ;;  %v3612_v51 = vld [vmem:[#allocation2 + $0x300] sm:$0xff] }
 0x12b   : > { %v4903_v63 = vpop.f32.mrf.mxu1  ;;  %5202 = vmatmul.mubr.msk.f32.gmra.mxu1 %vm340_vm1, %v3218_v23 }
 0x12c   : > { %v4953_v9 = vpop.f32.mrf.mxu0  ;;  %5252 = vmatmul.mubr.msk.f32.gmra.mxu0 %vm340_vm1, %v3609_v32  ;;  %v6590_v42 = vadd.f32 %v1515_v39, %v1158_v62  ;;  %v1173_v57 = vadd.f32 %v4903_v63, %v6384_v7  ;;  %5204 = vmatprep.mubr.msk.f32.mxu1 %vm340_vm1, %v3219_v40  ;;  %v3224_v39 = vld [vmem:[#allocation2 + $0x1f8] sm:$0xff]  ;;  %v3225_v63 = vld [vmem:[#allocation2 + $0x200] sm:$0xff] }
 0x12d   : > { %5254 = vmatprep.mubr.msk.f32.mxu0 %vm340_vm1, %v3610_v35  ;;  %v1167_v24 = vpop.f32.mrf.mxu1  ;;  %v3615_v40 = vld [vmem:[#allocation2 + $0x318] sm:$0xff] }
 0x12e   : > { %v1525_v14 = vpop.f32.mrf.mxu0  ;;  %v6595_v16 = vadd.f32 %v4953_v9, %v1173_v57  ;;  %v1168_v17 = vadd.f32 %v1167_v24, %v6396_v33  ;;  %v3614_v33 = vld [vmem:[#allocation2 + $0x310] sm:$0xff] }
 0x12f   : > { %v4906_v8 = vpop.f32.mrf.mxu1  ;;  %5205 = vmatmul.mubr.msk.f32.gmra.mxu1 %vm340_vm1, %v3220_v11 }
 0x130   : > { %v4956_v19 = vpop.f32.mrf.mxu0  ;;  %5255 = vmatmul.mubr.msk.f32.gmra.mxu0 %vm340_vm1, %v3611_v12  ;;  %v6600_v7 = vadd.f32 %v1525_v14, %v1168_v17  ;;  %v1183_v54 = vadd.f32 %v4906_v8, %v6400_v44  ;;  %5207 = vmatprep.mubr.msk.f32.mxu1 %vm340_vm1, %v3221_v15  ;;  %v3226_v14 = vld [vmem:[#allocation2 + $0x208] sm:$0xff]  ;;  %v3227_v8 = vld [vmem:[#allocation2 + $0x210] sm:$0xff] }
 0x131   : > { %5257 = vmatprep.mubr.msk.f32.mxu0 %vm340_vm1, %v3612_v51  ;;  %v1177_v20 = vpop.f32.mrf.mxu1  ;;  %v3617_v15 = vld [vmem:[#allocation2 + $0x328] sm:$0xff] }
 0x132   : > { %v1535_v29 = vpop.f32.mrf.mxu0  ;;  %v6605_v56 = vadd.f32 %v4956_v19, %v1183_v54  ;;  %v1178_v21 = vadd.f32 %v1177_v20, %v6412_v58  ;;  %v3616_v58 = vld [vmem:[#allocation2 + $0x320] sm:$0xff] }
 0x133   : > { %v4909_v23 = vpop.f32.mrf.mxu1  ;;  %5208 = vmatmul.mubr.msk.f32.gmra.mxu1 %vm340_vm1, %v3222_v2 }
 0x134   : > { %v4959_v32 = vpop.f32.mrf.mxu0  ;;  %5258 = vmatmul.mubr.msk.f32.gmra.mxu0 %vm340_vm1, %v3613_v0  ;;  %v6610_v44 = vadd.f32 %v1535_v29, %v1178_v21  ;;  %v1193_v26 = vadd.f32 %v4909_v23, %v6416_v61  ;;  %5210 = vmatprep.mubr.msk.f32.mxu1 %vm340_vm1, %v3223_v3  ;;  %v3228_v29 = vld [vmem:[#allocation2 + $0x218] sm:$0xff] }
 0x135   : > { %5260 = vmatprep.mubr.msk.f32.mxu0 %vm340_vm1, %v3614_v33  ;;  %v1187_v35 = vpop.f32.mrf.mxu1  ;;  %v3619_v3 = vld [vmem:[#allocation2 + $0x338] sm:$0xff] }
 0x136   : > { %v1545_v62 = vpop.f32.mrf.mxu0  ;;  %v6615_v9 = vadd.f32 %v4959_v32, %v1193_v26  ;;  %v1188_v57 = vadd.f32 %v1187_v35, %v6428_v1  ;;  %v3618_v1 = vld [vmem:[#allocation2 + $0x330] sm:$0xff] }
 0x137   : > { %v4912_v11 = vpop.f32.mrf.mxu1  ;;  %5211 = vmatmul.mubr.msk.f32.gmra.mxu1 %vm340_vm1, %v3224_v39 }
 0x138   : > { %v4962_v12 = vpop.f32.mrf.mxu0  ;;  %5261 = vmatmul.mubr.msk.f32.gmra.mxu0 %vm340_vm1, %v3615_v40  ;;  %v6620_v61 = vadd.f32 %v1545_v62, %v1188_v57  ;;  %v1203_v24 = vadd.f32 %v4912_v11, %v6432_v27  ;;  %5213 = vmatprep.mubr.msk.f32.mxu1 %vm340_vm1, %v3225_v63  ;;  %v3231_v62 = vld [vmem:[#allocation2 + $0x230] sm:$0xff] }
 0x139   : > { %5263 = vmatprep.mubr.msk.f32.mxu0 %vm340_vm1, %v3616_v58  ;;  %v1197_v51 = vpop.f32.mrf.mxu1 }
 0x13a   : > { %v1555_v17 = vpop.f32.mrf.mxu0  ;;  %v6625_v19 = vadd.f32 %v4962_v12, %v1203_v24  ;;  %v1198_v54 = vadd.f32 %v1197_v51, %v6444_v55  ;;  %v3623_v12 = vld [vmem:[#allocation2 + $0x358] sm:$0xff] }
 0x13b   : > { %v4915_v2 = vpop.f32.mrf.mxu1  ;;  %5214 = vmatmul.mubr.msk.f32.gmra.mxu1 %vm340_vm1, %v3226_v14 }
 0x13c   : > { %v4965_v0 = vpop.f32.mrf.mxu0  ;;  %5264 = vmatmul.mubr.msk.f32.gmra.mxu0 %vm340_vm1, %v3617_v15  ;;  %v6630_v27 = vadd.f32 %v1555_v17, %v1198_v54  ;;  %v1213_v20 = vadd.f32 %v4915_v2, %v6448_v48  ;;  %5216 = vmatprep.mubr.msk.f32.mxu1 %vm340_vm1, %v3227_v8 }
 0x13d   : > { %5266 = vmatprep.mubr.msk.f32.mxu0 %vm340_vm1, %v3618_v1  ;;  %v1207_v33 = vpop.f32.mrf.mxu1 }
 0x13e   : > { %v1565_v21 = vpop.f32.mrf.mxu0  ;;  %v6635_v23 = vadd.f32 %v4965_v0, %v1213_v20  ;;  %v1208_v55 = vadd.f32 %v1207_v33, %v6460_v45  ;;  %v3622_v45 = vld [vmem:[#allocation2 + $0x350] sm:$0xff] }
 0x13f   : > { %v4918_v32 = vpop.f32.mrf.mxu1  ;;  %5217 = vmatmul.mubr.msk.f32.gmra.mxu1 %vm340_vm1, %v3228_v29 }
 0x140   : > { %v4968_v26 = vpop.f32.mrf.mxu0  ;;  %5267 = vmatmul.mubr.msk.f32.gmra.mxu0 %vm340_vm1, %v3619_v3  ;;  %v6640_v39 = vadd.f32 %v1565_v21, %v1208_v55  ;;  %v1223_v48 = vadd.f32 %v4918_v32, %v6464_v50  ;;  %5219 = vmatprep.mubr.msk.f32.mxu1 %vm340_vm1, %v6292_v38 }
 0x141   : > { %5269 = vmatprep.mubr.msk.f32.mxu0 %vm340_vm1, %v6478_v6  ;;  %v1217_v40 = vpop.f32.mrf.mxu1  ;;  %v3232_v6 = vld [vmem:[#allocation2 + $0x238] sm:$0xff] }
 0x142   : > { %v1575_v35 = vpop.f32.mrf.mxu0  ;;  %v6647_v63 = vadd.f32 %v4968_v26, %v1223_v48  ;;  %v1218_v58 = vadd.f32 %v1217_v40, %v6476_v34 }
 0x143   : > { %v4921_v57 = vpop.f32.mrf.mxu1  ;;  %5220 = vmatmul.mubr.msk.f32.gmra.mxu1 %vm340_vm1, %v6304_v41 }
 0x144   : > { %v4971_v11 = vpop.f32.mrf.mxu0  ;;  %5270 = vmatmul.mubr.msk.f32.gmra.mxu0 %vm340_vm1, %v6491_v18  ;;  %v6654_v38 = vadd.f32 %v1575_v35, %v1218_v58  ;;  %v1233_v50 = vadd.f32 %v4921_v57, %v6482_v31  ;;  %5222 = vmatprep.mubr.msk.f32.mxu1 %vm340_vm1, %v3231_v62 }
 0x145   : > { %5272 = vmatprep.mubr.msk.f32.mxu0 %vm340_vm1, %v3622_v45  ;;  %v1227_v24 = vpop.f32.mrf.mxu1 }
 0x146   : > { %v1585_v34 = vpop.f32.mrf.mxu0  ;;  %v6659_v14 = vadd.f32 %v4971_v11, %v1233_v50  ;;  %v1228_v15 = vadd.f32 %v1227_v24, %v6495_v36 }
 0x147   : > { %v4924_v41 = vpop.f32.mrf.mxu1  ;;  %5223 = vmatmul.mubr.msk.f32.gmra.mxu1 %vm340_vm1, %v3232_v6 }
 0x148   : > { %v4974_v51 = vpop.f32.mrf.mxu0  ;;  %5273 = vmatmul.mubr.msk.f32.gmra.mxu0 %vm340_vm1, %v3623_v12  ;;  %v6664_v18 = vadd.f32 %v1585_v34, %v1228_v15  ;;  %v1243_v31 = vadd.f32 %v4924_v41, %v6499_v46 }
 0x149   : > { %v1237_v17 = vpop.f32.mrf.mxu1 }
 0x14a   : > { %v1595_v8 = vpop.f32.mrf.mxu0  ;;  %v6667_v1 = vadd.f32 %v4974_v51, %v1243_v31  ;;  %v1238_v54 = vadd.f32 %v1237_v17, %v6508_v52 }
 0x14b   : > { %v4979_v2 = vpop.f32.mrf.mxu1 }
 0x14c   : > { %v5029_v0 = vpop.f32.mrf.mxu0  ;;  %v6670_v20 = vadd.f32 %v1595_v8, %v1238_v54  ;;  %v1996_v36 = vadd.f32 %v4979_v2, %v6515_v22 }
 0x14d   : > { %v1836_v29 = vpop.f32.mrf.mxu1 }
 0x14e   : > { %v2227_v3 = vpop.f32.mrf.mxu0  ;;  %v6673_v33 = vadd.f32 %v5029_v0, %v1996_v36  ;;  %v1995_v21 = vadd.f32 %v1836_v29, %v6520_v5 }
 0x14f   : > { %v4982_v55 = vpop.f32.mrf.mxu1 }
 0x150   : > { %v5032_v46 = vpop.f32.mrf.mxu0  ;;  %v6676_v32 = vadd.f32 %v2227_v3, %v1995_v21  ;;  %v1998_v26 = vadd.f32 %v4982_v55, %v6525_v28 }
 0x151   : > { %v1846_v48 = vpop.f32.mrf.mxu1 }
 0x152   : > { %v2237_v52 = vpop.f32.mrf.mxu0  ;;  %v6679_v40 = vadd.f32 %v5032_v46, %v1998_v26  ;;  %v1997_v35 = vadd.f32 %v1846_v48, %v6530_v25 }
 0x153   : > { %v4985_v62 = vpop.f32.mrf.mxu1 }
 0x154   : > { %v5035_v22 = vpop.f32.mrf.mxu0  ;;  %v6682_v45 = vadd.f32 %v2237_v52, %v1997_v35  ;;  %v2000_v58 = vadd.f32 %v4985_v62, %v6535_v10 }
 0x155   : > { %v1856_v57 = vpop.f32.mrf.mxu1 }
 0x156   : > { %v2247_v5 = vpop.f32.mrf.mxu0  ;;  %v6685_v11 = vadd.f32 %v5035_v22, %v2000_v58  ;;  %v1999_v50 = vadd.f32 %v1856_v57, %v6540_v59 }
 0x157   : > { %v4988_v6 = vpop.f32.mrf.mxu1 }
 0x158   : > { %v5038_v28 = vpop.f32.mrf.mxu0  ;;  %v6688_v12 = vadd.f32 %v2247_v5, %v1999_v50  ;;  %v2002_v24 = vadd.f32 %v4988_v6, %v6545_v53 }
 0x159   : > { %v1866_v34 = vpop.f32.mrf.mxu1 }
 0x15a   : > { %v2257_v25 = vpop.f32.mrf.mxu0  ;;  %v6691_v15 = vadd.f32 %v5038_v28, %v2002_v24  ;;  %v2001_v41 = vadd.f32 %v1866_v34, %v6550_v4 }
 0x15b   : > { %v4991_v51 = vpop.f32.mrf.mxu1 }
 0x15c   : > { %v5041_v10 = vpop.f32.mrf.mxu0  ;;  %v6694_v31 = vadd.f32 %v2257_v25, %v2001_v41  ;;  %v2004_v17 = vadd.f32 %v4991_v51, %v6555_v37 }
 0x15d   : > { %v1876_v8 = vpop.f32.mrf.mxu1 }
 0x15e   : > { %v2267_v59 = vpop.f32.mrf.mxu0  ;;  %v6697_v54 = vadd.f32 %v5041_v10, %v2004_v17  ;;  %v2003_v2 = vadd.f32 %v1876_v8, %v6560_v43 }
 0x15f   : > { %v4994_v0 = vpop.f32.mrf.mxu1 }
 0x160   : > { %v5044_v53 = vpop.f32.mrf.mxu0  ;;  %v6700_v36 = vadd.f32 %v2267_v59, %v2003_v2  ;;  %v2006_v29 = vadd.f32 %v4994_v0, %v6565_v13 }
 0x161   : > { %v1886_v3 = vpop.f32.mrf.mxu1 }
 0x162   : > { %v2277_v4 = vpop.f32.mrf.mxu0  ;;  %v6703_v21 = vadd.f32 %v5044_v53, %v2006_v29  ;;  %v2005_v55 = vadd.f32 %v1886_v3, %v6570_v49 }
 0x163   : > { %v4997_v46 = vpop.f32.mrf.mxu1 }
 0x164   : > { %v5047_v37 = vpop.f32.mrf.mxu0  ;;  %v6706_v26 = vadd.f32 %v2277_v4, %v2005_v55  ;;  %v2008_v48 = vadd.f32 %v4997_v46, %v6575_v60 }
 0x165   : > { %v1896_v52 = vpop.f32.mrf.mxu1 }
 0x166   : > { %v2287_v43 = vpop.f32.mrf.mxu0  ;;  %v6709_v35 = vadd.f32 %v5047_v37, %v2008_v48  ;;  %v2007_v62 = vadd.f32 %v1896_v52, %v6580_v30 }
 0x167   : > { %v5000_v22 = vpop.f32.mrf.mxu1 }
 0x168   : > { %v5050_v13 = vpop.f32.mrf.mxu0  ;;  %v6712_v58 = vadd.f32 %v2287_v43, %v2007_v62  ;;  %v2010_v57 = vadd.f32 %v5000_v22, %v6585_v47 }
 0x169   : > { %v1906_v5 = vpop.f32.mrf.mxu1 }
 0x16a   : > { %v2297_v49 = vpop.f32.mrf.mxu0  ;;  %v6715_v50 = vadd.f32 %v5050_v13, %v2010_v57  ;;  %v2009_v6 = vadd.f32 %v1906_v5, %v6590_v42 }
 0x16b   : > { %v5003_v28 = vpop.f32.mrf.mxu1 }
 0x16c   : > { %v5053_v60 = vpop.f32.mrf.mxu0  ;;  %v6718_v24 = vadd.f32 %v2297_v49, %v2009_v6  ;;  %v2012_v34 = vadd.f32 %v5003_v28, %v6595_v16 }
 0x16d   : > { %v1916_v25 = vpop.f32.mrf.mxu1 }
 0x16e   : > { %v2307_v30 = vpop.f32.mrf.mxu0  ;;  %v6721_v41 = vadd.f32 %v5053_v60, %v2012_v34  ;;  %v2011_v51 = vadd.f32 %v1916_v25, %v6600_v7 }
 0x16f   : > { %v5006_v10 = vpop.f32.mrf.mxu1 }
 0x170   : > { %v5056_v47 = vpop.f32.mrf.mxu0  ;;  %v6724_v17 = vadd.f32 %v2307_v30, %v2011_v51  ;;  %v2014_v8 = vadd.f32 %v5006_v10, %v6605_v56 }
 0x171   : > { %v1926_v59 = vpop.f32.mrf.mxu1 }
 0x172   : > { %v2317_v42 = vpop.f32.mrf.mxu0  ;;  %v6727_v2 = vadd.f32 %v5056_v47, %v2014_v8  ;;  %v2013_v0 = vadd.f32 %v1926_v59, %v6610_v44 }
 0x173   : > { %v5009_v53 = vpop.f32.mrf.mxu1 }
 0x174   : > { %7245 = vst [vmem:[#allocation6_spill] sm:$0xff] %v6727_v2  ;;  %v5059_v16 = vpop.f32.mrf.mxu0  ;;  %v6730_v29 = vadd.f32 %v2317_v42, %v2013_v0  ;;  %v2016_v3 = vadd.f32 %v5009_v53, %v6615_v9 }
 0x175   : > { %v1936_v4 = vpop.f32.mrf.mxu1 }
 0x176   : > { %7246 = vst [vmem:[#allocation7_spill] sm:$0xff] %v6730_v29  ;;  %v2327_v7 = vpop.f32.mrf.mxu0  ;;  %v6733_v55 = vadd.f32 %v5059_v16, %v2016_v3  ;;  %v2015_v46 = vadd.f32 %v1936_v4, %v6620_v61 }
 0x177   : > { %v5012_v37 = vpop.f32.mrf.mxu1 }
 0x178   : > { %7247 = vst [vmem:[#allocation8_spill] sm:$0xff] %v6733_v55  ;;  %v5062_v56 = vpop.f32.mrf.mxu0  ;;  %v6736_v48 = vadd.f32 %v2327_v7, %v2015_v46  ;;  %v2018_v52 = vadd.f32 %v5012_v37, %v6625_v19 }
 0x179   : > { %v1946_v43 = vpop.f32.mrf.mxu1 }
 0x17a   : > { %7248 = vst [vmem:[#allocation9_spill] sm:$0xff] %v6736_v48  ;;  %v2337_v44 = vpop.f32.mrf.mxu0  ;;  %v6739_v62 = vadd.f32 %v5062_v56, %v2018_v52  ;;  %v2017_v22 = vadd.f32 %v1946_v43, %v6630_v27 }
 0x17b   : > { %v5015_v13 = vpop.f32.mrf.mxu1 }
 0x17c   : > { %7249 = vst [vmem:[#allocation10_spill] sm:$0xff] %v6739_v62  ;;  %v5065_v9 = vpop.f32.mrf.mxu0  ;;  %v6742_v57 = vadd.f32 %v2337_v44, %v2017_v22  ;;  %v2020_v5 = vadd.f32 %v5015_v13, %v6635_v23 }
 0x17d   : > { %v1956_v49 = vpop.f32.mrf.mxu1 }
 0x17e   : > { %7250 = vst [vmem:[#allocation11_spill] sm:$0xff] %v6742_v57  ;;  %v2347_v61 = vpop.f32.mrf.mxu0  ;;  %v6745_v6 = vadd.f32 %v5065_v9, %v2020_v5  ;;  %v2019_v28 = vadd.f32 %v1956_v49, %v6640_v39 }
 0x17f   : > { %v5018_v60 = vpop.f32.mrf.mxu1 }
 0x180   : > { %7251 = vst [vmem:[#allocation12_spill] sm:$0xff] %v6745_v6  ;;  %v5068_v19 = vpop.f32.mrf.mxu0  ;;  %v6748_v34 = vadd.f32 %v2347_v61, %v2019_v28  ;;  %v2022_v25 = vadd.f32 %v5018_v60, %v6647_v63 }
 0x181   : > { %v1966_v30 = vpop.f32.mrf.mxu1 }
 0x182   : > { %7252 = vst [vmem:[#allocation13_spill] sm:$0xff] %v6748_v34  ;;  %v2357_v27 = vpop.f32.mrf.mxu0  ;;  %v6751_v51 = vadd.f32 %v5068_v19, %v2022_v25  ;;  %v2021_v10 = vadd.f32 %v1966_v30, %v6654_v38 }
 0x183   : > { %v5021_v47 = vpop.f32.mrf.mxu1 }
 0x184   : > { %7253 = vst [vmem:[#allocation14_spill] sm:$0xff] %v6751_v51  ;;  %v5071_v23 = vpop.f32.mrf.mxu0  ;;  %v6754_v8 = vadd.f32 %v2357_v27, %v2021_v10  ;;  %v2024_v59 = vadd.f32 %v5021_v47, %v6659_v14 }
 0x185   : > { %v1976_v42 = vpop.f32.mrf.mxu1 }
 0x186   : > { %7254 = vst [vmem:[#allocation15_spill] sm:$0xff] %v6754_v8  ;;  %v2367_v39 = vpop.f32.mrf.mxu0  ;;  %v6757_v0 = vadd.f32 %v5071_v23, %v2024_v59  ;;  %v2023_v53 = vadd.f32 %v1976_v42, %v6664_v18 }
 0x187   : > { %v5024_v16 = vpop.f32.mrf.mxu1 }
 0x188   : > { %7255 = vst [vmem:[#allocation16_spill] sm:$0xff] %v6757_v0  ;;  %v5074_v63 = vpop.f32.mrf.mxu0  ;;  %v6760_v3 = vadd.f32 %v2367_v39, %v2023_v53  ;;  %v2026_v4 = vadd.f32 %v5024_v16, %v6667_v1 }
 0x189   : > { %v1986_v7 = vpop.f32.mrf.mxu1 }
 0x18a   : > { %7256 = vst [vmem:[#allocation17_spill] sm:$0xff] %v6760_v3  ;;  %v2377_v38 = vpop.f32.mrf.mxu0  ;;  %v6763_v46 = vadd.f32 %v5074_v63, %v2026_v4  ;;  %v2025_v37 = vadd.f32 %v1986_v7, %v6670_v20 }
 0x18b   : > { %v5079_v56 = vpop.f32.mrf.mxu1 }
 0x18c   : > { %7257 = vst [vmem:[#allocation18_spill] sm:$0xff] %v6763_v46  ;;  %v6766_v14 = vpop.f32.mrf.mxu0  ;;  %v6768_v52 = vadd.f32 %v2377_v38, %v2025_v37 }
 0x18d   : > { %v2618_v43 = vpop.f32.mrf.mxu1 }
 0x18e   : > { %7258 = vst [vmem:[#allocation19_spill] sm:$0xff] %v6768_v52  ;;  %v6770_v44 = vpop.f32.mrf.mxu0 }
 0x18f   : > { %v6772_v18 = vpop.f32.mrf.mxu1 }
 0x190   : > { %v6774_v22 = vpop.f32.mrf.mxu0 }
 0x191   : > { %v6776_v13 = vpop.f32.mrf.mxu1 }
 0x192   : > { %v6778_v1 = vpop.f32.mrf.mxu0 }
 0x193   : > { %v6780_v9 = vpop.f32.mrf.mxu1 }
 0x194   : > { %v6782_v5 = vpop.f32.mrf.mxu0 }
 0x195   : > { %v6784_v20 = vpop.f32.mrf.mxu1 }
 0x196   : > { %v6786_v49 = vpop.f32.mrf.mxu0 }
 0x197   : > { %v6788_v61 = vpop.f32.mrf.mxu1 }
 0x198   : > { %v6790_v28 = vpop.f32.mrf.mxu0 }
 0x199   : > { %v6792_v60 = vpop.f32.mrf.mxu1 }
 0x19a   : > { %v6794_v19 = vpop.f32.mrf.mxu0 }
 0x19b   : > { %v6796_v25 = vpop.f32.mrf.mxu1 }
 0x19c   : > { %v6798_v30 = vpop.f32.mrf.mxu0 }
 0x19d   : > { %v6800_v27 = vpop.f32.mrf.mxu1 }
 0x19e   : > { %v6802_v10 = vpop.f32.mrf.mxu0 }
 0x19f   : > { %v6804_v47 = vpop.f32.mrf.mxu1 }
 0x1a0   : > { %v6806_v23 = vpop.f32.mrf.mxu0 }
 0x1a1   : > { %v6808_v59 = vpop.f32.mrf.mxu1 }
 0x1a2   : > { %v6810_v42 = vpop.f32.mrf.mxu0 }
 0x1a3   : > { %v6812_v39 = vpop.f32.mrf.mxu1 }
 0x1a4   : > { %v6814_v53 = vpop.f32.mrf.mxu0 }
 0x1a5   : > { %v6816_v16 = vpop.f32.mrf.mxu1 }
 0x1a6   : > { %v6818_v63 = vpop.f32.mrf.mxu0 }
 0x1a7   : > { %v6820_v4 = vpop.f32.mrf.mxu1 }
 0x1a8   : > { %v6822_v7 = vpop.f32.mrf.mxu0 }
 0x1a9   : > { %v6824_v38 = vpop.f32.mrf.mxu1 }
 0x1aa   : > { %v6826_v37 = vpop.f32.mrf.mxu0 }
 0x1ab   : > { %v6828_v52 = vpop.f32.mrf.mxu1 }
 0x1ac   : > { %v6830_v46 = vpop.f32.mrf.mxu0 }
 0x1ad   : > { %v6832_v3 = vpop.f32.mrf.mxu1 }
 0x1ae   : > { %v6834_v0 = vpop.f32.mrf.mxu0 }
 0x1af   : > { %7259 = vst [vmem:[#allocation20_spill] sm:$0xff] %v6834_v0  ;;  %v6836_v8 = vpop.f32.mrf.mxu1 }
 0x1b0   : > { %7260 = vst [vmem:[#allocation21_spill] sm:$0xff] %v6836_v8  ;;  %v6838_v51 = vpop.f32.mrf.mxu0 }
 0x1b1   : > { %7261 = vst [vmem:[#allocation22_spill] sm:$0xff] %v6838_v51  ;;  %v6840_v34 = vpop.f32.mrf.mxu1 }
 0x1b2   : > { %7262 = vst [vmem:[#allocation23_spill] sm:$0xff] %v6840_v34  ;;  %v6842_v6 = vpop.f32.mrf.mxu0 }
 0x1b3   : > { %7263 = vst [vmem:[#allocation24_spill] sm:$0xff] %v6842_v6  ;;  %v6844_v57 = vpop.f32.mrf.mxu1 }
 0x1b4   : > { %7264 = vst [vmem:[#allocation25_spill] sm:$0xff] %v6844_v57  ;;  %v6846_v62 = vpop.f32.mrf.mxu0 }
 0x1b5   : > { %7265 = vst [vmem:[#allocation26_spill] sm:$0xff] %v6846_v62  ;;  %v6848_v48 = vpop.f32.mrf.mxu1 }
 0x1b6   : > { %7266 = vst [vmem:[#allocation27_spill] sm:$0xff] %v6848_v48  ;;  %v6850_v55 = vpop.f32.mrf.mxu0 }
 0x1b7   : > { %7267 = vst [vmem:[#allocation28_spill] sm:$0xff] %v6850_v55  ;;  %v6852_v29 = vpop.f32.mrf.mxu1 }
 0x1b8   : > { %v6854_v2 = vpop.f32.mrf.mxu0 }
 0x1b9   : > { %7268 = vst [vmem:[#allocation29_spill] sm:$0xff] %v6854_v2  ;;  %v6856_v0 = vpop.f32.mrf.mxu1 }
 0x1ba   : > { %7269 = vst [vmem:[#allocation30_spill] sm:$0xff] %v6856_v0  ;;  %v6858_v8 = vpop.f32.mrf.mxu0 }
 0x1bb   : > { %7270 = vst [vmem:[#allocation31_spill] sm:$0xff] %v6858_v8  ;;  %v6860_v51 = vpop.f32.mrf.mxu1 }
 0x1bc   : > { %7271 = vst [vmem:[#allocation32_spill] sm:$0xff] %v6860_v51  ;;  %v6862_v34 = vpop.f32.mrf.mxu0 }
 0x1bd   : > { %7272 = vst [vmem:[#allocation33_spill] sm:$0xff] %v6862_v34  ;;  %v6864_v6 = vpop.f32.mrf.mxu1 }
 0x1be   : > { %7273 = vst [vmem:[#allocation34_spill] sm:$0xff] %v6864_v6  ;;  %v6866_v57 = vpop.f32.mrf.mxu0  ;;  %v2778_v6 = vadd.f32 %v5079_v56, %v6673_v33  ;;  %v2779_v56 = vadd.f32 %v6776_v13, %v6682_v45  ;;  %v2781_v45 = vadd.f32 %v6784_v20, %v6688_v12 }
 0x1bf   : > { %7274 = vst [vmem:[#allocation35_spill] sm:$0xff] %v6866_v57  ;;  %v6868_v62 = vpop.f32.mrf.mxu1 }
 0x1c0   : > { %7275 = vst [vmem:[#allocation36_spill] sm:$0xff] %v6868_v62  ;;  %v6870_v48 = vpop.f32.mrf.mxu0 }
 0x1c1   : > { %7276 = vst [vmem:[#allocation37_spill] sm:$0xff] %v6870_v48  ;;  %v6872_v55 = vpop.f32.mrf.mxu1  ;;  %v2777_v48 = vadd.f32 %v2618_v43, %v6676_v32  ;;  %v2782_v32 = vadd.f32 %v6780_v9, %v6685_v11  ;;  %v6906_v43 = vld [vmem:[%s7151_s3] ss:$0 sm:$0xff]  ;;  %v3170_v11 = vadd.f32 %v6778_v1, %v2779_v56  ;;  %v2783_v1 = vadd.f32 %v6792_v60, %v6694_v31 }
 0x1c2   : > { %7277 = vst [vmem:[#allocation38_spill] sm:$0xff] %v6872_v55  ;;  %v6874_v2 = vpop.f32.mrf.mxu0 }
 0x1c3   : > { %7278 = vst [vmem:[#allocation39_spill] sm:$0xff] %v6874_v2  ;;  %v6876_v0 = vpop.f32.mrf.mxu1  ;;  %v3168_v33 = vadd.f32 %v6770_v44, %v2777_v48 }
 0x1c4   : > { %7279 = vst [vmem:[#allocation40_spill] sm:$0xff] %v6876_v0  ;;  %v6878_v8 = vpop.f32.mrf.mxu0  ;;  %v3169_v0 = vadd.f32 %v6766_v14, %v2778_v6 }
 0x1c5   : > { %7280 = vst [vmem:[#allocation41_spill] sm:$0xff] %v6878_v8  ;;  %v6880_v51 = vpop.f32.mrf.mxu1  ;;  %v2780_v8 = vadd.f32 %v6772_v18, %v6679_v40 }
 0x1c6   : > { %7281 = vst [vmem:[#allocation42_spill] sm:$0xff] %v6880_v51  ;;  %v6882_v34 = vpop.f32.mrf.mxu0 }
 0x1c7   : > { %7282 = vst [vmem:[#allocation43_spill] sm:$0xff] %v6882_v34  ;;  %v6885_v57 = vpop.f32.mrf.mxu1  ;;  %v3171_v40 = vadd.f32 %v6774_v22, %v2780_v8  ;;  %v2784_v8 = vadd.f32 %v6788_v61, %v6691_v15 }
 0x1c8   : > { %v6887_v62 = vpop.f32.mrf.mxu0 }
 0x1c9   : > { %7283 = vst [vmem:[#allocation44_spill] sm:$0xff] %v6887_v62  ;;  %v6890_v55 = vpop.f32.mrf.mxu1 }
 0x1ca   : > { %v6892_v2 = vpop.f32.mrf.mxu0 }
 0x1cb   : > { %7284 = vst [vmem:[#allocation45_spill] sm:$0xff] %v6892_v2  ;;  %v5179_v51 = vpop.f32.mrf.mxu1  ;;  %v3173_v2 = vadd.f32 %v6782_v5, %v2782_v32 }
 0x1cc   : > { %v5229_v34 = vpop.f32.mrf.mxu0  ;;  %v3560_v62 = vadd.f32 %v5179_v51, %v3169_v0 }
 0x1cd   : > { %v3400_v6 = vpop.f32.mrf.mxu1 }
 0x1ce   : > { %v3791_v14 = vpop.f32.mrf.mxu0  ;;  %v3951_v18 = vadd.f32 %v5229_v34, %v3560_v62  ;;  %v3559_v48 = vadd.f32 %v3400_v6, %v3168_v33  ;;  %v3172_v6 = vadd.f32 %v6786_v49, %v2781_v45  ;;  %v2786_v49 = vadd.f32 %v6796_v25, %v6697_v54 }
 0x1cf   : > { %v5182_v51 = vpop.f32.mrf.mxu1 }
 0x1d0   : > { %v5232_v0 = vpop.f32.mrf.mxu0  ;;  %v3990_v44 = vadd.f32 %v6906_v43, %v3951_v18  ;;  %v3950_v13 = vadd.f32 %v3791_v14, %v3559_v48  ;;  %v3562_v9 = vadd.f32 %v5182_v51, %v3171_v40  ;;  %v3175_v40 = vadd.f32 %v6790_v28, %v2784_v8 }
 0x1d1   : > { %v3410_v22 = vpop.f32.mrf.mxu1  ;;  %v2788_v8 = vadd.f32 %v6804_v47, %v6703_v21 }
 0x1d2   : > { %v3801_v62 = vpop.f32.mrf.mxu0  ;;  %v4022_v34 = vmax.f32 %v3990_v44, 0.0  ;;  %v3989_v33 = vadd.f32 %v6906_v43, %v3950_v13  ;;  %v3953_v12 = vadd.f32 %v5232_v0, %v3562_v9  ;;  %v3561_v20 = vadd.f32 %v3410_v22, %v3170_v11 }
 0x1d3   : > { %v5185_v56 = vpop.f32.mrf.mxu1  ;;  %v3174_v0 = vadd.f32 %v6794_v19, %v2783_v1  ;;  %v3177_v9 = vadd.f32 %v6798_v30, %v2786_v49 }
 0x1d4   : > { %v5235_v14 = vpop.f32.mrf.mxu0  ;;  %4055 = vst.msk [vmem:[%s6922_s26 + $0x8] sm:$0xff] %vm4053_vm2, %v4022_v34  ;;  %v4021_v15 = vmax.f32 %v3989_v33, 0.0  ;;  %v3992_v5 = vadd.f32 %v6906_v43, %v3953_v12  ;;  %v3952_v61 = vadd.f32 %v3801_v62, %v3561_v20  ;;  %v3564_v32 = vadd.f32 %v5185_v56, %v3173_v2 }
 0x1d5   : > { %v3420_v31 = vpop.f32.mrf.mxu1  ;;  %v2785_v2 = vadd.f32 %v6800_v27, %v6700_v36  ;;  %v2787_v12 = vadd.f32 %v6808_v59, %v6706_v26  ;;  %v3179_v56 = vadd.f32 %v6806_v23, %v2788_v8 }
 0x1d6   : > { %v3811_v60 = vpop.f32.mrf.mxu0  ;;  %4054 = vst.msk [vmem:[%s6922_s26] sm:$0xff] %vm4053_vm2, %v4021_v15  ;;  %v4024_v18 = vmax.f32 %v3992_v5, 0.0  ;;  %v3991_v48 = vadd.f32 %v6906_v43, %v3952_v61  ;;  %v3955_v45 = vadd.f32 %v5235_v14, %v3564_v32  ;;  %v3563_v51 = vadd.f32 %v3420_v31, %v3172_v6 }
 0x1d7   : > { %v5188_v11 = vpop.f32.mrf.mxu1  ;;  %v3176_v33 = vadd.f32 %v6802_v10, %v2785_v2  ;;  %v2790_v14 = vadd.f32 %v6812_v39, %v6709_v35  ;;  %v3178_v32 = vadd.f32 %v6810_v42, %v2787_v12  ;;  %v7285_v12 = vld [vmem:[#allocation6_spill] sm:$0xff] }
 0x1d8   : > { %v5238_v28 = vpop.f32.mrf.mxu0  ;;  %4057 = vst.msk [vmem:[%s6922_s26 + $0x18] sm:$0xff] %vm4053_vm2, %v4024_v18  ;;  %v4023_v54 = vmax.f32 %v3991_v48, 0.0  ;;  %v3994_v25 = vadd.f32 %v6906_v43, %v3955_v45  ;;  %v3954_v44 = vadd.f32 %v3811_v60, %v3563_v51  ;;  %v3566_v13 = vadd.f32 %v5188_v11, %v3175_v40 }
 0x1d9   : > { %v3430_v22 = vpop.f32.mrf.mxu1  ;;  %v2789_v40 = vadd.f32 %v6816_v16, %v6712_v58  ;;  %v3181_v18 = vadd.f32 %v6814_v53, %v2790_v14  ;;  %v2792_v48 = vadd.f32 %v6820_v4, %v6715_v50  ;;  %v2791_v11 = vadd.f32 %v6824_v38, %v6718_v24  ;;  %v7288_v14 = vld [vmem:[#allocation7_spill] sm:$0xff] }
 0x1da   : > { %v3821_v19 = vpop.f32.mrf.mxu0  ;;  %4056 = vst.msk [vmem:[%s6922_s26 + $0x10] sm:$0xff] %vm4053_vm2, %v4023_v54  ;;  %v4026_v36 = vmax.f32 %v3994_v25, 0.0  ;;  %v3993_v27 = vadd.f32 %v6906_v43, %v3954_v44  ;;  %v3957_v62 = vadd.f32 %v5238_v28, %v3566_v13  ;;  %v3565_v34 = vadd.f32 %v3430_v22, %v3174_v0 }
 0x1db   : > { %v5191_v20 = vpop.f32.mrf.mxu1  ;;  %v3180_v2 = vadd.f32 %v6818_v63, %v2789_v40  ;;  %v3183_v44 = vadd.f32 %v6822_v7, %v2792_v48  ;;  %v2794_v13 = vadd.f32 %v6828_v52, %v6721_v41  ;;  %v7290_v40 = vld [vmem:[#allocation22_spill] sm:$0xff] }
 0x1dc   : > { %v5241_v30 = vpop.f32.mrf.mxu0  ;;  %4059 = vst.msk [vmem:[%s6922_s26 + $0x28] sm:$0xff] %vm4053_vm2, %v4026_v36  ;;  %v4025_v21 = vmax.f32 %v3993_v27, 0.0  ;;  %v3996_v47 = vadd.f32 %v6906_v43, %v3957_v62  ;;  %v3956_v6 = vadd.f32 %v3821_v19, %v3565_v34  ;;  %v3568_v1 = vadd.f32 %v5191_v20, %v3177_v9  ;;  %v7286_v20 = vld [vmem:[#allocation21_spill] sm:$0xff] }
 0x1dd   : > { %v3440_v15 = vpop.f32.mrf.mxu1  ;;  %v3182_v19 = vadd.f32 %v6826_v37, %v2791_v11  ;;  %v2793_v36 = vadd.f32 %v6832_v3, %v6724_v17 }
 0x1de   : > { %v3831_v10 = vpop.f32.mrf.mxu0  ;;  %4058 = vst.msk [vmem:[%s6922_s26 + $0x20] sm:$0xff] %vm4053_vm2, %v4025_v21  ;;  %v4028_v26 = vmax.f32 %v3996_v47, 0.0  ;;  %v3995_v59 = vadd.f32 %v6906_v43, %v3956_v6  ;;  %v3959_v5 = vadd.f32 %v5241_v30, %v3568_v1  ;;  %v3567_v61 = vadd.f32 %v3440_v15, %v3176_v33  ;;  %v7287_v1 = vld [vmem:[#allocation20_spill] sm:$0xff]  ;;  %v7289_v15 = vld [vmem:[#allocation23_spill] sm:$0xff] }
 0x1df   : > { %v5194_v49 = vpop.f32.mrf.mxu1  ;;  %v3185_v33 = vadd.f32 %v6830_v46, %v2794_v13  ;;  %v2796_v30 = vadd.f32 %v7286_v20, %v7285_v12  ;;  %v7297_v13 = vld [vmem:[#allocation10_spill] sm:$0xff] }
 0x1e0   : > { %v5244_v23 = vpop.f32.mrf.mxu0  ;;  %4061 = vst.msk [vmem:[%s6922_s26 + $0x38] sm:$0xff] %vm4053_vm2, %v4028_v26  ;;  %v4027_v35 = vmax.f32 %v3995_v59, 0.0  ;;  %v3998_v39 = vadd.f32 %v6906_v43, %v3959_v5  ;;  %v3958_v31 = vadd.f32 %v3831_v10, %v3567_v61  ;;  %v3570_v60 = vadd.f32 %v5194_v49, %v3179_v56 }
 0x1e1   : > { %v3450_v45 = vpop.f32.mrf.mxu1  ;;  %v3184_v56 = vadd.f32 %v7287_v1, %v2793_v36  ;;  %v2795_v10 = vadd.f32 %v7289_v15, %v7288_v14  ;;  %v3187_v49 = vadd.f32 %v7290_v40, %v2796_v30  ;;  %v7298_v36 = vld [vmem:[#allocation28_spill] sm:$0xff]  ;;  %v7301_v30 = vld [vmem:[#allocation29_spill] sm:$0xff] }
 0x1e2   : > { %v3841_v42 = vpop.f32.mrf.mxu0  ;;  %4060 = vst.msk [vmem:[%s6922_s26 + $0x30] sm:$0xff] %vm4053_vm2, %v4027_v35  ;;  %v4030_v58 = vmax.f32 %v3998_v39, 0.0  ;;  %v3997_v16 = vadd.f32 %v6906_v43, %v3958_v31  ;;  %v3961_v51 = vadd.f32 %v5244_v23, %v3570_v60  ;;  %v3569_v0 = vadd.f32 %v3450_v45, %v3178_v32  ;;  %v7291_v23 = vld [vmem:[#allocation8_spill] sm:$0xff]  ;;  %v7292_v35 = vld [vmem:[#allocation25_spill] sm:$0xff] }
 0x1e3   : > { %v5197_v28 = vpop.f32.mrf.mxu1  ;;  %v2798_v39 = vadd.f32 %v7292_v35, %v7291_v23 }
 0x1e4   : > { %v5247_v53 = vpop.f32.mrf.mxu0  ;;  %4063 = vst.msk [vmem:[%s6922_s26 + $0x48] sm:$0xff] %vm4053_vm2, %v4030_v58  ;;  %v4029_v50 = vmax.f32 %v3997_v16, 0.0  ;;  %v4000_v4 = vadd.f32 %v6906_v43, %v3961_v51  ;;  %v3960_v54 = vadd.f32 %v3841_v42, %v3569_v0  ;;  %v3572_v25 = vadd.f32 %v5197_v28, %v3181_v18  ;;  %v7293_v58 = vld [vmem:[#allocation24_spill] sm:$0xff]  ;;  %v7294_v51 = vld [vmem:[#allocation9_spill] sm:$0xff]  ;;  %v7295_v0 = vld [vmem:[#allocation27_spill] sm:$0xff] }
 0x1e5   : > { %v3460_v9 = vpop.f32.mrf.mxu1  ;;  %v3186_v16 = vadd.f32 %v7293_v58, %v2795_v10  ;;  %v7304_v10 = vld [vmem:[#allocation31_spill] sm:$0xff] }
 0x1e6   : > { %v3851_v63 = vpop.f32.mrf.mxu0  ;;  %4062 = vst.msk [vmem:[%s6922_s26 + $0x40] sm:$0xff] %vm4053_vm2, %v4029_v50  ;;  %v4032_v24 = vmax.f32 %v4000_v4, 0.0  ;;  %v3999_v38 = vadd.f32 %v6906_v43, %v3960_v54  ;;  %v3963_v8 = vadd.f32 %v5247_v53, %v3572_v25  ;;  %v3571_v22 = vadd.f32 %v3460_v9, %v3180_v2  ;;  %v7296_v25 = vld [vmem:[#allocation26_spill] sm:$0xff] }
 0x1e7   : > { %v5200_v27 = vpop.f32.mrf.mxu1  ;;  %v2797_v2 = vadd.f32 %v7295_v0, %v7294_v51  ;;  %v2800_v9 = vadd.f32 %v6852_v29, %v7297_v13 }
 0x1e8   : > { %v5250_v7 = vpop.f32.mrf.mxu0  ;;  %4065 = vst.msk [vmem:[%s6922_s26 + $0x58] sm:$0xff] %vm4053_vm2, %v4032_v24  ;;  %v4031_v41 = vmax.f32 %v3999_v38, 0.0  ;;  %v4002_v52 = vadd.f32 %v6906_v43, %v3963_v8  ;;  %v3962_v62 = vadd.f32 %v3851_v63, %v3571_v22  ;;  %v3574_v34 = vadd.f32 %v5200_v27, %v3183_v44 }
 0x1e9   : > { %v3470_v21 = vpop.f32.mrf.mxu1  ;;  %v3189_v44 = vadd.f32 %v7296_v25, %v2798_v39  ;;  %v3188_v27 = vadd.f32 %v7298_v36, %v2797_v2  ;;  %v7307_v39 = vld [vmem:[#allocation33_spill] sm:$0xff]  ;;  %v7310_v2 = vld [vmem:[#allocation35_spill] sm:$0xff] }
 0x1ea   : > { %v3861_v37 = vpop.f32.mrf.mxu0  ;;  %4064 = vst.msk [vmem:[%s6922_s26 + $0x50] sm:$0xff] %vm4053_vm2, %v4031_v41  ;;  %v4034_v17 = vmax.f32 %v4002_v52, 0.0  ;;  %v4001_v3 = vadd.f32 %v6906_v43, %v3962_v62  ;;  %v3965_v47 = vadd.f32 %v5250_v7, %v3574_v34  ;;  %v3573_v6 = vadd.f32 %v3470_v21, %v3182_v19  ;;  %v7299_v7 = vld [vmem:[#allocation11_spill] sm:$0xff]  ;;  %v7300_v41 = vld [vmem:[#allocation30_spill] sm:$0xff] }
 0x1eb   : > { %v5203_v26 = vpop.f32.mrf.mxu1  ;;  %v2799_v52 = vadd.f32 %v7300_v41, %v7299_v7  ;;  %v3191_v21 = vadd.f32 %v7301_v30, %v2800_v9 }
 0x1ec   : > { %v5253_v46 = vpop.f32.mrf.mxu0  ;;  %4067 = vst.msk [vmem:[%s6922_s26 + $0x68] sm:$0xff] %vm4053_vm2, %v4034_v17  ;;  %v4033_v59 = vmax.f32 %v4001_v3, 0.0  ;;  %v4004_v5 = vadd.f32 %v6906_v43, %v3965_v47  ;;  %v3964_v61 = vadd.f32 %v3861_v37, %v3573_v6  ;;  %v3576_v32 = vadd.f32 %v5203_v26, %v3185_v33  ;;  %v7302_v37 = vld [vmem:[#allocation12_spill] sm:$0xff] }
 0x1ed   : > { %v3480_v31 = vpop.f32.mrf.mxu1  ;;  %v7303_v17 = vld [vmem:[#allocation32_spill] sm:$0xff]  ;;  %v3190_v26 = vadd.f32 %v7304_v10, %v2799_v52 }
 0x1ee   : > { %v3871_v60 = vpop.f32.mrf.mxu0  ;;  %4066 = vst.msk [vmem:[%s6922_s26 + $0x60] sm:$0xff] %vm4053_vm2, %v4033_v59  ;;  %v4036_v18 = vmax.f32 %v4004_v5, 0.0  ;;  %v4003_v48 = vadd.f32 %v6906_v43, %v3964_v61  ;;  %v3967_v45 = vadd.f32 %v5253_v46, %v3576_v32  ;;  %v3575_v42 = vadd.f32 %v3480_v31, %v3184_v56  ;;  %v7305_v46 = vld [vmem:[#allocation13_spill] sm:$0xff]  ;;  %v7306_v59 = vld [vmem:[#allocation34_spill] sm:$0xff] }
 0x1ef   : > { %v5206_v11 = vpop.f32.mrf.mxu1  ;;  %v2802_v3 = vadd.f32 %v7303_v17, %v7302_v37  ;;  %v2801_v5 = vadd.f32 %v7306_v59, %v7305_v46 }
 0x1f0   : > { %v5256_v28 = vpop.f32.mrf.mxu0  ;;  %4069 = vst.msk [vmem:[%s6922_s26 + $0x78] sm:$0xff] %vm4053_vm2, %v4036_v18  ;;  %v4035_v53 = vmax.f32 %v4003_v48, 0.0  ;;  %v4006_v50 = vadd.f32 %v6906_v43, %v3967_v45  ;;  %v3966_v4 = vadd.f32 %v3871_v60, %v3575_v42  ;;  %v3578_v54 = vadd.f32 %v5206_v11, %v3187_v49  ;;  %v7308_v60 = vld [vmem:[#allocation14_spill] sm:$0xff]  ;;  %v7309_v18 = vld [vmem:[#allocation36_spill] sm:$0xff] }
 0x1f1   : > { %v3490_v63 = vpop.f32.mrf.mxu1  ;;  %v3193_v31 = vadd.f32 %v7307_v39, %v2802_v3  ;;  %v2804_v48 = vadd.f32 %v7309_v18, %v7308_v60  ;;  %v3192_v11 = vadd.f32 %v7310_v2, %v2801_v5  ;;  %v7321_v5 = vld [vmem:[#allocation43_spill] sm:$0xff]  ;;  %v7323_v60 = vld [vmem:[#allocation44_spill] sm:$0xff] }
 0x1f2   : > { %v3881_v24 = vpop.f32.mrf.mxu0  ;;  %4068 = vst.msk [vmem:[%s6922_s26 + $0x70] sm:$0xff] %vm4053_vm2, %v4035_v53  ;;  %v4038_v38 = vmax.f32 %v4006_v50, 0.0  ;;  %v4005_v8 = vadd.f32 %v6906_v43, %v3966_v4  ;;  %v3969_v22 = vadd.f32 %v5256_v28, %v3578_v54  ;;  %v3577_v19 = vadd.f32 %v3490_v63, %v3186_v16  ;;  %v7311_v28 = vld [vmem:[#allocation15_spill] sm:$0xff]  ;;  %v7312_v53 = vld [vmem:[#allocation38_spill] sm:$0xff]  ;;  %v7313_v63 = vld [vmem:[#allocation37_spill] sm:$0xff] }
 0x1f3   : > { %v5209_v62 = vpop.f32.mrf.mxu1  ;;  %v2803_v50 = vadd.f32 %v7312_v53, %v7311_v28 }
 0x1f4   : > { %v5259_v34 = vpop.f32.mrf.mxu0  ;;  %4071 = vst.msk [vmem:[%s6922_s26 + $0x88] sm:$0xff] %vm4053_vm2, %v4038_v38  ;;  %v4037_v29 = vmax.f32 %v4005_v8, 0.0  ;;  %v4008_v33 = vadd.f32 %v6906_v43, %v3969_v22  ;;  %v3968_v12 = vadd.f32 %v3881_v24, %v3577_v19  ;;  %v3580_v20 = vadd.f32 %v5209_v62, %v3189_v44  ;;  %v7314_v38 = vld [vmem:[#allocation16_spill] sm:$0xff]  ;;  %v7316_v62 = vld [vmem:[#allocation39_spill] sm:$0xff] }
 0x1f5   : > { %v3500_v47 = vpop.f32.mrf.mxu1  ;;  %v3195_v24 = vadd.f32 %v7313_v63, %v2804_v48  ;;  %v7315_v8 = vld [vmem:[#allocation40_spill] sm:$0xff] }
 0x1f6   : > { %v3891_v6 = vpop.f32.mrf.mxu0  ;;  %4070 = vst.msk [vmem:[%s6922_s26 + $0x80] sm:$0xff] %vm4053_vm2, %v4037_v29  ;;  %v4040_v1 = vmax.f32 %v4008_v33, 0.0  ;;  %v4007_v56 = vadd.f32 %v6906_v43, %v3968_v12  ;;  %v3971_v14 = vadd.f32 %v5259_v34, %v3580_v20  ;;  %v3579_v15 = vadd.f32 %v3500_v47, %v3188_v27  ;;  %v7317_v29 = vld [vmem:[#allocation17_spill] sm:$0xff]  ;;  %v7318_v33 = vld [vmem:[#allocation42_spill] sm:$0xff] }
 0x1f7   : > { %v5212_v61 = vpop.f32.mrf.mxu1  ;;  %v2806_v22 = vadd.f32 %v7315_v8, %v7314_v38  ;;  %v3194_v34 = vadd.f32 %v7316_v62, %v2803_v50  ;;  %v2805_v12 = vadd.f32 %v7318_v33, %v7317_v29  ;;  %v7319_v47 = vld [vmem:[#allocation41_spill] sm:$0xff] }
 0x1f8   : > { %v5262_v32 = vpop.f32.mrf.mxu0  ;;  %4073 = vst.msk [vmem:[%s6922_s26 + $0x98] sm:$0xff] %vm4053_vm2, %v4040_v1  ;;  %v4039_v40 = vmax.f32 %v4007_v56, 0.0  ;;  %v4010_v49 = vadd.f32 %v6906_v43, %v3971_v14  ;;  %v3970_v23 = vadd.f32 %v3891_v6, %v3579_v15  ;;  %v3582_v35 = vadd.f32 %v5212_v61, %v3191_v21  ;;  %v7320_v1 = vld [vmem:[#allocation18_spill] sm:$0xff] }
 0x1f9   : > { %v3510_v45 = vpop.f32.mrf.mxu1  ;;  %v3197_v6 = vadd.f32 %v7319_v47, %v2806_v22  ;;  %v2808_v56 = vadd.f32 %v6885_v57, %v7320_v1  ;;  %v3196_v61 = vadd.f32 %v7321_v5, %v2805_v12 }
 0x1fa   : > { %v3901_v42 = vpop.f32.mrf.mxu0  ;;  %4072 = vst.msk [vmem:[%s6922_s26 + $0x90] sm:$0xff] %vm4053_vm2, %v4039_v40  ;;  %v4042_v58 = vmax.f32 %v4010_v49, 0.0  ;;  %v4009_v16 = vadd.f32 %v6906_v43, %v3970_v23  ;;  %v3973_v51 = vadd.f32 %v5262_v32, %v3582_v35  ;;  %v3581_v0 = vadd.f32 %v3510_v45, %v3190_v26  ;;  %v7322_v32 = vld [vmem:[#allocation19_spill] sm:$0xff] }
 0x1fb   : > { %v5215_v4 = vpop.f32.mrf.mxu1  ;;  %v2807_v40 = vadd.f32 %v6890_v55, %v7322_v32  ;;  %v3199_v18 = vadd.f32 %v7323_v60, %v2808_v56 }
 0x1fc   : > { %v5265_v54 = vpop.f32.mrf.mxu0  ;;  %4075 = vst.msk [vmem:[%s6922_s26 + $0xa8] sm:$0xff] %vm4053_vm2, %v4042_v58  ;;  %v4041_v25 = vmax.f32 %v4009_v16, 0.0  ;;  %v4012_v44 = vadd.f32 %v6906_v43, %v3973_v51  ;;  %v3972_v13 = vadd.f32 %v3901_v42, %v3581_v0  ;;  %v3584_v9 = vadd.f32 %v5215_v4, %v3193_v31  ;;  %v7324_v51 = vld [vmem:[#allocation45_spill] sm:$0xff] }
 0x1fd   : > { %v3520_v19 = vpop.f32.mrf.mxu1  ;;  %v3198_v0 = vadd.f32 %v7324_v51, %v2807_v40 }
 0x1fe   : > { %v3911_v36 = vpop.f32.mrf.mxu0  ;;  %4074 = vst.msk [vmem:[%s6922_s26 + $0xa0] sm:$0xff] %vm4053_vm2, %v4041_v25  ;;  %v4044_v27 = vmax.f32 %v4012_v44, 0.0  ;;  %v4011_v7 = vadd.f32 %v6906_v43, %v3972_v13  ;;  %v3975_v41 = vadd.f32 %v5265_v54, %v3584_v9  ;;  %v3583_v52 = vadd.f32 %v3520_v19, %v3192_v11 }
 0x1ff   : > { %v5218_v20 = vpop.f32.mrf.mxu1 }
 0x200   : > { %v5268_v30 = vpop.f32.mrf.mxu0  ;;  %4077 = vst.msk [vmem:[%s6922_s26 + $0xb8] sm:$0xff] %vm4053_vm2, %v4044_v27  ;;  %v4043_v21 = vmax.f32 %v4011_v7, 0.0  ;;  %v4014_v37 = vadd.f32 %v6906_v43, %v3975_v41  ;;  %v3974_v17 = vadd.f32 %v3911_v36, %v3583_v52  ;;  %v3586_v3 = vadd.f32 %v5218_v20, %v3195_v24 }
 0x201   : > { %v3530_v14 = vpop.f32.mrf.mxu1 }
 0x202   : > { %v3921_v15 = vpop.f32.mrf.mxu0  ;;  %4076 = vst.msk [vmem:[%s6922_s26 + $0xb0] sm:$0xff] %vm4053_vm2, %v4043_v21  ;;  %v4046_v10 = vmax.f32 %v4014_v37, 0.0  ;;  %v4013_v26 = vadd.f32 %v6906_v43, %v3974_v17  ;;  %v3977_v46 = vadd.f32 %v5268_v30, %v3586_v3  ;;  %v3585_v59 = vadd.f32 %v3530_v14, %v3194_v34 }
 0x203   : > { %v5221_v49 = vpop.f32.mrf.mxu1 }
 0x204   : > { %v5271_v23 = vpop.f32.mrf.mxu0  ;;  %4079 = vst.msk [vmem:[%s6922_s26 + $0xc8] sm:$0xff] %vm4053_vm2, %v4046_v10  ;;  %v4045_v57 = vmax.f32 %v4013_v26, 0.0  ;;  %v4016_v35 = vadd.f32 %v6906_v43, %v3977_v46  ;;  %v3976_v39 = vadd.f32 %v3921_v15, %v3585_v59  ;;  %v3588_v31 = vadd.f32 %v5221_v49, %v3197_v6 }
 0x205   : > { %v3540_v48 = vpop.f32.mrf.mxu1 }
 0x206   : > { %v3931_v45 = vpop.f32.mrf.mxu0  ;;  %4078 = vst.msk [vmem:[%s6922_s26 + $0xc0] sm:$0xff] %vm4053_vm2, %v4045_v57  ;;  %v4048_v42 = vmax.f32 %v4016_v35, 0.0  ;;  %v4015_v55 = vadd.f32 %v6906_v43, %v3976_v39  ;;  %v3979_v58 = vadd.f32 %v5271_v23, %v3588_v31  ;;  %v3587_v16 = vadd.f32 %v3540_v48, %v3196_v61 }
 0x207   : > { %v5224_v2 = vpop.f32.mrf.mxu1 }
 0x208   : > { %v5274_v11 = vpop.f32.mrf.mxu0  ;;  %4081 = vst.msk [vmem:[%s6922_s26 + $0xd8] sm:$0xff] %vm4053_vm2, %v4048_v42  ;;  %v4047_v28 = vmax.f32 %v4015_v55, 0.0  ;;  %v4018_v53 = vadd.f32 %v6906_v43, %v3979_v58  ;;  %v3978_v50 = vadd.f32 %v3931_v45, %v3587_v16  ;;  %v3590_v4 = vadd.f32 %v5224_v2, %v3199_v18 }
 0x209   : > { %v3550_v54 = vpop.f32.mrf.mxu1 }
 0x20a   : > { %4080 = vst.msk [vmem:[%s6922_s26 + $0xd0] sm:$0xff] %vm4053_vm2, %v4047_v28  ;;  %v4050_v25 = vmax.f32 %v4018_v53, 0.0  ;;  %v4017_v44 = vadd.f32 %v6906_v43, %v3978_v50  ;;  %v3981_v13 = vadd.f32 %v5274_v11, %v3590_v4  ;;  %v3589_v9 = vadd.f32 %v3550_v54, %v3198_v0  ;;  %v3941_v63 = vpop.f32.mrf.mxu0 }
 0x20c   : > { %4083 = vst.msk [vmem:[%s6922_s26 + $0xe8] sm:$0xff] %vm4053_vm2, %v4050_v25  ;;  %v4049_v24 = vmax.f32 %v4017_v44, 0.0  ;;  %v4020_v38 = vadd.f32 %v6906_v43, %v3981_v13  ;;  %v3980_v8 = vadd.f32 %v3941_v63, %v3589_v9 }
 0x20e   : > { %4082 = vst.msk [vmem:[%s6922_s26 + $0xe0] sm:$0xff] %vm4053_vm2, %v4049_v24  ;;  %v4052_v22 = vmax.f32 %v4020_v38, 0.0  ;;  %v4019_v19 = vadd.f32 %v6906_v43, %v3980_v8 }
 0x210   : > { %4085 = vst.msk [vmem:[%s6922_s26 + $0xf8] sm:$0xff] %vm4053_vm2, %v4052_v22  ;;  %v4051_v36 = vmax.f32 %v4019_v19, 0.0 }
 0x212   : > { %4084 = vst.msk [vmem:[%s6922_s26 + $0xf0] sm:$0xff] %vm4053_vm2, %v4051_v36 }
 0x213   : > { %5350 = shalt.err (!%p5347_p5)
}
 0x214   : > { %s5351_s12 = scalar_lea.hbm %s7093_s7, 4096  ;;  %s5355_s21 = scalar_lea.hbm %s7152_s4, 8192 }
 0x215   : > { %p5352_p6 = scmp.ne.s32.totalorder %s7093_s7, %s5351_s12  ;;  %p5356_p10 = scmp.lt.s32.totalorder %s7093_s7, %s7152_s4 }
 0x216   : > { %p5357_p11 = scmp.lt.s32.totalorder %s5355_s21, %s5351_s12 }
 0x217   : > { %p5353_p7 = pnand %p5352_p6, %p5483_p4 }
 0x218   : > { %p5358_p12 = por %p5357_p11, %p5356_p10 }
 0x219   : > { %p5354_p9 = pneg %p5353_p7 }
 0x21b   : > { %p5359_p13 = pnand %p5358_p12, %p5354_p9 }
 0x21d   : > { %5362 = shalt.err (!%p5359_p13)
}
 0x21e   : > { %s5416_s26 = smov 128   ;;  %s5417_s29 = smov 8  }
 0x21f   : > { %5279 = dma.vmem_to_hbm [thread:$0]  (%p5483_p4), %s7095_s30, 4096, %s7093_s7, %s7103_s18, %s5416_s26, %s5416_s26, %s5417_s29  }
 0x220 PF: > { %p5286_p0 = scmp.ge.s32.totalorder %s5413_s20, 2  ;;  %s4118_s5 = sand.u32 1, %s5393_s15  }
 0x221   : > { %s4119_s6 = scalar_lea.sflag [#allocation4], %s4118_s5 }
 0x222   : > { %p5282_p1 = pnand %p5286_p0, %p5490_p8 }
 0x224   : > { %p5283_p2 = pneg %p5282_p1 }
 0x226   : > { %5388 = dma.done.wait (%p5283_p2), %s4119_s6, 4096  }
 0x227   : > { %5390 = vsyncadd (%p5283_p2), %s4119_s6, 4294963200  ;;  %s17_s20 = sadd.s32 1, %s5413_s20   ;;  %s7325_s15 = smov %s5397_s16 }
 0x228   : > { %p14_p3 = scmp.ge.s32.totalorder %s17_s20, 4   ;;  %s7326_s16 = smov %s5401_s17 }
 0x229   : > { %s7327_s17 = smov %s5496_s28  ;;  %s7328_s18 = smov %s5409_s19 }
 0x22a   : > { %s7329_s19 = smov %s7331_s23  ;;  %16 = sbr.rel (!%p14_p3) target bundleno = 4 (0x4), region = 93 }
 0x22f   :  { %4124 = vsyncpa [#allocation4], 1 }
 0x230   :  { %4126 = vsyncpa [#allocation4 + $0x1], 1 }

// kernel: tpu_custom_call.1
= control target key start
LH: loop header
LB: loop body
LE: loop exit
PB: predicated region body
PF: predicated region fallthrough
CT: control target
= control target key end

     0   :  { %9 = vsyncpa [#allocation4], 0  ;;  %s7148_s0 = inlined_call_operand.vmem [shape: f32[2,18,18,4], index: 0, kind: input, shape index: {}]   ;;  %s7149_s1 = inlined_call_operand.vmem [shape: f32[2,18,18,4], index: 1, kind: input, shape index: {}]   ;;  %s7150_s2 = inlined_call_operand.vmem [shape: f32[9,4,32], index: 2, kind: input, shape index: {}]   ;;  %s7151_s3 = inlined_call_operand.vmem [shape: f32[1,32], index: 3, kind: input, shape index: {}]   ;;  %s7152_s4 = inlined_call_operand.hbm [shape: f32[2,16,16,32], index: 4, kind: output, shape index: {}]  }
   0x1   :  { %11 = vsyncpa [#allocation4 + $0x1], 0  ;;  %s5443_s15 = smov 0   ;;  %s5445_s16 = smov 0  }
   0x2   :  { %s5447_s17 = smov 0   ;;  %s5449_s18 = smov 0  }
   0x3   :  { %s5451_s19 = smov 0   ;;  %s5453_s20 = smov 0  }
   0x4 LB: > { %s4206_s21 = sadd.s32 4294967295, %s5413_s20   ;;  %s4207_s22 = sadd.s32 4294967294, %s5413_s20   ;;  %s5413_s20 = sphi %s5453_s20, %s17_s20   ;;  %s5409_s19 = sphi %s5451_s19, %s7329_s19   ;;  %s5405_s18 = sphi %s5449_s18, %s7328_s18   ;;  %s5401_s17 = sphi %s5447_s17, %s7327_s17   ;;  %s5397_s16 = sphi %s5445_s16, %s7326_s16   ;;  %s5393_s15 = sphi %s5443_s15, %s7325_s15  }
   0x5   : > { %s29_s23 = sadd.s32 1, %s5409_s19  ;;  %s140_s24 = sadd.s32 1, %s5401_s17 }
   0x6   : > { %p31_p0 = scmp.ge.s32.totalorder %s29_s23, 2  ;;  %p150_p1 = scmp.ne.s32.totalorder %s5401_s17, %s5397_s16 }
   0x7   : > { %p151_p2 = scmp.eq.s32.totalorder %s4206_s21, 1  ;;  %p156_p3 = scmp.ne.s32.totalorder %s5397_s16, %s5393_s15 }
   0x8   : > { %s7331_s23 = smov (%p31_p0, %s29_s23), 0  ;;  %p157_p5 = scmp.eq.s32.totalorder %s4207_s22, 1 }
   0x9   : > { %p5483_p4 = por %p151_p2, %p150_p1  ;;  %s135_s26 = ssub.s32 %s5409_s19, %s7331_s23 }
   0xa   : > { %p4210_p6 = scmp.ge.s32.totalorder %s5413_s20, 1  ;;  %p138_p7 = scmp.eq.s32.totalorder %s135_s26, 0 }
   0xb   : > { %p5490_p8 = por %p157_p5, %p156_p3  ;;  %p223_p9 = scmp.lt.s32.totalorder %s5413_s20, 3 }
   0xc   : > { %s5496_s28 = scalar_select %p138_p7, %s5401_s17, %s140_s24  }
   0xd   : > { %p224_p10 = pnand %p4210_p6, %p223_p9 }
   0xf   : > { %227 = sbr.rel (%p224_p10) target bundleno = 544 (0x220), region = 36 }
  0x14   : > { %v4214_v0 = vld [vmem:[%s7150_s2 + $0x4] sm:$0xf]  ;;  %vm693_vm0 = vcmask 1043456   ;;  %p277_p11 = scmp.lt.s32.totalorder %s5405_s18, 1  ;;  %v5507_v1 = vld [vmem:[%s7150_s2] sm:$0xf] }
  0x15   : > { %5275 = vmatprep.subr.msk.mxu1 %vm693_vm0, %v4214_v0  ;;  %4825 = vmatprep.subr.msk.mxu0 %vm693_vm0, %v4214_v0  ;;  %v5512_v2 = vld [vmem:[%s7150_s2 + $0x8] sm:$0xf]  ;;  %vm340_vm1 = vcmask 31744   ;;  %v5596_v33 = vld [vmem:[%s7150_s2 + $0xc] sm:$0xf]  ;;  %s268_s14 = sand.u32 1, %s5397_s16  }
  0x16   : > { %5276 = vmatpush3.msk.msra.mxu1 %vm693_vm0, %v4214_v0  ;;  %4826 = vmatpush3.msk.msra.mxu0 %vm693_vm0, %v4214_v0  ;;  %s5517_s9 = scalar_select %p277_p11, %s5405_s18, 1  ;;  %v5601_v34 = vld [vmem:[%s7150_s2 + $0x10] sm:$0xf]  ;;  %vm4053_vm2 = vcmask 261120  }
  0x17   : > { %4875 = vmatprep.subr.msk.mxu1 %vm693_vm0, %v5507_v1  ;;  %4925 = vmatprep.subr.msk.mxu0 %vm693_vm0, %v5512_v2  ;;  %s4211_s24 = sshll.u32 %s268_s14, 8  ;;  %s4527_s29 = sshll.u32 %s5405_s18, 12 }
  0x18   : > { %s5277_s10 = smul.u32 432, %s5517_s9  ;;  %s6922_s26 = scalar_lea.vmem [#allocation3], %s4211_s24 }
  0x19   : > { %s4103_s30 = sshll.u32 %s6922_s26, 4  ;;  %s7093_s7 = scalar_lea.hbm %s7152_s4, %s4527_s29  ;;  %s7095_s30 = int_to_ptr.vmem [resolvable:$true] %s4103_s30 }
  0x1a   : > { %s5529_s13 = scalar_lea.vmem %s7148_s0, %s5277_s10  ;;  %s4526_s6 = sadd.s32 384, %s5277_s10 }
  0x1b   : > { %v382_v3 = vld [vmem:[%s5529_s13 + $0x1] sm:$0xff]  ;;  %v383_v5 = vld [vmem:[%s5529_s13 + $0x9] sm:$0xff]  ;;  %v384_v7 = vld [vmem:[%s5529_s13 + $0x19] sm:$0xff]  ;;  %s5970_s11 = scalar_lea.vmem %s7149_s1, %s4526_s6  ;;  %s7103_s18 = scalar_lea.sflag [#allocation4], %s268_s14 }
  0x1c   : > { %v398_v4 = vld [vmem:[%s5529_s13 + $0xc1] sm:$0xff]  ;;  %415 = vst.msk [vmem:[#allocation2 + $0x120] sm:$0xff] %vm340_vm1, %v382_v3  ;;  %416 = vst.msk [vmem:[#allocation2 + $0x128] sm:$0xff] %vm340_vm1, %v383_v5  ;;  %v399_v6 = vld [vmem:[%s5529_s13 + $0xc9] sm:$0xff]  ;;  %s5337_s8 = scalar_lea.vmem %s7095_s30, 4096 }
  0x1d   : > { %431 = vst.msk [vmem:[#allocation2 + $0x1a0] sm:$0xff] %vm340_vm1, %v398_v4  ;;  %v400_v8 = vld [vmem:[%s5529_s13 + $0xd9] sm:$0xff]  ;;  %432 = vst.msk [vmem:[#allocation2 + $0x1a8] sm:$0xff] %vm340_vm1, %v399_v6  ;;  %v385_v9 = vld [vmem:[%s5529_s13 + $0x21] sm:$0xff]  ;;  %p5338_p12 = scmp.ne.s32.totalorder %s7095_s30, %s5337_s8 }
  0x1e   : > { %417 = vst.msk [vmem:[#allocation2 + $0x130] sm:$0xff] %vm340_vm1, %v384_v7  ;;  %433 = vst.msk [vmem:[#allocation2 + $0x1b0] sm:$0xff] %vm340_vm1, %v400_v8  ;;  %v401_v10 = vld [vmem:[%s5529_s13 + $0xe1] sm:$0xff]  ;;  %v386_v11 = vld [vmem:[%s5529_s13 + $0x31] sm:$0xff] }
  0x1f   : > { %418 = vst.msk [vmem:[#allocation2 + $0x138] sm:$0xff] %vm340_vm1, %v385_v9  ;;  %434 = vst.msk [vmem:[#allocation2 + $0x1b8] sm:$0xff] %vm340_vm1, %v401_v10  ;;  %v402_v12 = vld [vmem:[%s5529_s13 + $0xf1] sm:$0xff]  ;;  %v387_v13 = vld [vmem:[%s5529_s13 + $0x39] sm:$0xff]  ;;  %p5339_p13 = pnand %p5338_p12, %p5483_p4 }
  0x20   : > { %419 = vst.msk [vmem:[#allocation2 + $0x140] sm:$0xff] %vm340_vm1, %v386_v11  ;;  %v403_v14 = vld [vmem:[%s5529_s13 + $0xf9] sm:$0xff]  ;;  %435 = vst.msk [vmem:[#allocation2 + $0x1c0] sm:$0xff] %vm340_vm1, %v402_v12  ;;  %v388_v15 = vld [vmem:[%s5529_s13 + $0x49] sm:$0xff] }
  0x21   : > { %420 = vst.msk [vmem:[#allocation2 + $0x148] sm:$0xff] %vm340_vm1, %v387_v13  ;;  %436 = vst.msk [vmem:[#allocation2 + $0x1c8] sm:$0xff] %vm340_vm1, %v403_v14  ;;  %v404_v16 = vld [vmem:[%s5529_s13 + $0x109] sm:$0xff]  ;;  %v389_v17 = vld [vmem:[%s5529_s13 + $0x51] sm:$0xff]  ;;  %p5340_p0 = pneg %p5339_p13 }
  0x22   : > { %421 = vst.msk [vmem:[#allocation2 + $0x150] sm:$0xff] %vm340_vm1, %v388_v15  ;;  %437 = vst.msk [vmem:[#allocation2 + $0x1d0] sm:$0xff] %vm340_vm1, %v404_v16  ;;  %v405_v18 = vld [vmem:[%s5529_s13 + $0x111] sm:$0xff]  ;;  %v390_v19 = vld [vmem:[%s5529_s13 + $0x61] sm:$0xff] }
  0x23   : > { %422 = vst.msk [vmem:[#allocation2 + $0x158] sm:$0xff] %vm340_vm1, %v389_v17  ;;  %v406_v20 = vld [vmem:[%s5529_s13 + $0x121] sm:$0xff]  ;;  %438 = vst.msk [vmem:[#allocation2 + $0x1d8] sm:$0xff] %vm340_vm1, %v405_v18  ;;  %v391_v21 = vld [vmem:[%s5529_s13 + $0x69] sm:$0xff] }
  0x24   : > { %423 = vst.msk [vmem:[#allocation2 + $0x160] sm:$0xff] %vm340_vm1, %v390_v19  ;;  %439 = vst.msk [vmem:[#allocation2 + $0x1e0] sm:$0xff] %vm340_vm1, %v406_v20  ;;  %v407_v22 = vld [vmem:[%s5529_s13 + $0x129] sm:$0xff]  ;;  %v392_v23 = vld [vmem:[%s5529_s13 + $0x79] sm:$0xff] }
  0x25   : > { %424 = vst.msk [vmem:[#allocation2 + $0x168] sm:$0xff] %vm340_vm1, %v391_v21  ;;  %440 = vst.msk [vmem:[#allocation2 + $0x1e8] sm:$0xff] %vm340_vm1, %v407_v22  ;;  %v408_v24 = vld [vmem:[%s5529_s13 + $0x139] sm:$0xff]  ;;  %v393_v25 = vld [vmem:[%s5529_s13 + $0x81] sm:$0xff] }
  0x26   : > { %425 = vst.msk [vmem:[#allocation2 + $0x170] sm:$0xff] %vm340_vm1, %v392_v23  ;;  %v409_v26 = vld [vmem:[%s5529_s13 + $0x141] sm:$0xff]  ;;  %441 = vst.msk [vmem:[#allocation2 + $0x1f0] sm:$0xff] %vm340_vm1, %v408_v24  ;;  %v5586_v31 = vld [vmem:[#allocation2 + $0x130] sm:$0xff] }
  0x27   : > { %v563_v27 = vld [vmem:[#allocation2 + $0x120] sm:$0xff]  ;;  %v564_v29 = vld [vmem:[#allocation2 + $0x128] sm:$0xff]  ;;  %426 = vst.msk [vmem:[#allocation2 + $0x178] sm:$0xff] %vm340_vm1, %v393_v25  ;;  %442 = vst.msk [vmem:[#allocation2 + $0x1f8] sm:$0xff] %vm340_vm1, %v409_v26 }
  0x28   : > { %v5576_v28 = vld [vmem:[#allocation2 + $0x1a0] sm:$0xff]  ;;  %4827 = vmatprep.mubr.msk.f32.mxu0 %vm340_vm1, %v563_v27  ;;  %v5584_v30 = vld [vmem:[#allocation2 + $0x1a8] sm:$0xff]  ;;  %v5588_v32 = vld [vmem:[#allocation2 + $0x1b0] sm:$0xff] }
  0x29   : > { %4851 = vmatprep.mubr.msk.f32.mxu1 %vm340_vm1, %v5576_v28  ;;  %4828 = vmatmul.mubr.msk.f32.vlgmr.msra.gmra.mxu0 %vm340_vm1, %v564_v29  ;;  %v5607_v35 = vld [vmem:[#allocation2 + $0x138] sm:$0xff]  ;;  %v5615_v37 = vld [vmem:[#allocation2 + $0x140] sm:$0xff]  ;;  %v5627_v39 = vld [vmem:[#allocation2 + $0x148] sm:$0xff] }
  0x2a   : > { %4852 = vmatmul.mubr.msk.f32.vlgmr.msra.gmra.mxu1 %vm340_vm1, %v5584_v30  ;;  %4926 = vmatpush3.msk.msra.mxu0 %vm693_vm0, %v5512_v2  ;;  %v5609_v36 = vld [vmem:[#allocation2 + $0x1b8] sm:$0xff]  ;;  %v5617_v38 = vld [vmem:[#allocation2 + $0x1c0] sm:$0xff]  ;;  %v5633_v40 = vld [vmem:[#allocation2 + $0x1c8] sm:$0xff] }
  0x2b   : > { %4876 = vmatpush3.msk.msra.mxu1 %vm693_vm0, %v5507_v1  ;;  %4830 = vmatprep.mubr.msk.f32.mxu0 %vm340_vm1, %v5586_v31  ;;  %v5635_v41 = vld [vmem:[#allocation2 + $0x150] sm:$0xff]  ;;  %v395_v45 = vld [vmem:[%s5529_s13 + $0x99] sm:$0xff]  ;;  %v456_v56 = vld [vmem:[%s5529_s13 + $0x2] sm:$0xff] }
  0x2c   : > { %4854 = vmatprep.mubr.msk.f32.mxu1 %vm340_vm1, %v5588_v32  ;;  %4975 = vmatprep.subr.msk.mxu1 %vm693_vm0, %v5596_v33  ;;  %v5637_v42 = vld [vmem:[#allocation2 + $0x1d0] sm:$0xff]  ;;  %v5642_v46 = vld [vmem:[#allocation2 + $0x158] sm:$0xff]  ;;  %428 = vst.msk [vmem:[#allocation2 + $0x188] sm:$0xff] %vm340_vm1, %v395_v45  ;;  %v5656_v51 = vld [vmem:[#allocation2 + $0x160] sm:$0xff] }
  0x2d   : > { %5025 = vmatprep.subr.msk.mxu0 %vm693_vm0, %v5601_v34  ;;  %4831 = vmatmul.mubr.msk.f32.gmra.mxu0 %vm340_vm1, %v5607_v35  ;;  %v394_v43 = vld [vmem:[%s5529_s13 + $0x91] sm:$0xff]  ;;  %v411_v48 = vld [vmem:[%s5529_s13 + $0x159] sm:$0xff]  ;;  %v396_v49 = vld [vmem:[%s5529_s13 + $0xa9] sm:$0xff]  ;;  %489 = vst.msk [vmem:[#allocation2 + $0x240] sm:$0xff] %vm340_vm1, %v456_v56 }
  0x2e   : > { %4855 = vmatmul.mubr.msk.f32.gmra.mxu1 %vm340_vm1, %v5609_v36  ;;  %4833 = vmatprep.mubr.msk.f32.mxu0 %vm340_vm1, %v5615_v37  ;;  %v410_v44 = vld [vmem:[%s5529_s13 + $0x151] sm:$0xff]  ;;  %427 = vst.msk [vmem:[#allocation2 + $0x180] sm:$0xff] %vm340_vm1, %v394_v43  ;;  %v412_v50 = vld [vmem:[%s5529_s13 + $0x169] sm:$0xff]  ;;  %v5658_v52 = vld [vmem:[#allocation2 + $0x1e0] sm:$0xff] }
  0x2f   : > { %4857 = vmatprep.mubr.msk.f32.mxu1 %vm340_vm1, %v5617_v38  ;;  %v5644_v47 = vld [vmem:[#allocation2 + $0x1d8] sm:$0xff]  ;;  %443 = vst.msk [vmem:[#allocation2 + $0x200] sm:$0xff] %vm340_vm1, %v410_v44  ;;  %444 = vst.msk [vmem:[#allocation2 + $0x208] sm:$0xff] %vm340_vm1, %v411_v48  ;;  %v308_v55 = vld [vmem:[%s5529_s13] sm:$0xff] }
  0x30   : > { %429 = vst.msk [vmem:[#allocation2 + $0x190] sm:$0xff] %vm340_vm1, %v396_v49  ;;  %445 = vst.msk [vmem:[#allocation2 + $0x210] sm:$0xff] %vm340_vm1, %v412_v50  ;;  %v397_v53 = vld [vmem:[%s5529_s13 + $0xb1] sm:$0xff]  ;;  %v309_v57 = vld [vmem:[%s5529_s13 + $0x8] sm:$0xff] }
  0x31   : > { %4834 = vmatmul.mubr.msk.f32.gmra.mxu0 %vm340_vm1, %v5627_v39  ;;  %v413_v54 = vld [vmem:[%s5529_s13 + $0x171] sm:$0xff]  ;;  %430 = vst.msk [vmem:[#allocation2 + $0x198] sm:$0xff] %vm340_vm1, %v397_v53  ;;  %341 = vst.msk [vmem:[#allocation2] sm:$0xff] %vm340_vm1, %v308_v55  ;;  %v458_v60 = vld [vmem:[%s5529_s13 + $0x1a] sm:$0xff] }
  0x32   : > { %4858 = vmatmul.mubr.msk.f32.gmra.mxu1 %vm340_vm1, %v5633_v40  ;;  %4836 = vmatprep.mubr.msk.f32.mxu0 %vm340_vm1, %v5635_v41  ;;  %446 = vst.msk [vmem:[#allocation2 + $0x218] sm:$0xff] %vm340_vm1, %v413_v54  ;;  %v457_v58 = vld [vmem:[%s5529_s13 + $0xa] sm:$0xff]  ;;  %342 = vst.msk [vmem:[#allocation2 + $0x8] sm:$0xff] %vm340_vm1, %v309_v57  ;;  %v310_v59 = vld [vmem:[%s5529_s13 + $0x18] sm:$0xff] }
  0x33   : > { %4860 = vmatprep.mubr.msk.f32.mxu1 %vm340_vm1, %v5637_v42  ;;  %490 = vst.msk [vmem:[#allocation2 + $0x248] sm:$0xff] %vm340_vm1, %v457_v58  ;;  %v311_v61 = vld [vmem:[%s5529_s13 + $0x20] sm:$0xff]  ;;  %v5682_v62 = vld [vmem:[#allocation2 + $0x168] sm:$0xff]  ;;  %343 = vst.msk [vmem:[#allocation2 + $0x10] sm:$0xff] %vm340_vm1, %v310_v59 }
  0x34   : > { %v5684_v63 = vld [vmem:[#allocation2 + $0x1e8] sm:$0xff]  ;;  %491 = vst.msk [vmem:[#allocation2 + $0x250] sm:$0xff] %vm340_vm1, %v458_v60  ;;  %344 = vst.msk [vmem:[#allocation2 + $0x18] sm:$0xff] %vm340_vm1, %v311_v61  ;;  %v312_v1 = vld [vmem:[%s5529_s13 + $0x30] sm:$0xff] }
  0x35   : > { %v459_v0 = vld [vmem:[%s5529_s13 + $0x22] sm:$0xff]  ;;  %v460_v2 = vld [vmem:[%s5529_s13 + $0x32] sm:$0xff]  ;;  %4837 = vmatmul.mubr.msk.f32.gmra.mxu0 %vm340_vm1, %v5642_v46  ;;  %345 = vst.msk [vmem:[#allocation2 + $0x20] sm:$0xff] %vm340_vm1, %v312_v1  ;;  %v461_v4 = vld [vmem:[%s5529_s13 + $0x3a] sm:$0xff] }
  0x36   : > { %4861 = vmatmul.mubr.msk.f32.gmra.mxu1 %vm340_vm1, %v5644_v47  ;;  %492 = vst.msk [vmem:[#allocation2 + $0x258] sm:$0xff] %vm340_vm1, %v459_v0  ;;  %493 = vst.msk [vmem:[#allocation2 + $0x260] sm:$0xff] %vm340_vm1, %v460_v2  ;;  %v313_v3 = vld [vmem:[%s5529_s13 + $0x38] sm:$0xff]  ;;  %v314_v5 = vld [vmem:[%s5529_s13 + $0x48] sm:$0xff]  ;;  %4839 = vmatprep.mubr.msk.f32.mxu0 %vm340_vm1, %v5656_v51 }
  0x37   : > { %4863 = vmatprep.mubr.msk.f32.mxu1 %vm340_vm1, %v5658_v52  ;;  %346 = vst.msk [vmem:[#allocation2 + $0x28] sm:$0xff] %vm340_vm1, %v313_v3  ;;  %494 = vst.msk [vmem:[#allocation2 + $0x268] sm:$0xff] %vm340_vm1, %v461_v4  ;;  %v462_v6 = vld [vmem:[%s5529_s13 + $0x4a] sm:$0xff]  ;;  %v463_v8 = vld [vmem:[%s5529_s13 + $0x52] sm:$0xff] }
  0x38   : > { %347 = vst.msk [vmem:[#allocation2 + $0x30] sm:$0xff] %vm340_vm1, %v314_v5  ;;  %v315_v7 = vld [vmem:[%s5529_s13 + $0x50] sm:$0xff]  ;;  %495 = vst.msk [vmem:[#allocation2 + $0x270] sm:$0xff] %vm340_vm1, %v462_v6  ;;  %v5727_v11 = vld [vmem:[#allocation2 + $0x178] sm:$0xff] }
  0x39   : > { %v5712_v9 = vld [vmem:[#allocation2 + $0x170] sm:$0xff]  ;;  %348 = vst.msk [vmem:[#allocation2 + $0x38] sm:$0xff] %vm340_vm1, %v315_v7  ;;  %496 = vst.msk [vmem:[#allocation2 + $0x278] sm:$0xff] %vm340_vm1, %v463_v8  ;;  %4840 = vmatmul.mubr.msk.f32.gmra.mxu0 %vm340_vm1, %v5682_v62  ;;  %v5729_v12 = vld [vmem:[#allocation2 + $0x1f8] sm:$0xff] }
  0x3a   : > { %v5714_v10 = vld [vmem:[#allocation2 + $0x1f0] sm:$0xff]  ;;  %4864 = vmatmul.mubr.msk.f32.gmra.mxu1 %vm340_vm1, %v5684_v63  ;;  %4842 = vmatprep.mubr.msk.f32.mxu0 %vm340_vm1, %v5712_v9  ;;  %v5731_v13 = vld [vmem:[#allocation2 + $0x180] sm:$0xff]  ;;  %v5739_v15 = vld [vmem:[#allocation2 + $0x188] sm:$0xff] }
  0x3b   : > { %4866 = vmatprep.mubr.msk.f32.mxu1 %vm340_vm1, %v5714_v10  ;;  %v5733_v14 = vld [vmem:[#allocation2 + $0x200] sm:$0xff]  ;;  %v5745_v16 = vld [vmem:[#allocation2 + $0x208] sm:$0xff]  ;;  %v5747_v17 = vld [vmem:[#allocation2 + $0x190] sm:$0xff] }
  0x3c   : > { %7185 = vst [vmem:[#allocation6_spill] sm:$0xff] %v5745_v16  ;;  %v5749_v18 = vld [vmem:[#allocation2 + $0x210] sm:$0xff]  ;;  %v316_v19 = vld [vmem:[%s5529_s13 + $0x60] sm:$0xff]  ;;  %v317_v21 = vld [vmem:[%s5529_s13 + $0x68] sm:$0xff] }
  0x3d   : > { %4843 = vmatmul.mubr.msk.f32.gmra.mxu0 %vm340_vm1, %v5727_v11  ;;  %7186 = vst [vmem:[#allocation7_spill] sm:$0xff] %v5749_v18  ;;  %v464_v20 = vld [vmem:[%s5529_s13 + $0x62] sm:$0xff]  ;;  %v5754_v22 = vld [vmem:[#allocation2 + $0x198] sm:$0xff]  ;;  %349 = vst.msk [vmem:[#allocation2 + $0x40] sm:$0xff] %vm340_vm1, %v316_v19 }
  0x3e   : > { %4867 = vmatmul.mubr.msk.f32.gmra.mxu1 %vm340_vm1, %v5729_v12  ;;  %4845 = vmatprep.mubr.msk.f32.mxu0 %vm340_vm1, %v5731_v13  ;;  %v5756_v23 = vld [vmem:[#allocation2 + $0x218] sm:$0xff]  ;;  %497 = vst.msk [vmem:[#allocation2 + $0x280] sm:$0xff] %vm340_vm1, %v464_v20  ;;  %350 = vst.msk [vmem:[#allocation2 + $0x48] sm:$0xff] %vm340_vm1, %v317_v21  ;;  %v465_v24 = vld [vmem:[%s5529_s13 + $0x6a] sm:$0xff] }
  0x3f   : > { %4869 = vmatprep.mubr.msk.f32.mxu1 %vm340_vm1, %v5733_v14  ;;  %7187 = vst [vmem:[#allocation8_spill] sm:$0xff] %v5756_v23  ;;  %v318_v25 = vld [vmem:[%s5529_s13 + $0x78] sm:$0xff]  ;;  %v530_v27 = vld [vmem:[#allocation2] sm:$0xff]  ;;  %498 = vst.msk [vmem:[#allocation2 + $0x288] sm:$0xff] %vm340_vm1, %v465_v24 }
  0x40   : > { %v466_v26 = vld [vmem:[%s5529_s13 + $0x7a] sm:$0xff]  ;;  %351 = vst.msk [vmem:[#allocation2 + $0x50] sm:$0xff] %vm340_vm1, %v318_v25  ;;  %v467_v44 = vld [vmem:[%s5529_s13 + $0x82] sm:$0xff]  ;;  %v320_v45 = vld [vmem:[%s5529_s13 + $0x90] sm:$0xff] }
  0x41   : > { %4846 = vmatmul.mubr.msk.f32.gmra.mxu0 %vm340_vm1, %v5739_v15  ;;  %v1246_v29 = vld [vmem:[#allocation2 + $0x240] sm:$0xff]  ;;  %499 = vst.msk [vmem:[#allocation2 + $0x290] sm:$0xff] %vm340_vm1, %v466_v26  ;;  %500 = vst.msk [vmem:[#allocation2 + $0x298] sm:$0xff] %vm340_vm1, %v467_v44  ;;  %v468_v48 = vld [vmem:[%s5529_s13 + $0x92] sm:$0xff] }
  0x42   : > { %4870 = vmatmul.mubr.msk.f32.gmra.mxu1 %vm340_vm1, %v5745_v16  ;;  %v319_v43 = vld [vmem:[%s5529_s13 + $0x80] sm:$0xff]  ;;  %4848 = vmatprep.mubr.msk.f32.mxu0 %vm340_vm1, %v5747_v17  ;;  %353 = vst.msk [vmem:[#allocation2 + $0x60] sm:$0xff] %vm340_vm1, %v320_v45  ;;  %v321_v49 = vld [vmem:[%s5529_s13 + $0x98] sm:$0xff]  ;;  %501 = vst.msk [vmem:[#allocation2 + $0x2a0] sm:$0xff] %vm340_vm1, %v468_v48 }
  0x43   : > { %4872 = vmatprep.mubr.msk.f32.mxu1 %vm340_vm1, %v5749_v18  ;;  %352 = vst.msk [vmem:[#allocation2 + $0x58] sm:$0xff] %vm340_vm1, %v319_v43  ;;  %v469_v50 = vld [vmem:[%s5529_s13 + $0x9a] sm:$0xff]  ;;  %354 = vst.msk [vmem:[#allocation2 + $0x68] sm:$0xff] %vm340_vm1, %v321_v49  ;;  %v322_v53 = vld [vmem:[%s5529_s13 + $0xa8] sm:$0xff] }
  0x44   : > { %502 = vst.msk [vmem:[#allocation2 + $0x2a8] sm:$0xff] %vm340_vm1, %v469_v50  ;;  %v470_v54 = vld [vmem:[%s5529_s13 + $0xaa] sm:$0xff]  ;;  %355 = vst.msk [vmem:[#allocation2 + $0x70] sm:$0xff] %vm340_vm1, %v322_v53  ;;  %v471_v58 = vld [vmem:[%s5529_s13 + $0xb2] sm:$0xff] }
  0x45   : > { %v323_v55 = vld [vmem:[%s5529_s13 + $0xb0] sm:$0xff]  ;;  %v531_v56 = vld [vmem:[#allocation2 + $0x8] sm:$0xff]  ;;  %503 = vst.msk [vmem:[#allocation2 + $0x2b0] sm:$0xff] %vm340_vm1, %v470_v54  ;;  %v324_v59 = vld [vmem:[%s5529_s13 + $0xc0] sm:$0xff]  ;;  %4849 = vmatmul.mubr.msk.f32.gmra.mxu0 %vm340_vm1, %v5754_v22 }
  0x46   : > { %v1247_v57 = vld [vmem:[#allocation2 + $0x248] sm:$0xff]  ;;  %356 = vst.msk [vmem:[#allocation2 + $0x78] sm:$0xff] %vm340_vm1, %v323_v55  ;;  %4873 = vmatmul.mubr.msk.f32.gmra.mxu1 %vm340_vm1, %v5756_v23  ;;  %504 = vst.msk [vmem:[#allocation2 + $0x2b8] sm:$0xff] %vm340_vm1, %v471_v58  ;;  %v326_v1 = vld [vmem:[%s5529_s13 + $0xd8] sm:$0xff]  ;;  %4927 = vmatprep.mubr.msk.f32.mxu0 %vm340_vm1, %v1246_v29 }
  0x47   : > { %v472_v60 = vld [vmem:[%s5529_s13 + $0xc2] sm:$0xff]  ;;  %357 = vst.msk [vmem:[#allocation2 + $0x80] sm:$0xff] %vm340_vm1, %v324_v59  ;;  %v473_v0 = vld [vmem:[%s5529_s13 + $0xca] sm:$0xff]  ;;  %4877 = vmatprep.mubr.msk.f32.mxu1 %vm340_vm1, %v530_v27  ;;  %359 = vst.msk [vmem:[#allocation2 + $0x90] sm:$0xff] %vm340_vm1, %v326_v1 }
  0x48   : > { %505 = vst.msk [vmem:[#allocation2 + $0x2c0] sm:$0xff] %vm340_vm1, %v472_v60  ;;  %v325_v61 = vld [vmem:[%s5529_s13 + $0xc8] sm:$0xff]  ;;  %506 = vst.msk [vmem:[#allocation2 + $0x2c8] sm:$0xff] %vm340_vm1, %v473_v0  ;;  %v474_v2 = vld [vmem:[%s5529_s13 + $0xda] sm:$0xff] }
  0x49   : > { %358 = vst.msk [vmem:[#allocation2 + $0x88] sm:$0xff] %vm340_vm1, %v325_v61  ;;  %v327_v3 = vld [vmem:[%s5529_s13 + $0xe0] sm:$0xff]  ;;  %507 = vst.msk [vmem:[#allocation2 + $0x2d0] sm:$0xff] %vm340_vm1, %v474_v2  ;;  %v5817_v5 = vld [vmem:[#allocation2 + $0x10] sm:$0xff]  ;;  %4928 = vmatmul.mubr.msk.f32.vlgmr.msra.gmra.mxu0 %vm340_vm1, %v1247_v57 }
  0x4a   : > { %v475_v4 = vld [vmem:[%s5529_s13 + $0xe2] sm:$0xff]  ;;  %360 = vst.msk [vmem:[#allocation2 + $0x98] sm:$0xff] %vm340_vm1, %v327_v3  ;;  %v5819_v6 = vld [vmem:[#allocation2 + $0x250] sm:$0xff]  ;;  %4878 = vmatmul.mubr.msk.f32.vlgmr.msra.gmra.mxu1 %vm340_vm1, %v531_v56  ;;  %v5831_v8 = vld [vmem:[%s7150_s2 + $0x18] sm:$0xf]  ;;  %5026 = vmatpush3.msk.msra.mxu0 %vm693_vm0, %v5601_v34 }
  0x4b   : > { %508 = vst.msk [vmem:[#allocation2 + $0x2d8] sm:$0xff] %vm340_vm1, %v475_v4  ;;  %7188 = vst [vmem:[#allocation9_spill] sm:$0xff] %v5819_v6  ;;  %v5826_v7 = vld [vmem:[%s7150_s2 + $0x14] sm:$0xf]  ;;  %4976 = vmatpush3.msk.msra.mxu1 %vm693_vm0, %v5596_v33  ;;  %v5837_v19 = vld [vmem:[#allocation2 + $0x18] sm:$0xff]  ;;  %4880 = vmatprep.mubr.msk.f32.mxu1 %vm340_vm1, %v5817_v5 }
  0x4c   : > { %v5839_v20 = vld [vmem:[#allocation2 + $0x258] sm:$0xff]  ;;  %4930 = vmatprep.mubr.msk.f32.mxu0 %vm340_vm1, %v5819_v6  ;;  %v5845_v21 = vld [vmem:[#allocation2 + $0x20] sm:$0xff]  ;;  %5075 = vmatprep.subr.msk.mxu1 %vm693_vm0, %v5826_v7  ;;  %v5857_v33 = vld [vmem:[#allocation2 + $0x28] sm:$0xff] }
  0x4d   : > { %7189 = vst [vmem:[#allocation10_spill] sm:$0xff] %v5839_v20  ;;  %v5847_v24 = vld [vmem:[#allocation2 + $0x260] sm:$0xff]  ;;  %5125 = vmatprep.subr.msk.mxu0 %vm693_vm0, %v5831_v8  ;;  %4931 = vmatmul.mubr.msk.f32.gmra.mxu0 %vm340_vm1, %v5839_v20  ;;  %v5863_v34 = vld [vmem:[#allocation2 + $0x268] sm:$0xff]  ;;  %v5865_v25 = vld [vmem:[#allocation2 + $0x30] sm:$0xff] }
  0x4e   : > { %7190 = vst [vmem:[#allocation11_spill] sm:$0xff] %v5847_v24  ;;  %4881 = vmatmul.mubr.msk.f32.gmra.mxu1 %vm340_vm1, %v5837_v19  ;;  %4933 = vmatprep.mubr.msk.f32.mxu0 %vm340_vm1, %v5847_v24  ;;  %7191 = vst [vmem:[#allocation12_spill] sm:$0xff] %v5863_v34  ;;  %v5867_v26 = vld [vmem:[#allocation2 + $0x270] sm:$0xff]  ;;  %v329_v43 = vld [vmem:[%s5529_s13 + $0xf8] sm:$0xff] }
  0x4f   : > { %4883 = vmatprep.mubr.msk.f32.mxu1 %vm340_vm1, %v5845_v21  ;;  %7192 = vst [vmem:[#allocation13_spill] sm:$0xff] %v5867_v26  ;;  %v328_v27 = vld [vmem:[%s5529_s13 + $0xf0] sm:$0xff]  ;;  %v5872_v44 = vld [vmem:[#allocation2 + $0x38] sm:$0xff]  ;;  %362 = vst.msk [vmem:[#allocation2 + $0xa8] sm:$0xff] %vm340_vm1, %v329_v43 }
  0x50   : > { %v476_v29 = vld [vmem:[%s5529_s13 + $0xf2] sm:$0xff]  ;;  %361 = vst.msk [vmem:[#allocation2 + $0xa0] sm:$0xff] %vm340_vm1, %v328_v27  ;;  %v477_v48 = vld [vmem:[%s5529_s13 + $0xfa] sm:$0xff]  ;;  %v330_v49 = vld [vmem:[%s5529_s13 + $0x108] sm:$0xff] }
  0x51   : > { %v5874_v45 = vld [vmem:[#allocation2 + $0x278] sm:$0xff]  ;;  %509 = vst.msk [vmem:[#allocation2 + $0x2e0] sm:$0xff] %vm340_vm1, %v476_v29  ;;  %v478_v50 = vld [vmem:[%s5529_s13 + $0x10a] sm:$0xff]  ;;  %4934 = vmatmul.mubr.msk.f32.gmra.mxu0 %vm340_vm1, %v5863_v34  ;;  %v5886_v53 = vld [vmem:[#allocation2 + $0x40] sm:$0xff] }
  0x52   : > { %7193 = vst [vmem:[#allocation14_spill] sm:$0xff] %v5874_v45  ;;  %4884 = vmatmul.mubr.msk.f32.gmra.mxu1 %vm340_vm1, %v5857_v33  ;;  %v5888_v54 = vld [vmem:[#allocation2 + $0x280] sm:$0xff]  ;;  %510 = vst.msk [vmem:[#allocation2 + $0x2e8] sm:$0xff] %vm340_vm1, %v477_v48  ;;  %v331_v55 = vld [vmem:[%s5529_s13 + $0x110] sm:$0xff]  ;;  %4936 = vmatprep.mubr.msk.f32.mxu0 %vm340_vm1, %v5867_v26 }
  0x53   : > { %7194 = vst [vmem:[#allocation15_spill] sm:$0xff] %v5888_v54  ;;  %363 = vst.msk [vmem:[#allocation2 + $0xb0] sm:$0xff] %vm340_vm1, %v330_v49  ;;  %v479_v56 = vld [vmem:[%s5529_s13 + $0x112] sm:$0xff]  ;;  %v332_v57 = vld [vmem:[%s5529_s13 + $0x120] sm:$0xff]  ;;  %4886 = vmatprep.mubr.msk.f32.mxu1 %vm340_vm1, %v5865_v25 }
  0x54   : > { %511 = vst.msk [vmem:[#allocation2 + $0x2f0] sm:$0xff] %vm340_vm1, %v478_v50  ;;  %364 = vst.msk [vmem:[#allocation2 + $0xb8] sm:$0xff] %vm340_vm1, %v331_v55  ;;  %v480_v58 = vld [vmem:[%s5529_s13 + $0x122] sm:$0xff]  ;;  %v481_v60 = vld [vmem:[%s5529_s13 + $0x12a] sm:$0xff] }
  0x55   : > { %512 = vst.msk [vmem:[#allocation2 + $0x2f8] sm:$0xff] %vm340_vm1, %v479_v56  ;;  %365 = vst.msk [vmem:[#allocation2 + $0xc0] sm:$0xff] %vm340_vm1, %v332_v57  ;;  %v333_v59 = vld [vmem:[%s5529_s13 + $0x128] sm:$0xff]  ;;  %v334_v61 = vld [vmem:[%s5529_s13 + $0x138] sm:$0xff]  ;;  %4937 = vmatmul.mubr.msk.f32.gmra.mxu0 %vm340_vm1, %v5874_v45 }
  0x56   : > { %513 = vst.msk [vmem:[#allocation2 + $0x300] sm:$0xff] %vm340_vm1, %v480_v58  ;;  %366 = vst.msk [vmem:[#allocation2 + $0xc8] sm:$0xff] %vm340_vm1, %v333_v59  ;;  %v482_v0 = vld [vmem:[%s5529_s13 + $0x13a] sm:$0xff]  ;;  %v5912_v2 = vld [vmem:[#allocation2 + $0x48] sm:$0xff]  ;;  %4887 = vmatmul.mubr.msk.f32.gmra.mxu1 %vm340_vm1, %v5872_v44  ;;  %4939 = vmatprep.mubr.msk.f32.mxu0 %vm340_vm1, %v5888_v54 }
  0x57   : > { %514 = vst.msk [vmem:[#allocation2 + $0x308] sm:$0xff] %vm340_vm1, %v481_v60  ;;  %v335_v1 = vld [vmem:[%s5529_s13 + $0x140] sm:$0xff]  ;;  %v5914_v3 = vld [vmem:[#allocation2 + $0x288] sm:$0xff]  ;;  %367 = vst.msk [vmem:[#allocation2 + $0xd0] sm:$0xff] %vm340_vm1, %v334_v61  ;;  %4889 = vmatprep.mubr.msk.f32.mxu1 %vm340_vm1, %v5886_v53 }
  0x58   : > { %7195 = vst [vmem:[#allocation16_spill] sm:$0xff] %v5914_v3  ;;  %515 = vst.msk [vmem:[#allocation2 + $0x310] sm:$0xff] %vm340_vm1, %v482_v0  ;;  %v483_v4 = vld [vmem:[%s5529_s13 + $0x142] sm:$0xff]  ;;  %v336_v27 = vld [vmem:[%s5529_s13 + $0x150] sm:$0xff] }
  0x59   : > { %368 = vst.msk [vmem:[#allocation2 + $0xd8] sm:$0xff] %vm340_vm1, %v335_v1  ;;  %v484_v29 = vld [vmem:[%s5529_s13 + $0x152] sm:$0xff]  ;;  %516 = vst.msk [vmem:[#allocation2 + $0x318] sm:$0xff] %vm340_vm1, %v483_v4  ;;  %v485_v48 = vld [vmem:[%s5529_s13 + $0x15a] sm:$0xff]  ;;  %4940 = vmatmul.mubr.msk.f32.gmra.mxu0 %vm340_vm1, %v5914_v3 }
  0x5a   : > { %369 = vst.msk [vmem:[#allocation2 + $0xe0] sm:$0xff] %vm340_vm1, %v336_v27  ;;  %517 = vst.msk [vmem:[#allocation2 + $0x320] sm:$0xff] %vm340_vm1, %v484_v29  ;;  %v337_v43 = vld [vmem:[%s5529_s13 + $0x158] sm:$0xff]  ;;  %v338_v49 = vld [vmem:[%s5529_s13 + $0x168] sm:$0xff]  ;;  %4890 = vmatmul.mubr.msk.f32.gmra.mxu1 %vm340_vm1, %v5912_v2 }
  0x5b   : > { %370 = vst.msk [vmem:[#allocation2 + $0xe8] sm:$0xff] %vm340_vm1, %v337_v43  ;;  %518 = vst.msk [vmem:[#allocation2 + $0x328] sm:$0xff] %vm340_vm1, %v485_v48  ;;  %v486_v50 = vld [vmem:[%s5529_s13 + $0x16a] sm:$0xff]  ;;  %v487_v56 = vld [vmem:[%s5529_s13 + $0x172] sm:$0xff] }
  0x5c   : > { %371 = vst.msk [vmem:[#allocation2 + $0xf0] sm:$0xff] %vm340_vm1, %v338_v49  ;;  %v339_v55 = vld [vmem:[%s5529_s13 + $0x170] sm:$0xff]  ;;  %519 = vst.msk [vmem:[#allocation2 + $0x330] sm:$0xff] %vm340_vm1, %v486_v50  ;;  %v5959_v59 = vld [vmem:[#allocation2 + $0x58] sm:$0xff] }
  0x5d   : > { %v5942_v57 = vld [vmem:[#allocation2 + $0x50] sm:$0xff]  ;;  %372 = vst.msk [vmem:[#allocation2 + $0xf8] sm:$0xff] %vm340_vm1, %v339_v55  ;;  %520 = vst.msk [vmem:[#allocation2 + $0x338] sm:$0xff] %vm340_vm1, %v487_v56  ;;  %v5961_v60 = vld [vmem:[#allocation2 + $0x298] sm:$0xff] }
  0x5e   : > { %v5944_v58 = vld [vmem:[#allocation2 + $0x290] sm:$0xff]  ;;  %4892 = vmatprep.mubr.msk.f32.mxu1 %vm340_vm1, %v5942_v57  ;;  %7197 = vst [vmem:[#allocation18_spill] sm:$0xff] %v5961_v60  ;;  %v5963_v61 = vld [vmem:[#allocation2 + $0x60] sm:$0xff]  ;;  %v5976_v1 = vld [vmem:[#allocation2 + $0x68] sm:$0xff] }
  0x5f   : > { %7196 = vst [vmem:[#allocation17_spill] sm:$0xff] %v5944_v58  ;;  %4942 = vmatprep.mubr.msk.f32.mxu0 %vm340_vm1, %v5944_v58  ;;  %v5965_v0 = vld [vmem:[#allocation2 + $0x2a0] sm:$0xff]  ;;  %4893 = vmatmul.mubr.msk.f32.gmra.mxu1 %vm340_vm1, %v5959_v59  ;;  %v5982_v4 = vld [vmem:[#allocation2 + $0x2a8] sm:$0xff]  ;;  %v5984_v27 = vld [vmem:[#allocation2 + $0x70] sm:$0xff] }
  0x60   : > { %7198 = vst [vmem:[#allocation19_spill] sm:$0xff] %v5965_v0  ;;  %4943 = vmatmul.mubr.msk.f32.gmra.mxu0 %vm340_vm1, %v5961_v60  ;;  %4895 = vmatprep.mubr.msk.f32.mxu1 %vm340_vm1, %v5963_v61  ;;  %7199 = vst [vmem:[#allocation20_spill] sm:$0xff] %v5982_v4  ;;  %v5986_v29 = vld [vmem:[#allocation2 + $0x2b0] sm:$0xff]  ;;  %v373_v43 = vld [vmem:[%s5970_s11] sm:$0xff] }
  0x61   : > { %4945 = vmatprep.mubr.msk.f32.mxu0 %vm340_vm1, %v5965_v0  ;;  %7200 = vst [vmem:[#allocation21_spill] sm:$0xff] %v5986_v29  ;;  %v447_v48 = vld [vmem:[%s5970_s11 + $0x1] sm:$0xff]  ;;  %378 = vst.msk [vmem:[#allocation2 + $0x100] sm:$0xff] %vm340_vm1, %v373_v43  ;;  %v448_v50 = vld [vmem:[%s5970_s11 + $0x9] sm:$0xff] }
  0x62   : > { %v374_v49 = vld [vmem:[%s5970_s11 + $0x8] sm:$0xff]  ;;  %452 = vst.msk [vmem:[#allocation2 + $0x220] sm:$0xff] %vm340_vm1, %v447_v48  ;;  %453 = vst.msk [vmem:[#allocation2 + $0x228] sm:$0xff] %vm340_vm1, %v448_v50  ;;  %v6004_v55 = vld [vmem:[#allocation2 + $0x78] sm:$0xff] }
  0x63   : > { %379 = vst.msk [vmem:[#allocation2 + $0x108] sm:$0xff] %vm340_vm1, %v374_v49  ;;  %4896 = vmatmul.mubr.msk.f32.gmra.mxu1 %vm340_vm1, %v5976_v1  ;;  %v6006_v56 = vld [vmem:[#allocation2 + $0x2b8] sm:$0xff]  ;;  %v6008_v43 = vld [vmem:[#allocation2 + $0x80] sm:$0xff]  ;;  %v6020_v49 = vld [vmem:[#allocation2 + $0x88] sm:$0xff] }
  0x64   : > { %4946 = vmatmul.mubr.msk.f32.gmra.mxu0 %vm340_vm1, %v5982_v4  ;;  %4898 = vmatprep.mubr.msk.f32.mxu1 %vm340_vm1, %v5984_v27  ;;  %7201 = vst [vmem:[#allocation22_spill] sm:$0xff] %v6006_v56  ;;  %v6010_v48 = vld [vmem:[#allocation2 + $0x2c0] sm:$0xff]  ;;  %v6022_v50 = vld [vmem:[#allocation2 + $0x2c8] sm:$0xff]  ;;  %v6026_v4 = vld [vmem:[#allocation2 + $0x2d0] sm:$0xff] }
  0x65   : > { %4948 = vmatprep.mubr.msk.f32.mxu0 %vm340_vm1, %v5986_v29  ;;  %7202 = vst [vmem:[#allocation23_spill] sm:$0xff] %v6010_v48  ;;  %7203 = vst [vmem:[#allocation24_spill] sm:$0xff] %v6022_v50  ;;  %v6024_v29 = vld [vmem:[#allocation2 + $0x90] sm:$0xff]  ;;  %v6040_v0 = vld [vmem:[#allocation2 + $0xa0] sm:$0xff] }
  0x66   : > { %7204 = vst [vmem:[#allocation25_spill] sm:$0xff] %v6026_v4  ;;  %v6042_v60 = vld [vmem:[#allocation2 + $0x2e0] sm:$0xff]  ;;  %v6056_v58 = vld [vmem:[#allocation2 + $0xb0] sm:$0xff]  ;;  %v375_v23 = vld [vmem:[%s5970_s11 + $0x18] sm:$0xff] }
  0x67   : > { %4899 = vmatmul.mubr.msk.f32.gmra.mxu1 %vm340_vm1, %v6004_v55  ;;  %7206 = vst [vmem:[#allocation27_spill] sm:$0xff] %v6042_v60  ;;  %v6058_v3 = vld [vmem:[#allocation2 + $0x2f0] sm:$0xff]  ;;  %v6072_v54 = vld [vmem:[#allocation2 + $0xc0] sm:$0xff]  ;;  %380 = vst.msk [vmem:[#allocation2 + $0x110] sm:$0xff] %vm340_vm1, %v375_v23 }
  0x68   : > { %4949 = vmatmul.mubr.msk.f32.gmra.mxu0 %vm340_vm1, %v6006_v56  ;;  %4901 = vmatprep.mubr.msk.f32.mxu1 %vm340_vm1, %v6008_v43  ;;  %v6038_v56 = vld [vmem:[#allocation2 + $0x2d8] sm:$0xff]  ;;  %7208 = vst [vmem:[#allocation29_spill] sm:$0xff] %v6058_v3  ;;  %v6074_v45 = vld [vmem:[#allocation2 + $0x300] sm:$0xff]  ;;  %v6088_v26 = vld [vmem:[#allocation2 + $0xd0] sm:$0xff] }
  0x69   : > { %4951 = vmatprep.mubr.msk.f32.mxu0 %vm340_vm1, %v6010_v48  ;;  %v6036_v48 = vld [vmem:[#allocation2 + $0x98] sm:$0xff]  ;;  %7205 = vst [vmem:[#allocation26_spill] sm:$0xff] %v6038_v56  ;;  %7210 = vst [vmem:[#allocation31_spill] sm:$0xff] %v6074_v45  ;;  %v6090_v34 = vld [vmem:[#allocation2 + $0x310] sm:$0xff] }
  0x6a   : > { %7212 = vst [vmem:[#allocation33_spill] sm:$0xff] %v6090_v34  ;;  %v6104_v24 = vld [vmem:[#allocation2 + $0xe0] sm:$0xff]  ;;  %v6126_v23 = vld [vmem:[#allocation2 + $0x328] sm:$0xff]  ;;  %v6130_v16 = vld [vmem:[#allocation2 + $0x330] sm:$0xff] }
  0x6b   : > { %4902 = vmatmul.mubr.msk.f32.gmra.mxu1 %vm340_vm1, %v6020_v49  ;;  %v6106_v20 = vld [vmem:[#allocation2 + $0x320] sm:$0xff]  ;;  %7213 = vst [vmem:[#allocation34_spill] sm:$0xff] %v6130_v16 }
  0x6c   : > { %4952 = vmatmul.mubr.msk.f32.gmra.mxu0 %vm340_vm1, %v6022_v50  ;;  %4904 = vmatprep.mubr.msk.f32.mxu1 %vm340_vm1, %v6024_v29  ;;  %v6054_v50 = vld [vmem:[#allocation2 + $0x2e8] sm:$0xff]  ;;  %v376_v18 = vld [vmem:[%s5970_s11 + $0x20] sm:$0xff] }
  0x6d   : > { %4954 = vmatprep.mubr.msk.f32.mxu0 %vm340_vm1, %v6026_v4  ;;  %v6052_v4 = vld [vmem:[#allocation2 + $0xa8] sm:$0xff]  ;;  %7207 = vst [vmem:[#allocation28_spill] sm:$0xff] %v6054_v50  ;;  %381 = vst.msk [vmem:[#allocation2 + $0x118] sm:$0xff] %vm340_vm1, %v376_v18  ;;  %v6140_v18 = vld [vmem:[#allocation2 + $0xf8] sm:$0xff] }
  0x6e   : > { %v521_v6 = vld [vmem:[%s5970_s11 + $0x2] sm:$0xff] }
  0x6f   : > { %4905 = vmatmul.mubr.msk.f32.gmra.mxu1 %vm340_vm1, %v6036_v48  ;;  %526 = vst.msk [vmem:[#allocation2 + $0x340] sm:$0xff] %vm340_vm1, %v521_v6  ;;  %v6124_v6 = vld [vmem:[#allocation2 + $0xe8] sm:$0xff] }
  0x70   : > { %4955 = vmatmul.mubr.msk.f32.gmra.mxu0 %vm340_vm1, %v6038_v56  ;;  %4907 = vmatprep.mubr.msk.f32.mxu1 %vm340_vm1, %v6040_v0  ;;  %v6070_v56 = vld [vmem:[#allocation2 + $0x2f8] sm:$0xff] }
  0x71   : > { %4957 = vmatprep.mubr.msk.f32.mxu0 %vm340_vm1, %v6042_v60  ;;  %v6068_v60 = vld [vmem:[#allocation2 + $0xb8] sm:$0xff]  ;;  %7209 = vst [vmem:[#allocation30_spill] sm:$0xff] %v6070_v56 }
  0x73   : > { %4908 = vmatmul.mubr.msk.f32.gmra.mxu1 %vm340_vm1, %v6052_v4 }
  0x74   : > { %4958 = vmatmul.mubr.msk.f32.gmra.mxu0 %vm340_vm1, %v6054_v50  ;;  %4910 = vmatprep.mubr.msk.f32.mxu1 %vm340_vm1, %v6056_v58  ;;  %v6086_v50 = vld [vmem:[#allocation2 + $0x308] sm:$0xff] }
  0x75   : > { %4960 = vmatprep.mubr.msk.f32.mxu0 %vm340_vm1, %v6058_v3  ;;  %v6084_v3 = vld [vmem:[#allocation2 + $0xc8] sm:$0xff]  ;;  %7211 = vst [vmem:[#allocation32_spill] sm:$0xff] %v6086_v50 }
  0x77   : > { %4911 = vmatmul.mubr.msk.f32.gmra.mxu1 %vm340_vm1, %v6068_v60 }
  0x78   : > { %4961 = vmatmul.mubr.msk.f32.gmra.mxu0 %vm340_vm1, %v6070_v56  ;;  %4913 = vmatprep.mubr.msk.f32.mxu1 %vm340_vm1, %v6072_v54  ;;  %v6102_v56 = vld [vmem:[#allocation2 + $0x318] sm:$0xff] }
  0x79   : > { %4963 = vmatprep.mubr.msk.f32.mxu0 %vm340_vm1, %v6074_v45  ;;  %v6100_v45 = vld [vmem:[#allocation2 + $0xd8] sm:$0xff] }
  0x7b   : > { %4914 = vmatmul.mubr.msk.f32.gmra.mxu1 %vm340_vm1, %v6084_v3 }
  0x7c   : > { %4964 = vmatmul.mubr.msk.f32.gmra.mxu0 %vm340_vm1, %v6086_v50  ;;  %4916 = vmatprep.mubr.msk.f32.mxu1 %vm340_vm1, %v6088_v26  ;;  %v522_v50 = vld [vmem:[%s5970_s11 + $0xa] sm:$0xff] }
  0x7d   : > { %4966 = vmatprep.mubr.msk.f32.mxu0 %vm340_vm1, %v6090_v34  ;;  %527 = vst.msk [vmem:[#allocation2 + $0x348] sm:$0xff] %vm340_vm1, %v522_v50  ;;  %v6128_v34 = vld [vmem:[#allocation2 + $0xf0] sm:$0xff]  ;;  %v6142_v50 = vld [vmem:[#allocation2 + $0x338] sm:$0xff] }
  0x7e   : > { %7214 = vst [vmem:[#allocation35_spill] sm:$0xff] %v6142_v50 }
  0x7f   : > { %4917 = vmatmul.mubr.msk.f32.gmra.mxu1 %vm340_vm1, %v6100_v45 }
  0x80   : > { %4967 = vmatmul.mubr.msk.f32.gmra.mxu0 %vm340_vm1, %v6102_v56  ;;  %4919 = vmatprep.mubr.msk.f32.mxu1 %vm340_vm1, %v6104_v24 }
  0x81   : > { %4969 = vmatprep.mubr.msk.f32.mxu0 %vm340_vm1, %v6106_v20 }
  0x83   : > { %4920 = vmatmul.mubr.msk.f32.gmra.mxu1 %vm340_vm1, %v6124_v6 }
  0x84   : > { %4970 = vmatmul.mubr.msk.f32.gmra.mxu0 %vm340_vm1, %v6126_v23  ;;  %4922 = vmatprep.mubr.msk.f32.mxu1 %vm340_vm1, %v6128_v34 }
  0x85   : > { %4972 = vmatprep.mubr.msk.f32.mxu0 %vm340_vm1, %v6130_v16  ;;  %v6159_v16 = vld [vmem:[%s7150_s2 + $0x1c] sm:$0xf] }
  0x87   : > { %4923 = vmatmul.mubr.msk.f32.gmra.mxu1 %vm340_vm1, %v6140_v18 }
  0x88   : > { %4973 = vmatmul.mubr.msk.f32.gmra.mxu0 %vm340_vm1, %v6142_v50  ;;  %4977 = vmatprep.mubr.msk.f32.mxu1 %vm340_vm1, %v5817_v5  ;;  %v6164_v50 = vld [vmem:[%s7150_s2 + $0x20] sm:$0xf] }
  0x89   : > { %5027 = vmatprep.mubr.msk.f32.mxu0 %vm340_vm1, %v5586_v31  ;;  %v7215_v31 = vld [vmem:[#allocation6_spill] sm:$0xff] }
  0x8b   : > { %4978 = vmatmul.mubr.msk.f32.vlgmr.msra.gmra.mxu1 %vm340_vm1, %v5837_v19  ;;  %v7236_v19 = vld [vmem:[#allocation27_spill] sm:$0xff] }
  0x8c   : > { %5028 = vmatmul.mubr.msk.f32.vlgmr.msra.gmra.mxu0 %vm340_vm1, %v5607_v35  ;;  %5076 = vmatpush3.msk.msra.mxu1 %vm693_vm0, %v5826_v7  ;;  %v524_v35 = vld [vmem:[%s5970_s11 + $0x22] sm:$0xff] }
  0x8d   : > { %5126 = vmatpush3.msk.msra.mxu0 %vm693_vm0, %v5831_v8  ;;  %4980 = vmatprep.mubr.msk.f32.mxu1 %vm340_vm1, %v5845_v21  ;;  %529 = vst.msk [vmem:[#allocation2 + $0x358] sm:$0xff] %vm340_vm1, %v524_v35  ;;  %v7235_v8 = vld [vmem:[#allocation26_spill] sm:$0xff] }
  0x8e   : > { %5030 = vmatprep.mubr.msk.f32.mxu0 %vm340_vm1, %v5615_v37  ;;  %5175 = vmatprep.subr.msk.mxu1 %vm693_vm0, %v6159_v16  ;;  %v6290_v37 = vld [vmem:[#allocation2 + $0x100] sm:$0xff] }
  0x8f   : > { %5225 = vmatprep.subr.msk.mxu0 %vm693_vm0, %v6164_v50  ;;  %4981 = vmatmul.mubr.msk.f32.gmra.mxu1 %vm340_vm1, %v5857_v33 }
  0x90   : > { %5031 = vmatmul.mubr.msk.f32.gmra.mxu0 %vm340_vm1, %v5627_v39  ;;  %4983 = vmatprep.mubr.msk.f32.mxu1 %vm340_vm1, %v5865_v25  ;;  %v7217_v39 = vld [vmem:[#allocation8_spill] sm:$0xff] }
  0x91   : > { %5033 = vmatprep.mubr.msk.f32.mxu0 %vm340_vm1, %v5635_v41  ;;  %v6304_v41 = vld [vmem:[#allocation2 + $0x228] sm:$0xff] }
  0x93   : > { %4984 = vmatmul.mubr.msk.f32.gmra.mxu1 %vm340_vm1, %v5872_v44 }
  0x94   : > { %5034 = vmatmul.mubr.msk.f32.gmra.mxu0 %vm340_vm1, %v5642_v46  ;;  %4986 = vmatprep.mubr.msk.f32.mxu1 %vm340_vm1, %v5886_v53  ;;  %v7219_v46 = vld [vmem:[#allocation10_spill] sm:$0xff] }
  0x95   : > { %5036 = vmatprep.mubr.msk.f32.mxu0 %vm340_vm1, %v5656_v51  ;;  %v7221_v51 = vld [vmem:[#allocation12_spill] sm:$0xff] }
  0x97   : > { %4987 = vmatmul.mubr.msk.f32.gmra.mxu1 %vm340_vm1, %v5912_v2 }
  0x98   : > { %5037 = vmatmul.mubr.msk.f32.gmra.mxu0 %vm340_vm1, %v5682_v62  ;;  %4989 = vmatprep.mubr.msk.f32.mxu1 %vm340_vm1, %v5942_v57  ;;  %v7223_v62 = vld [vmem:[#allocation14_spill] sm:$0xff] }
  0x99   : > { %5039 = vmatprep.mubr.msk.f32.mxu0 %vm340_vm1, %v5712_v9  ;;  %v7225_v9 = vld [vmem:[#allocation16_spill] sm:$0xff] }
  0x9b   : > { %4990 = vmatmul.mubr.msk.f32.gmra.mxu1 %vm340_vm1, %v5959_v59 }
  0x9c   : > { %5040 = vmatmul.mubr.msk.f32.gmra.mxu0 %vm340_vm1, %v5727_v11  ;;  %4992 = vmatprep.mubr.msk.f32.mxu1 %vm340_vm1, %v5963_v61  ;;  %v7227_v11 = vld [vmem:[#allocation18_spill] sm:$0xff] }
  0x9d   : > { %5042 = vmatprep.mubr.msk.f32.mxu0 %vm340_vm1, %v5731_v13  ;;  %v7229_v13 = vld [vmem:[#allocation20_spill] sm:$0xff] }
  0x9f   : > { %4993 = vmatmul.mubr.msk.f32.gmra.mxu1 %vm340_vm1, %v5976_v1 }
  0xa0   : > { %5043 = vmatmul.mubr.msk.f32.gmra.mxu0 %vm340_vm1, %v5739_v15  ;;  %4995 = vmatprep.mubr.msk.f32.mxu1 %vm340_vm1, %v5984_v27  ;;  %v7231_v15 = vld [vmem:[#allocation22_spill] sm:$0xff] }
  0xa1   : > { %5045 = vmatprep.mubr.msk.f32.mxu0 %vm340_vm1, %v5747_v17  ;;  %v7233_v17 = vld [vmem:[#allocation24_spill] sm:$0xff] }
  0xa3   : > { %4996 = vmatmul.mubr.msk.f32.gmra.mxu1 %vm340_vm1, %v6004_v55 }
  0xa4   : > { %5046 = vmatmul.mubr.msk.f32.gmra.mxu0 %vm340_vm1, %v5754_v22  ;;  %4998 = vmatprep.mubr.msk.f32.mxu1 %vm340_vm1, %v6008_v43  ;;  %v7234_v22 = vld [vmem:[#allocation25_spill] sm:$0xff] }
  0xa5   : > { %5048 = vmatprep.mubr.msk.f32.mxu0 %vm340_vm1, %v5576_v28  ;;  %v449_v28 = vld [vmem:[%s5970_s11 + $0x19] sm:$0xff] }
  0xa6   : > { %454 = vst.msk [vmem:[#allocation2 + $0x230] sm:$0xff] %vm340_vm1, %v449_v28  ;;  %v2840_v28 = vld [vmem:[#allocation2 + $0x110] sm:$0xff] }
  0xa7   : > { %4999 = vmatmul.mubr.msk.f32.gmra.mxu1 %vm340_vm1, %v6020_v49 }
  0xa8   : > { %5049 = vmatmul.mubr.msk.f32.gmra.mxu0 %vm340_vm1, %v5584_v30  ;;  %5001 = vmatprep.mubr.msk.f32.mxu1 %vm340_vm1, %v6024_v29  ;;  %v523_v30 = vld [vmem:[%s5970_s11 + $0x1a] sm:$0xff] }
  0xa9   : > { %5051 = vmatprep.mubr.msk.f32.mxu0 %vm340_vm1, %v5588_v32  ;;  %528 = vst.msk [vmem:[#allocation2 + $0x350] sm:$0xff] %vm340_vm1, %v523_v30  ;;  %v450_v32 = vld [vmem:[%s5970_s11 + $0x21] sm:$0xff]  ;;  %s5415_s11 = smov [#allocation3]  }
  0xaa   : > { %455 = vst.msk [vmem:[#allocation2 + $0x238] sm:$0xff] %vm340_vm1, %v450_v32  ;;  %v2841_v32 = vld [vmem:[#allocation2 + $0x118] sm:$0xff]  ;;  %s5341_s9 = sshll.u32 %s5415_s11, 4  ;;  %s5342_s9 = int_to_ptr.vmem [resolvable:$false] %s5341_s9 }
  0xab   : > { %5002 = vmatmul.mubr.msk.f32.gmra.mxu1 %vm340_vm1, %v6036_v48  ;;  %s5343_s10 = scalar_lea.vmem %s5342_s9, 8192  ;;  %p5344_p1 = scmp.lt.s32.totalorder %s7095_s30, %s5342_s9 }
  0xac   : > { %5052 = vmatmul.mubr.msk.f32.gmra.mxu0 %vm340_vm1, %v5609_v36  ;;  %5004 = vmatprep.mubr.msk.f32.mxu1 %vm340_vm1, %v6040_v0  ;;  %v7216_v36 = vld [vmem:[#allocation7_spill] sm:$0xff]  ;;  %p5345_p2 = scmp.lt.s32.totalorder %s5343_s10, %s5337_s8 }
  0xad   : > { %5054 = vmatprep.mubr.msk.f32.mxu0 %vm340_vm1, %v5617_v38  ;;  %v6292_v38 = vld [vmem:[#allocation2 + $0x220] sm:$0xff] }
  0xae   : > { %p5346_p3 = por %p5345_p2, %p5344_p1 }
  0xaf   : > { %5005 = vmatmul.mubr.msk.f32.gmra.mxu1 %vm340_vm1, %v6052_v4 }
  0xb0   : > { %5055 = vmatmul.mubr.msk.f32.gmra.mxu0 %vm340_vm1, %v5633_v40  ;;  %5007 = vmatprep.mubr.msk.f32.mxu1 %vm340_vm1, %v6056_v58  ;;  %v6302_v40 = vld [vmem:[#allocation2 + $0x108] sm:$0xff]  ;;  %p5347_p5 = pnand %p5346_p3, %p5340_p0 }
  0xb1   : > { %5057 = vmatprep.mubr.msk.f32.mxu0 %vm340_vm1, %v5637_v42  ;;  %v7218_v42 = vld [vmem:[#allocation9_spill] sm:$0xff] }
  0xb3   : > { %5008 = vmatmul.mubr.msk.f32.gmra.mxu1 %vm340_vm1, %v6068_v60 }
  0xb4   : > { %5058 = vmatmul.mubr.msk.f32.gmra.mxu0 %vm340_vm1, %v5644_v47  ;;  %5010 = vmatprep.mubr.msk.f32.mxu1 %vm340_vm1, %v6072_v54  ;;  %v7220_v47 = vld [vmem:[#allocation11_spill] sm:$0xff] }
  0xb5   : > { %5060 = vmatprep.mubr.msk.f32.mxu0 %vm340_vm1, %v5658_v52  ;;  %v7222_v52 = vld [vmem:[#allocation13_spill] sm:$0xff] }
  0xb7   : > { %5011 = vmatmul.mubr.msk.f32.gmra.mxu1 %vm340_vm1, %v6084_v3 }
  0xb8   : > { %5061 = vmatmul.mubr.msk.f32.gmra.mxu0 %vm340_vm1, %v5684_v63  ;;  %5013 = vmatprep.mubr.msk.f32.mxu1 %vm340_vm1, %v6088_v26  ;;  %v7224_v63 = vld [vmem:[#allocation15_spill] sm:$0xff] }
  0xb9   : > { %5063 = vmatprep.mubr.msk.f32.mxu0 %vm340_vm1, %v5714_v10  ;;  %v7226_v10 = vld [vmem:[#allocation17_spill] sm:$0xff] }
  0xbb   : > { %5014 = vmatmul.mubr.msk.f32.gmra.mxu1 %vm340_vm1, %v6100_v45 }
  0xbc   : > { %5064 = vmatmul.mubr.msk.f32.gmra.mxu0 %vm340_vm1, %v5729_v12  ;;  %5016 = vmatprep.mubr.msk.f32.mxu1 %vm340_vm1, %v6104_v24  ;;  %v7228_v12 = vld [vmem:[#allocation19_spill] sm:$0xff] }
  0xbd   : > { %5066 = vmatprep.mubr.msk.f32.mxu0 %vm340_vm1, %v5733_v14  ;;  %v7230_v14 = vld [vmem:[#allocation21_spill] sm:$0xff] }
  0xbf   : > { %5017 = vmatmul.mubr.msk.f32.gmra.mxu1 %vm340_vm1, %v6124_v6 }
  0xc0   : > { %5067 = vmatmul.mubr.msk.f32.gmra.mxu0 %vm340_vm1, %v7215_v31  ;;  %5019 = vmatprep.mubr.msk.f32.mxu1 %vm340_vm1, %v6128_v34 }
  0xc1   : > { %5069 = vmatprep.mubr.msk.f32.mxu0 %vm340_vm1, %v7216_v36 }
  0xc3   : > { %5020 = vmatmul.mubr.msk.f32.gmra.mxu1 %vm340_vm1, %v6140_v18 }
  0xc4   : > { %5070 = vmatmul.mubr.msk.f32.gmra.mxu0 %vm340_vm1, %v7217_v39  ;;  %5022 = vmatprep.mubr.msk.f32.mxu1 %vm340_vm1, %v6290_v37  ;;  %v3592_v39 = vld [vmem:[#allocation2 + $0x260] sm:$0xff] }
  0xc5   : > { %5072 = vmatprep.mubr.msk.f32.mxu0 %vm340_vm1, %v6292_v38 }
  0xc7   : > { %5023 = vmatmul.mubr.msk.f32.gmra.mxu1 %vm340_vm1, %v6302_v40 }
  0xc8   : > { %5073 = vmatmul.mubr.msk.f32.gmra.mxu0 %vm340_vm1, %v6304_v41  ;;  %5077 = vmatprep.mubr.msk.f32.mxu1 %vm340_vm1, %v7218_v42 }
  0xc9   : > { %5127 = vmatprep.mubr.msk.f32.mxu0 %vm340_vm1, %v5845_v21 }
  0xcb   : > { %5078 = vmatmul.mubr.msk.f32.vlgmr.msra.gmra.mxu1 %vm340_vm1, %v7219_v46 }
  0xcc   : > { %5128 = vmatmul.mubr.msk.f32.vlgmr.msra.gmra.mxu0 %vm340_vm1, %v5857_v33  ;;  %5176 = vmatpush3.msk.msra.mxu1 %vm693_vm0, %v6159_v16  ;;  %v7232_v16 = vld [vmem:[#allocation23_spill] sm:$0xff] }
  0xcd   : > { %5226 = vmatpush3.msk.msra.mxu0 %vm693_vm0, %v6164_v50  ;;  %5080 = vmatprep.mubr.msk.f32.mxu1 %vm340_vm1, %v7220_v47  ;;  %v3593_v47 = vld [vmem:[#allocation2 + $0x268] sm:$0xff] }
  0xce   : > { %5130 = vmatprep.mubr.msk.f32.mxu0 %vm340_vm1, %v5865_v25 }
  0xcf   : > { %5081 = vmatmul.mubr.msk.f32.gmra.mxu1 %vm340_vm1, %v7221_v51 }
  0xd0   : > { %5131 = vmatmul.mubr.msk.f32.gmra.mxu0 %vm340_vm1, %v5872_v44  ;;  %5083 = vmatprep.mubr.msk.f32.mxu1 %vm340_vm1, %v7222_v52 }
  0xd1   : > { %5133 = vmatprep.mubr.msk.f32.mxu0 %vm340_vm1, %v5886_v53  ;;  %v7237_v53 = vld [vmem:[#allocation28_spill] sm:$0xff] }
  0xd3   : > { %5084 = vmatmul.mubr.msk.f32.gmra.mxu1 %vm340_vm1, %v7223_v62  ;;  %v3203_v62 = vld [vmem:[#allocation2 + $0x150] sm:$0xff] }
  0xd4   : > { %5134 = vmatmul.mubr.msk.f32.gmra.mxu0 %vm340_vm1, %v5912_v2  ;;  %5086 = vmatprep.mubr.msk.f32.mxu1 %vm340_vm1, %v7224_v63  ;;  %v7238_v2 = vld [vmem:[#allocation29_spill] sm:$0xff]  ;;  %v3594_v63 = vld [vmem:[#allocation2 + $0x270] sm:$0xff] }
  0xd5   : > { %5136 = vmatprep.mubr.msk.f32.mxu0 %vm340_vm1, %v5942_v57 }
  0xd7   : > { %5087 = vmatmul.mubr.msk.f32.gmra.mxu1 %vm340_vm1, %v7225_v9 }
  0xd8   : > { %5137 = vmatmul.mubr.msk.f32.gmra.mxu0 %vm340_vm1, %v5959_v59  ;;  %5089 = vmatprep.mubr.msk.f32.mxu1 %vm340_vm1, %v7226_v10 }
  0xd9   : > { %5139 = vmatprep.mubr.msk.f32.mxu0 %vm340_vm1, %v5963_v61 }
  0xdb   : > { %5090 = vmatmul.mubr.msk.f32.gmra.mxu1 %vm340_vm1, %v7227_v11 }
  0xdc   : > { %5140 = vmatmul.mubr.msk.f32.gmra.mxu0 %vm340_vm1, %v5976_v1  ;;  %5092 = vmatprep.mubr.msk.f32.mxu1 %vm340_vm1, %v7228_v12  ;;  %v3204_v12 = vld [vmem:[#allocation2 + $0x158] sm:$0xff] }
  0xdd   : > { %5142 = vmatprep.mubr.msk.f32.mxu0 %vm340_vm1, %v5984_v27 }
  0xdf   : > { %5093 = vmatmul.mubr.msk.f32.gmra.mxu1 %vm340_vm1, %v7229_v13  ;;  %v3595_v13 = vld [vmem:[#allocation2 + $0x278] sm:$0xff] }
  0xe0   : > { %5143 = vmatmul.mubr.msk.f32.gmra.mxu0 %vm340_vm1, %v6004_v55  ;;  %5095 = vmatprep.mubr.msk.f32.mxu1 %vm340_vm1, %v7230_v14 }
  0xe1   : > { %5145 = vmatprep.mubr.msk.f32.mxu0 %vm340_vm1, %v6008_v43 }
  0xe3   : > { %5096 = vmatmul.mubr.msk.f32.gmra.mxu1 %vm340_vm1, %v7231_v15 }
  0xe4   : > { %5146 = vmatmul.mubr.msk.f32.gmra.mxu0 %vm340_vm1, %v6020_v49  ;;  %5098 = vmatprep.mubr.msk.f32.mxu1 %vm340_vm1, %v7232_v16  ;;  %v3205_v16 = vld [vmem:[#allocation2 + $0x160] sm:$0xff] }
  0xe5   : > { %5148 = vmatprep.mubr.msk.f32.mxu0 %vm340_vm1, %v6024_v29  ;;  %v7241_v29 = vld [vmem:[#allocation32_spill] sm:$0xff] }
  0xe7   : > { %5099 = vmatmul.mubr.msk.f32.gmra.mxu1 %vm340_vm1, %v7233_v17  ;;  %v3596_v17 = vld [vmem:[#allocation2 + $0x280] sm:$0xff] }
  0xe8   : > { %5149 = vmatmul.mubr.msk.f32.gmra.mxu0 %vm340_vm1, %v6036_v48  ;;  %5101 = vmatprep.mubr.msk.f32.mxu1 %vm340_vm1, %v7234_v22 }
  0xe9   : > { %5151 = vmatprep.mubr.msk.f32.mxu0 %vm340_vm1, %v6040_v0  ;;  %v6382_v5 = vpop.f32.mrf.mxu0  ;;  %v7239_v0 = vld [vmem:[#allocation30_spill] sm:$0xff] }
  0xea   : > { %v6384_v7 = vpop.f32.mrf.mxu1 }
  0xeb   : > { %5102 = vmatmul.mubr.msk.f32.gmra.mxu1 %vm340_vm1, %v7235_v8  ;;  %v6394_v21 = vpop.f32.mrf.mxu0 }
  0xec   : > { %5152 = vmatmul.mubr.msk.f32.gmra.mxu0 %vm340_vm1, %v6052_v4  ;;  %5104 = vmatprep.mubr.msk.f32.mxu1 %vm340_vm1, %v7236_v19  ;;  %v6396_v33 = vpop.f32.mrf.mxu1 }
  0xed   : > { %5154 = vmatprep.mubr.msk.f32.mxu0 %vm340_vm1, %v6056_v58  ;;  %v6398_v25 = vpop.f32.mrf.mxu0 }
  0xee   : > { %v6400_v44 = vpop.f32.mrf.mxu1 }
  0xef   : > { %5105 = vmatmul.mubr.msk.f32.gmra.mxu1 %vm340_vm1, %v7237_v53  ;;  %v6410_v57 = vpop.f32.mrf.mxu0 }
  0xf0   : > { %5155 = vmatmul.mubr.msk.f32.gmra.mxu0 %vm340_vm1, %v6068_v60  ;;  %5107 = vmatprep.mubr.msk.f32.mxu1 %vm340_vm1, %v7238_v2  ;;  %v6412_v58 = vpop.f32.mrf.mxu1  ;;  %v7240_v60 = vld [vmem:[#allocation31_spill] sm:$0xff] }
  0xf1   : > { %5157 = vmatprep.mubr.msk.f32.mxu0 %vm340_vm1, %v6072_v54  ;;  %v6414_v59 = vpop.f32.mrf.mxu0 }
  0xf2   : > { %v6416_v61 = vpop.f32.mrf.mxu1 }
  0xf3   : > { %5108 = vmatmul.mubr.msk.f32.gmra.mxu1 %vm340_vm1, %v7239_v0  ;;  %v6426_v54 = vpop.f32.mrf.mxu0  ;;  %v3206_v0 = vld [vmem:[#allocation2 + $0x168] sm:$0xff] }
  0xf4   : > { %5158 = vmatmul.mubr.msk.f32.gmra.mxu0 %vm340_vm1, %v6084_v3  ;;  %5110 = vmatprep.mubr.msk.f32.mxu1 %vm340_vm1, %v7240_v60  ;;  %v6428_v1 = vpop.f32.mrf.mxu1  ;;  %v7242_v3 = vld [vmem:[#allocation33_spill] sm:$0xff]  ;;  %v3597_v60 = vld [vmem:[#allocation2 + $0x288] sm:$0xff] }
  0xf5   : > { %5160 = vmatprep.mubr.msk.f32.mxu0 %vm340_vm1, %v6088_v26  ;;  %v6430_v4 = vpop.f32.mrf.mxu0 }
  0xf6   : > { %v6432_v27 = vpop.f32.mrf.mxu1 }
  0xf7   : > { %5111 = vmatmul.mubr.msk.f32.gmra.mxu1 %vm340_vm1, %v7241_v29  ;;  %v6442_v26 = vpop.f32.mrf.mxu0 }
  0xf8   : > { %5161 = vmatmul.mubr.msk.f32.gmra.mxu0 %vm340_vm1, %v6100_v45  ;;  %5113 = vmatprep.mubr.msk.f32.mxu1 %vm340_vm1, %v7242_v3  ;;  %v6444_v55 = vpop.f32.mrf.mxu1 }
  0xf9   : > { %5163 = vmatprep.mubr.msk.f32.mxu0 %vm340_vm1, %v6104_v24  ;;  %v6446_v43 = vpop.f32.mrf.mxu0 }
  0xfa   : > { %v6448_v48 = vpop.f32.mrf.mxu1 }
  0xfb   : > { %5114 = vmatmul.mubr.msk.f32.gmra.mxu1 %vm340_vm1, %v6102_v56  ;;  %v6458_v24 = vpop.f32.mrf.mxu0  ;;  %v7243_v56 = vld [vmem:[#allocation34_spill] sm:$0xff] }
  0xfc   : > { %5164 = vmatmul.mubr.msk.f32.gmra.mxu0 %vm340_vm1, %v6124_v6  ;;  %5116 = vmatprep.mubr.msk.f32.mxu1 %vm340_vm1, %v6106_v20  ;;  %v6460_v45 = vpop.f32.mrf.mxu1  ;;  %v6478_v6 = vld [vmem:[#allocation2 + $0x340] sm:$0xff] }
  0xfd   : > { %5166 = vmatprep.mubr.msk.f32.mxu0 %vm340_vm1, %v6128_v34  ;;  %v6462_v49 = vpop.f32.mrf.mxu0 }
  0xfe   : > { %v6464_v50 = vpop.f32.mrf.mxu1 }
  0xff   : > { %5117 = vmatmul.mubr.msk.f32.gmra.mxu1 %vm340_vm1, %v6126_v23  ;;  %v6474_v20 = vpop.f32.mrf.mxu0  ;;  %v7244_v23 = vld [vmem:[#allocation35_spill] sm:$0xff] }
 0x100   : > { %5167 = vmatmul.mubr.msk.f32.gmra.mxu0 %vm340_vm1, %v6140_v18  ;;  %5119 = vmatprep.mubr.msk.f32.mxu1 %vm340_vm1, %v7243_v56  ;;  %v6476_v34 = vpop.f32.mrf.mxu1  ;;  %v6491_v18 = vld [vmem:[#allocation2 + $0x348] sm:$0xff]  ;;  %v3207_v56 = vld [vmem:[#allocation2 + $0x170] sm:$0xff] }
 0x101   : > { %5169 = vmatprep.mubr.msk.f32.mxu0 %vm340_vm1, %v6290_v37  ;;  %v6480_v30 = vpop.f32.mrf.mxu0  ;;  %v3201_v37 = vld [vmem:[#allocation2 + $0x140] sm:$0xff] }
 0x102   : > { %v6482_v31 = vpop.f32.mrf.mxu1 }
 0x103   : > { %5120 = vmatmul.mubr.msk.f32.gmra.mxu1 %vm340_vm1, %v7244_v23  ;;  %v6493_v35 = vpop.f32.mrf.mxu0 }
 0x104   : > { %5170 = vmatmul.mubr.msk.f32.gmra.mxu0 %vm340_vm1, %v6302_v40  ;;  %5122 = vmatprep.mubr.msk.f32.mxu1 %vm340_vm1, %v6478_v6  ;;  %v6495_v36 = vpop.f32.mrf.mxu1  ;;  %v3202_v40 = vld [vmem:[#allocation2 + $0x148] sm:$0xff] }
 0x105   : > { %5172 = vmatprep.mubr.msk.f32.mxu0 %vm340_vm1, %v2840_v28  ;;  %v6497_v42 = vpop.f32.mrf.mxu0 }
 0x106   : > { %v6499_v46 = vpop.f32.mrf.mxu1 }
 0x107   : > { %5123 = vmatmul.mubr.msk.f32.gmra.mxu1 %vm340_vm1, %v6491_v18  ;;  %v6506_v51 = vpop.f32.mrf.mxu0 }
 0x108   : > { %5173 = vmatmul.mubr.msk.f32.gmra.mxu0 %vm340_vm1, %v2841_v32  ;;  %5177 = vmatprep.mubr.msk.f32.mxu1 %vm340_vm1, %v3201_v37  ;;  %v6508_v52 = vpop.f32.mrf.mxu1 }
 0x109   : > { %5227 = vmatprep.mubr.msk.f32.mxu0 %vm340_vm1, %v3592_v39  ;;  %v4929_v10 = vpop.f32.mrf.mxu0 }
 0x10a   : > { %v4879_v9 = vpop.f32.mrf.mxu1 }
 0x10b   : > { %5178 = vmatmul.mubr.msk.f32.vlgmr.msra.gmra.mxu1 %vm340_vm1, %v3202_v40  ;;  %v1093_v11 = vadd.f32 %v4879_v9, %v6382_v5  ;;  %v1445_v15 = vpop.f32.mrf.mxu0  ;;  %v3208_v40 = vld [vmem:[#allocation2 + $0x178] sm:$0xff]  ;;  %v3209_v9 = vld [vmem:[#allocation2 + $0x180] sm:$0xff] }
 0x10c   : > { %5228 = vmatmul.mubr.msk.f32.vlgmr.msra.gmra.mxu0 %vm340_vm1, %v3593_v47  ;;  %5180 = vmatprep.mubr.msk.f32.mxu1 %vm340_vm1, %v3203_v62  ;;  %v1087_v14 = vpop.f32.mrf.mxu1  ;;  %v3599_v47 = vld [vmem:[#allocation2 + $0x298] sm:$0xff] }
 0x10d   : > { %5230 = vmatprep.mubr.msk.f32.mxu0 %vm340_vm1, %v3594_v63  ;;  %v6515_v22 = vadd.f32 %v4929_v10, %v1093_v11  ;;  %v1088_v8 = vadd.f32 %v1087_v14, %v6394_v21  ;;  %v4932_v53 = vpop.f32.mrf.mxu0  ;;  %v3598_v21 = vld [vmem:[#allocation2 + $0x290] sm:$0xff] }
 0x10e   : > { %v4882_v19 = vpop.f32.mrf.mxu1 }
 0x10f   : > { %5181 = vmatmul.mubr.msk.f32.gmra.mxu1 %vm340_vm1, %v3204_v12  ;;  %v6520_v5 = vadd.f32 %v1445_v15, %v1088_v8  ;;  %v1103_v2 = vadd.f32 %v4882_v19, %v6398_v25  ;;  %v1455_v3 = vpop.f32.mrf.mxu0  ;;  %v3210_v15 = vld [vmem:[#allocation2 + $0x188] sm:$0xff]  ;;  %v3211_v19 = vld [vmem:[#allocation2 + $0x190] sm:$0xff] }
 0x110   : > { %5231 = vmatmul.mubr.msk.f32.gmra.mxu0 %vm340_vm1, %v3595_v13  ;;  %5183 = vmatprep.mubr.msk.f32.mxu1 %vm340_vm1, %v3205_v16  ;;  %v1097_v29 = vpop.f32.mrf.mxu1  ;;  %v3601_v16 = vld [vmem:[#allocation2 + $0x2a8] sm:$0xff] }
 0x111   : > { %5233 = vmatprep.mubr.msk.f32.mxu0 %vm340_vm1, %v3596_v17  ;;  %v6525_v28 = vadd.f32 %v4932_v53, %v1103_v2  ;;  %v1098_v23 = vadd.f32 %v1097_v29, %v6410_v57  ;;  %v4935_v37 = vpop.f32.mrf.mxu0  ;;  %v3600_v57 = vld [vmem:[#allocation2 + $0x2a0] sm:$0xff] }
 0x112   : > { %v4885_v32 = vpop.f32.mrf.mxu1 }
 0x113   : > { %5184 = vmatmul.mubr.msk.f32.gmra.mxu1 %vm340_vm1, %v3206_v0  ;;  %v6530_v25 = vadd.f32 %v1455_v3, %v1098_v23  ;;  %v1113_v39 = vadd.f32 %v4885_v32, %v6414_v59  ;;  %v1465_v63 = vpop.f32.mrf.mxu0  ;;  %v3212_v3 = vld [vmem:[#allocation2 + $0x198] sm:$0xff]  ;;  %v3213_v32 = vld [vmem:[#allocation2 + $0x1a0] sm:$0xff] }
 0x114   : > { %5234 = vmatmul.mubr.msk.f32.gmra.mxu0 %vm340_vm1, %v3597_v60  ;;  %5186 = vmatprep.mubr.msk.f32.mxu1 %vm340_vm1, %v3207_v56  ;;  %v1107_v62 = vpop.f32.mrf.mxu1  ;;  %v3603_v56 = vld [vmem:[#allocation2 + $0x2b8] sm:$0xff] }
 0x115   : > { %5236 = vmatprep.mubr.msk.f32.mxu0 %vm340_vm1, %v3598_v21  ;;  %v6535_v10 = vadd.f32 %v4935_v37, %v1113_v39  ;;  %v1108_v11 = vadd.f32 %v1107_v62, %v6426_v54  ;;  %v4938_v13 = vpop.f32.mrf.mxu0  ;;  %v3602_v54 = vld [vmem:[#allocation2 + $0x2b0] sm:$0xff] }
 0x116   : > { %v4888_v12 = vpop.f32.mrf.mxu1 }
 0x117   : > { %5187 = vmatmul.mubr.msk.f32.gmra.mxu1 %vm340_vm1, %v3208_v40  ;;  %v6540_v59 = vadd.f32 %v1465_v63, %v1108_v11  ;;  %v1123_v14 = vadd.f32 %v4888_v12, %v6430_v4  ;;  %v1475_v8 = vpop.f32.mrf.mxu0  ;;  %v3214_v63 = vld [vmem:[#allocation2 + $0x1a8] sm:$0xff]  ;;  %v3215_v12 = vld [vmem:[#allocation2 + $0x1b0] sm:$0xff] }
 0x118   : > { %5237 = vmatmul.mubr.msk.f32.gmra.mxu0 %vm340_vm1, %v3599_v47  ;;  %5189 = vmatprep.mubr.msk.f32.mxu1 %vm340_vm1, %v3209_v9  ;;  %v1117_v17 = vpop.f32.mrf.mxu1  ;;  %v3605_v9 = vld [vmem:[#allocation2 + $0x2c8] sm:$0xff] }
 0x119   : > { %5239 = vmatprep.mubr.msk.f32.mxu0 %vm340_vm1, %v3600_v57  ;;  %v6545_v53 = vadd.f32 %v4938_v13, %v1123_v14  ;;  %v1118_v2 = vadd.f32 %v1117_v17, %v6442_v26  ;;  %v4941_v60 = vpop.f32.mrf.mxu0  ;;  %v3604_v26 = vld [vmem:[#allocation2 + $0x2c0] sm:$0xff] }
 0x11a   : > { %v4891_v0 = vpop.f32.mrf.mxu1 }
 0x11b   : > { %5190 = vmatmul.mubr.msk.f32.gmra.mxu1 %vm340_vm1, %v3210_v15  ;;  %v6550_v4 = vadd.f32 %v1475_v8, %v1118_v2  ;;  %v1133_v29 = vadd.f32 %v4891_v0, %v6446_v43  ;;  %v1485_v23 = vpop.f32.mrf.mxu0  ;;  %v3216_v8 = vld [vmem:[#allocation2 + $0x1b8] sm:$0xff]  ;;  %v3217_v0 = vld [vmem:[#allocation2 + $0x1c0] sm:$0xff] }
 0x11c   : > { %5240 = vmatmul.mubr.msk.f32.gmra.mxu0 %vm340_vm1, %v3601_v16  ;;  %5192 = vmatprep.mubr.msk.f32.mxu1 %vm340_vm1, %v3211_v19  ;;  %v1127_v21 = vpop.f32.mrf.mxu1  ;;  %v3607_v19 = vld [vmem:[#allocation2 + $0x2d8] sm:$0xff] }
 0x11d   : > { %5242 = vmatprep.mubr.msk.f32.mxu0 %vm340_vm1, %v3602_v54  ;;  %v6555_v37 = vadd.f32 %v4941_v60, %v1133_v29  ;;  %v1128_v39 = vadd.f32 %v1127_v21, %v6458_v24  ;;  %v3606_v24 = vld [vmem:[#allocation2 + $0x2d0] sm:$0xff] }
 0x11f   : > { %v4894_v40 = vpop.f32.mrf.mxu1  ;;  %5193 = vmatmul.mubr.msk.f32.gmra.mxu1 %vm340_vm1, %v3212_v3  ;;  %v6560_v43 = vadd.f32 %v1485_v23, %v1128_v39  ;;  %v3218_v23 = vld [vmem:[#allocation2 + $0x1c8] sm:$0xff] }
 0x120   : > { %v4944_v47 = vpop.f32.mrf.mxu0  ;;  %5243 = vmatmul.mubr.msk.f32.gmra.mxu0 %vm340_vm1, %v3603_v56  ;;  %v1143_v62 = vadd.f32 %v4894_v40, %v6462_v49  ;;  %5195 = vmatprep.mubr.msk.f32.mxu1 %vm340_vm1, %v3213_v32  ;;  %v3609_v32 = vld [vmem:[#allocation2 + $0x2e8] sm:$0xff]  ;;  %v3219_v40 = vld [vmem:[#allocation2 + $0x1d0] sm:$0xff] }
 0x121   : > { %5245 = vmatprep.mubr.msk.f32.mxu0 %vm340_vm1, %v3604_v26  ;;  %v1137_v57 = vpop.f32.mrf.mxu1 }
 0x122   : > { %v1495_v11 = vpop.f32.mrf.mxu0  ;;  %v6565_v13 = vadd.f32 %v4944_v47, %v1143_v62  ;;  %v1138_v14 = vadd.f32 %v1137_v57, %v6474_v20  ;;  %v3608_v20 = vld [vmem:[#allocation2 + $0x2e0] sm:$0xff] }
 0x123   : > { %v4897_v15 = vpop.f32.mrf.mxu1  ;;  %5196 = vmatmul.mubr.msk.f32.gmra.mxu1 %vm340_vm1, %v3214_v63 }
 0x124   : > { %v4947_v16 = vpop.f32.mrf.mxu0  ;;  %5246 = vmatmul.mubr.msk.f32.gmra.mxu0 %vm340_vm1, %v3605_v9  ;;  %v6570_v49 = vadd.f32 %v1495_v11, %v1138_v14  ;;  %v1153_v17 = vadd.f32 %v4897_v15, %v6480_v30  ;;  %5198 = vmatprep.mubr.msk.f32.mxu1 %vm340_vm1, %v3215_v12  ;;  %v3220_v11 = vld [vmem:[#allocation2 + $0x1d8] sm:$0xff]  ;;  %v3221_v15 = vld [vmem:[#allocation2 + $0x1e0] sm:$0xff] }
 0x125   : > { %5248 = vmatprep.mubr.msk.f32.mxu0 %vm340_vm1, %v3606_v24  ;;  %v1147_v54 = vpop.f32.mrf.mxu1  ;;  %v3611_v12 = vld [vmem:[#allocation2 + $0x2f8] sm:$0xff] }
 0x126   : > { %v1505_v2 = vpop.f32.mrf.mxu0  ;;  %v6575_v60 = vadd.f32 %v4947_v16, %v1153_v17  ;;  %v1148_v29 = vadd.f32 %v1147_v54, %v6493_v35  ;;  %v3610_v35 = vld [vmem:[#allocation2 + $0x2f0] sm:$0xff] }
 0x127   : > { %v4900_v3 = vpop.f32.mrf.mxu1  ;;  %5199 = vmatmul.mubr.msk.f32.gmra.mxu1 %vm340_vm1, %v3216_v8 }
 0x128   : > { %v4950_v56 = vpop.f32.mrf.mxu0  ;;  %5249 = vmatmul.mubr.msk.f32.gmra.mxu0 %vm340_vm1, %v3607_v19  ;;  %v6580_v30 = vadd.f32 %v1505_v2, %v1148_v29  ;;  %v1163_v21 = vadd.f32 %v4900_v3, %v6497_v42  ;;  %5201 = vmatprep.mubr.msk.f32.mxu1 %vm340_vm1, %v3217_v0  ;;  %v3222_v2 = vld [vmem:[#allocation2 + $0x1e8] sm:$0xff]  ;;  %v3223_v3 = vld [vmem:[#allocation2 + $0x1f0] sm:$0xff] }
 0x129   : > { %5251 = vmatprep.mubr.msk.f32.mxu0 %vm340_vm1, %v3608_v20  ;;  %v1157_v26 = vpop.f32.mrf.mxu1  ;;  %v3613_v0 = vld [vmem:[#allocation2 + $0x308] sm:$0xff] }
 0x12a   : > { %v1515_v39 = vpop.f32.mrf.mxu0  ;;  %v6585_v47 = vadd.f32 %v4950_v56, %v1163_v21  ;;  %v1158_v62 = vadd.f32 %v1157_v26, %v6506_v51  ;;  %v3612_v51 = vld [vmem:[#allocation2 + $0x300] sm:$0xff] }
 0x12b   : > { %v4903_v63 = vpop.f32.mrf.mxu1  ;;  %5202 = vmatmul.mubr.msk.f32.gmra.mxu1 %vm340_vm1, %v3218_v23 }
 0x12c   : > { %v4953_v9 = vpop.f32.mrf.mxu0  ;;  %5252 = vmatmul.mubr.msk.f32.gmra.mxu0 %vm340_vm1, %v3609_v32  ;;  %v6590_v42 = vadd.f32 %v1515_v39, %v1158_v62  ;;  %v1173_v57 = vadd.f32 %v4903_v63, %v6384_v7  ;;  %5204 = vmatprep.mubr.msk.f32.mxu1 %vm340_vm1, %v3219_v40  ;;  %v3224_v39 = vld [vmem:[#allocation2 + $0x1f8] sm:$0xff]  ;;  %v3225_v63 = vld [vmem:[#allocation2 + $0x200] sm:$0xff] }
 0x12d   : > { %5254 = vmatprep.mubr.msk.f32.mxu0 %vm340_vm1, %v3610_v35  ;;  %v1167_v24 = vpop.f32.mrf.mxu1  ;;  %v3615_v40 = vld [vmem:[#allocation2 + $0x318] sm:$0xff] }
 0x12e   : > { %v1525_v14 = vpop.f32.mrf.mxu0  ;;  %v6595_v16 = vadd.f32 %v4953_v9, %v1173_v57  ;;  %v1168_v17 = vadd.f32 %v1167_v24, %v6396_v33  ;;  %v3614_v33 = vld [vmem:[#allocation2 + $0x310] sm:$0xff] }
 0x12f   : > { %v4906_v8 = vpop.f32.mrf.mxu1  ;;  %5205 = vmatmul.mubr.msk.f32.gmra.mxu1 %vm340_vm1, %v3220_v11 }
 0x130   : > { %v4956_v19 = vpop.f32.mrf.mxu0  ;;  %5255 = vmatmul.mubr.msk.f32.gmra.mxu0 %vm340_vm1, %v3611_v12  ;;  %v6600_v7 = vadd.f32 %v1525_v14, %v1168_v17  ;;  %v1183_v54 = vadd.f32 %v4906_v8, %v6400_v44  ;;  %5207 = vmatprep.mubr.msk.f32.mxu1 %vm340_vm1, %v3221_v15  ;;  %v3226_v14 = vld [vmem:[#allocation2 + $0x208] sm:$0xff]  ;;  %v3227_v8 = vld [vmem:[#allocation2 + $0x210] sm:$0xff] }
 0x131   : > { %5257 = vmatprep.mubr.msk.f32.mxu0 %vm340_vm1, %v3612_v51  ;;  %v1177_v20 = vpop.f32.mrf.mxu1  ;;  %v3617_v15 = vld [vmem:[#allocation2 + $0x328] sm:$0xff] }
 0x132   : > { %v1535_v29 = vpop.f32.mrf.mxu0  ;;  %v6605_v56 = vadd.f32 %v4956_v19, %v1183_v54  ;;  %v1178_v21 = vadd.f32 %v1177_v20, %v6412_v58  ;;  %v3616_v58 = vld [vmem:[#allocation2 + $0x320] sm:$0xff] }
 0x133   : > { %v4909_v23 = vpop.f32.mrf.mxu1  ;;  %5208 = vmatmul.mubr.msk.f32.gmra.mxu1 %vm340_vm1, %v3222_v2 }
 0x134   : > { %v4959_v32 = vpop.f32.mrf.mxu0  ;;  %5258 = vmatmul.mubr.msk.f32.gmra.mxu0 %vm340_vm1, %v3613_v0  ;;  %v6610_v44 = vadd.f32 %v1535_v29, %v1178_v21  ;;  %v1193_v26 = vadd.f32 %v4909_v23, %v6416_v61  ;;  %5210 = vmatprep.mubr.msk.f32.mxu1 %vm340_vm1, %v3223_v3  ;;  %v3228_v29 = vld [vmem:[#allocation2 + $0x218] sm:$0xff] }
 0x135   : > { %5260 = vmatprep.mubr.msk.f32.mxu0 %vm340_vm1, %v3614_v33  ;;  %v1187_v35 = vpop.f32.mrf.mxu1  ;;  %v3619_v3 = vld [vmem:[#allocation2 + $0x338] sm:$0xff] }
 0x136   : > { %v1545_v62 = vpop.f32.mrf.mxu0  ;;  %v6615_v9 = vadd.f32 %v4959_v32, %v1193_v26  ;;  %v1188_v57 = vadd.f32 %v1187_v35, %v6428_v1  ;;  %v3618_v1 = vld [vmem:[#allocation2 + $0x330] sm:$0xff] }
 0x137   : > { %v4912_v11 = vpop.f32.mrf.mxu1  ;;  %5211 = vmatmul.mubr.msk.f32.gmra.mxu1 %vm340_vm1, %v3224_v39 }
 0x138   : > { %v4962_v12 = vpop.f32.mrf.mxu0  ;;  %5261 = vmatmul.mubr.msk.f32.gmra.mxu0 %vm340_vm1, %v3615_v40  ;;  %v6620_v61 = vadd.f32 %v1545_v62, %v1188_v57  ;;  %v1203_v24 = vadd.f32 %v4912_v11, %v6432_v27  ;;  %5213 = vmatprep.mubr.msk.f32.mxu1 %vm340_vm1, %v3225_v63  ;;  %v3231_v62 = vld [vmem:[#allocation2 + $0x230] sm:$0xff] }
 0x139   : > { %5263 = vmatprep.mubr.msk.f32.mxu0 %vm340_vm1, %v3616_v58  ;;  %v1197_v51 = vpop.f32.mrf.mxu1 }
 0x13a   : > { %v1555_v17 = vpop.f32.mrf.mxu0  ;;  %v6625_v19 = vadd.f32 %v4962_v12, %v1203_v24  ;;  %v1198_v54 = vadd.f32 %v1197_v51, %v6444_v55  ;;  %v3623_v12 = vld [vmem:[#allocation2 + $0x358] sm:$0xff] }
 0x13b   : > { %v4915_v2 = vpop.f32.mrf.mxu1  ;;  %5214 = vmatmul.mubr.msk.f32.gmra.mxu1 %vm340_vm1, %v3226_v14 }
 0x13c   : > { %v4965_v0 = vpop.f32.mrf.mxu0  ;;  %5264 = vmatmul.mubr.msk.f32.gmra.mxu0 %vm340_vm1, %v3617_v15  ;;  %v6630_v27 = vadd.f32 %v1555_v17, %v1198_v54  ;;  %v1213_v20 = vadd.f32 %v4915_v2, %v6448_v48  ;;  %5216 = vmatprep.mubr.msk.f32.mxu1 %vm340_vm1, %v3227_v8 }
 0x13d   : > { %5266 = vmatprep.mubr.msk.f32.mxu0 %vm340_vm1, %v3618_v1  ;;  %v1207_v33 = vpop.f32.mrf.mxu1 }
 0x13e   : > { %v1565_v21 = vpop.f32.mrf.mxu0  ;;  %v6635_v23 = vadd.f32 %v4965_v0, %v1213_v20  ;;  %v1208_v55 = vadd.f32 %v1207_v33, %v6460_v45  ;;  %v3622_v45 = vld [vmem:[#allocation2 + $0x350] sm:$0xff] }
 0x13f   : > { %v4918_v32 = vpop.f32.mrf.mxu1  ;;  %5217 = vmatmul.mubr.msk.f32.gmra.mxu1 %vm340_vm1, %v3228_v29 }
 0x140   : > { %v4968_v26 = vpop.f32.mrf.mxu0  ;;  %5267 = vmatmul.mubr.msk.f32.gmra.mxu0 %vm340_vm1, %v3619_v3  ;;  %v6640_v39 = vadd.f32 %v1565_v21, %v1208_v55  ;;  %v1223_v48 = vadd.f32 %v4918_v32, %v6464_v50  ;;  %5219 = vmatprep.mubr.msk.f32.mxu1 %vm340_vm1, %v6292_v38 }
 0x141   : > { %5269 = vmatprep.mubr.msk.f32.mxu0 %vm340_vm1, %v6478_v6  ;;  %v1217_v40 = vpop.f32.mrf.mxu1  ;;  %v3232_v6 = vld [vmem:[#allocation2 + $0x238] sm:$0xff] }
 0x142   : > { %v1575_v35 = vpop.f32.mrf.mxu0  ;;  %v6647_v63 = vadd.f32 %v4968_v26, %v1223_v48  ;;  %v1218_v58 = vadd.f32 %v1217_v40, %v6476_v34 }
 0x143   : > { %v4921_v57 = vpop.f32.mrf.mxu1  ;;  %5220 = vmatmul.mubr.msk.f32.gmra.mxu1 %vm340_vm1, %v6304_v41 }
 0x144   : > { %v4971_v11 = vpop.f32.mrf.mxu0  ;;  %5270 = vmatmul.mubr.msk.f32.gmra.mxu0 %vm340_vm1, %v6491_v18  ;;  %v6654_v38 = vadd.f32 %v1575_v35, %v1218_v58  ;;  %v1233_v50 = vadd.f32 %v4921_v57, %v6482_v31  ;;  %5222 = vmatprep.mubr.msk.f32.mxu1 %vm340_vm1, %v3231_v62 }
 0x145   : > { %5272 = vmatprep.mubr.msk.f32.mxu0 %vm340_vm1, %v3622_v45  ;;  %v1227_v24 = vpop.f32.mrf.mxu1 }
 0x146   : > { %v1585_v34 = vpop.f32.mrf.mxu0  ;;  %v6659_v14 = vadd.f32 %v4971_v11, %v1233_v50  ;;  %v1228_v15 = vadd.f32 %v1227_v24, %v6495_v36 }
 0x147   : > { %v4924_v41 = vpop.f32.mrf.mxu1  ;;  %5223 = vmatmul.mubr.msk.f32.gmra.mxu1 %vm340_vm1, %v3232_v6 }
 0x148   : > { %v4974_v51 = vpop.f32.mrf.mxu0  ;;  %5273 = vmatmul.mubr.msk.f32.gmra.mxu0 %vm340_vm1, %v3623_v12  ;;  %v6664_v18 = vadd.f32 %v1585_v34, %v1228_v15  ;;  %v1243_v31 = vadd.f32 %v4924_v41, %v6499_v46 }
 0x149   : > { %v1237_v17 = vpop.f32.mrf.mxu1 }
 0x14a   : > { %v1595_v8 = vpop.f32.mrf.mxu0  ;;  %v6667_v1 = vadd.f32 %v4974_v51, %v1243_v31  ;;  %v1238_v54 = vadd.f32 %v1237_v17, %v6508_v52 }
 0x14b   : > { %v4979_v2 = vpop.f32.mrf.mxu1 }
 0x14c   : > { %v5029_v0 = vpop.f32.mrf.mxu0  ;;  %v6670_v20 = vadd.f32 %v1595_v8, %v1238_v54  ;;  %v1996_v36 = vadd.f32 %v4979_v2, %v6515_v22 }
 0x14d   : > { %v1836_v29 = vpop.f32.mrf.mxu1 }
 0x14e   : > { %v2227_v3 = vpop.f32.mrf.mxu0  ;;  %v6673_v33 = vadd.f32 %v5029_v0, %v1996_v36  ;;  %v1995_v21 = vadd.f32 %v1836_v29, %v6520_v5 }
 0x14f   : > { %v4982_v55 = vpop.f32.mrf.mxu1 }
 0x150   : > { %v5032_v46 = vpop.f32.mrf.mxu0  ;;  %v6676_v32 = vadd.f32 %v2227_v3, %v1995_v21  ;;  %v1998_v26 = vadd.f32 %v4982_v55, %v6525_v28 }
 0x151   : > { %v1846_v48 = vpop.f32.mrf.mxu1 }
 0x152   : > { %v2237_v52 = vpop.f32.mrf.mxu0  ;;  %v6679_v40 = vadd.f32 %v5032_v46, %v1998_v26  ;;  %v1997_v35 = vadd.f32 %v1846_v48, %v6530_v25 }
 0x153   : > { %v4985_v62 = vpop.f32.mrf.mxu1 }
 0x154   : > { %v5035_v22 = vpop.f32.mrf.mxu0  ;;  %v6682_v45 = vadd.f32 %v2237_v52, %v1997_v35  ;;  %v2000_v58 = vadd.f32 %v4985_v62, %v6535_v10 }
 0x155   : > { %v1856_v57 = vpop.f32.mrf.mxu1 }
 0x156   : > { %v2247_v5 = vpop.f32.mrf.mxu0  ;;  %v6685_v11 = vadd.f32 %v5035_v22, %v2000_v58  ;;  %v1999_v50 = vadd.f32 %v1856_v57, %v6540_v59 }
 0x157   : > { %v4988_v6 = vpop.f32.mrf.mxu1 }
 0x158   : > { %v5038_v28 = vpop.f32.mrf.mxu0  ;;  %v6688_v12 = vadd.f32 %v2247_v5, %v1999_v50  ;;  %v2002_v24 = vadd.f32 %v4988_v6, %v6545_v53 }
 0x159   : > { %v1866_v34 = vpop.f32.mrf.mxu1 }
 0x15a   : > { %v2257_v25 = vpop.f32.mrf.mxu0  ;;  %v6691_v15 = vadd.f32 %v5038_v28, %v2002_v24  ;;  %v2001_v41 = vadd.f32 %v1866_v34, %v6550_v4 }
 0x15b   : > { %v4991_v51 = vpop.f32.mrf.mxu1 }
 0x15c   : > { %v5041_v10 = vpop.f32.mrf.mxu0  ;;  %v6694_v31 = vadd.f32 %v2257_v25, %v2001_v41  ;;  %v2004_v17 = vadd.f32 %v4991_v51, %v6555_v37 }
 0x15d   : > { %v1876_v8 = vpop.f32.mrf.mxu1 }
 0x15e   : > { %v2267_v59 = vpop.f32.mrf.mxu0  ;;  %v6697_v54 = vadd.f32 %v5041_v10, %v2004_v17  ;;  %v2003_v2 = vadd.f32 %v1876_v8, %v6560_v43 }
 0x15f   : > { %v4994_v0 = vpop.f32.mrf.mxu1 }
 0x160   : > { %v5044_v53 = vpop.f32.mrf.mxu0  ;;  %v6700_v36 = vadd.f32 %v2267_v59, %v2003_v2  ;;  %v2006_v29 = vadd.f32 %v4994_v0, %v6565_v13 }
 0x161   : > { %v1886_v3 = vpop.f32.mrf.mxu1 }
 0x162   : > { %v2277_v4 = vpop.f32.mrf.mxu0  ;;  %v6703_v21 = vadd.f32 %v5044_v53, %v2006_v29  ;;  %v2005_v55 = vadd.f32 %v1886_v3, %v6570_v49 }
 0x163   : > { %v4997_v46 = vpop.f32.mrf.mxu1 }
 0x164   : > { %v5047_v37 = vpop.f32.mrf.mxu0  ;;  %v6706_v26 = vadd.f32 %v2277_v4, %v2005_v55  ;;  %v2008_v48 = vadd.f32 %v4997_v46, %v6575_v60 }
 0x165   : > { %v1896_v52 = vpop.f32.mrf.mxu1 }
 0x166   : > { %v2287_v43 = vpop.f32.mrf.mxu0  ;;  %v6709_v35 = vadd.f32 %v5047_v37, %v2008_v48  ;;  %v2007_v62 = vadd.f32 %v1896_v52, %v6580_v30 }
 0x167   : > { %v5000_v22 = vpop.f32.mrf.mxu1 }
 0x168   : > { %v5050_v13 = vpop.f32.mrf.mxu0  ;;  %v6712_v58 = vadd.f32 %v2287_v43, %v2007_v62  ;;  %v2010_v57 = vadd.f32 %v5000_v22, %v6585_v47 }
 0x169   : > { %v1906_v5 = vpop.f32.mrf.mxu1 }
 0x16a   : > { %v2297_v49 = vpop.f32.mrf.mxu0  ;;  %v6715_v50 = vadd.f32 %v5050_v13, %v2010_v57  ;;  %v2009_v6 = vadd.f32 %v1906_v5, %v6590_v42 }
 0x16b   : > { %v5003_v28 = vpop.f32.mrf.mxu1 }
 0x16c   : > { %v5053_v60 = vpop.f32.mrf.mxu0  ;;  %v6718_v24 = vadd.f32 %v2297_v49, %v2009_v6  ;;  %v2012_v34 = vadd.f32 %v5003_v28, %v6595_v16 }
 0x16d   : > { %v1916_v25 = vpop.f32.mrf.mxu1 }
 0x16e   : > { %v2307_v30 = vpop.f32.mrf.mxu0  ;;  %v6721_v41 = vadd.f32 %v5053_v60, %v2012_v34  ;;  %v2011_v51 = vadd.f32 %v1916_v25, %v6600_v7 }
 0x16f   : > { %v5006_v10 = vpop.f32.mrf.mxu1 }
 0x170   : > { %v5056_v47 = vpop.f32.mrf.mxu0  ;;  %v6724_v17 = vadd.f32 %v2307_v30, %v2011_v51  ;;  %v2014_v8 = vadd.f32 %v5006_v10, %v6605_v56 }
 0x171   : > { %v1926_v59 = vpop.f32.mrf.mxu1 }
 0x172   : > { %v2317_v42 = vpop.f32.mrf.mxu0  ;;  %v6727_v2 = vadd.f32 %v5056_v47, %v2014_v8  ;;  %v2013_v0 = vadd.f32 %v1926_v59, %v6610_v44 }
 0x173   : > { %v5009_v53 = vpop.f32.mrf.mxu1 }
 0x174   : > { %7245 = vst [vmem:[#allocation6_spill] sm:$0xff] %v6727_v2  ;;  %v5059_v16 = vpop.f32.mrf.mxu0  ;;  %v6730_v29 = vadd.f32 %v2317_v42, %v2013_v0  ;;  %v2016_v3 = vadd.f32 %v5009_v53, %v6615_v9 }
 0x175   : > { %v1936_v4 = vpop.f32.mrf.mxu1 }
 0x176   : > { %7246 = vst [vmem:[#allocation7_spill] sm:$0xff] %v6730_v29  ;;  %v2327_v7 = vpop.f32.mrf.mxu0  ;;  %v6733_v55 = vadd.f32 %v5059_v16, %v2016_v3  ;;  %v2015_v46 = vadd.f32 %v1936_v4, %v6620_v61 }
 0x177   : > { %v5012_v37 = vpop.f32.mrf.mxu1 }
 0x178   : > { %7247 = vst [vmem:[#allocation8_spill] sm:$0xff] %v6733_v55  ;;  %v5062_v56 = vpop.f32.mrf.mxu0  ;;  %v6736_v48 = vadd.f32 %v2327_v7, %v2015_v46  ;;  %v2018_v52 = vadd.f32 %v5012_v37, %v6625_v19 }
 0x179   : > { %v1946_v43 = vpop.f32.mrf.mxu1 }
 0x17a   : > { %7248 = vst [vmem:[#allocation9_spill] sm:$0xff] %v6736_v48  ;;  %v2337_v44 = vpop.f32.mrf.mxu0  ;;  %v6739_v62 = vadd.f32 %v5062_v56, %v2018_v52  ;;  %v2017_v22 = vadd.f32 %v1946_v43, %v6630_v27 }
 0x17b   : > { %v5015_v13 = vpop.f32.mrf.mxu1 }
 0x17c   : > { %7249 = vst [vmem:[#allocation10_spill] sm:$0xff] %v6739_v62  ;;  %v5065_v9 = vpop.f32.mrf.mxu0  ;;  %v6742_v57 = vadd.f32 %v2337_v44, %v2017_v22  ;;  %v2020_v5 = vadd.f32 %v5015_v13, %v6635_v23 }
 0x17d   : > { %v1956_v49 = vpop.f32.mrf.mxu1 }
 0x17e   : > { %7250 = vst [vmem:[#allocation11_spill] sm:$0xff] %v6742_v57  ;;  %v2347_v61 = vpop.f32.mrf.mxu0  ;;  %v6745_v6 = vadd.f32 %v5065_v9, %v2020_v5  ;;  %v2019_v28 = vadd.f32 %v1956_v49, %v6640_v39 }
 0x17f   : > { %v5018_v60 = vpop.f32.mrf.mxu1 }
 0x180   : > { %7251 = vst [vmem:[#allocation12_spill] sm:$0xff] %v6745_v6  ;;  %v5068_v19 = vpop.f32.mrf.mxu0  ;;  %v6748_v34 = vadd.f32 %v2347_v61, %v2019_v28  ;;  %v2022_v25 = vadd.f32 %v5018_v60, %v6647_v63 }
 0x181   : > { %v1966_v30 = vpop.f32.mrf.mxu1 }
 0x182   : > { %7252 = vst [vmem:[#allocation13_spill] sm:$0xff] %v6748_v34  ;;  %v2357_v27 = vpop.f32.mrf.mxu0  ;;  %v6751_v51 = vadd.f32 %v5068_v19, %v2022_v25  ;;  %v2021_v10 = vadd.f32 %v1966_v30, %v6654_v38 }
 0x183   : > { %v5021_v47 = vpop.f32.mrf.mxu1 }
 0x184   : > { %7253 = vst [vmem:[#allocation14_spill] sm:$0xff] %v6751_v51  ;;  %v5071_v23 = vpop.f32.mrf.mxu0  ;;  %v6754_v8 = vadd.f32 %v2357_v27, %v2021_v10  ;;  %v2024_v59 = vadd.f32 %v5021_v47, %v6659_v14 }
 0x185   : > { %v1976_v42 = vpop.f32.mrf.mxu1 }
 0x186   : > { %7254 = vst [vmem:[#allocation15_spill] sm:$0xff] %v6754_v8  ;;  %v2367_v39 = vpop.f32.mrf.mxu0  ;;  %v6757_v0 = vadd.f32 %v5071_v23, %v2024_v59  ;;  %v2023_v53 = vadd.f32 %v1976_v42, %v6664_v18 }
 0x187   : > { %v5024_v16 = vpop.f32.mrf.mxu1 }
 0x188   : > { %7255 = vst [vmem:[#allocation16_spill] sm:$0xff] %v6757_v0  ;;  %v5074_v63 = vpop.f32.mrf.mxu0  ;;  %v6760_v3 = vadd.f32 %v2367_v39, %v2023_v53  ;;  %v2026_v4 = vadd.f32 %v5024_v16, %v6667_v1 }
 0x189   : > { %v1986_v7 = vpop.f32.mrf.mxu1 }
 0x18a   : > { %7256 = vst [vmem:[#allocation17_spill] sm:$0xff] %v6760_v3  ;;  %v2377_v38 = vpop.f32.mrf.mxu0  ;;  %v6763_v46 = vadd.f32 %v5074_v63, %v2026_v4  ;;  %v2025_v37 = vadd.f32 %v1986_v7, %v6670_v20 }
 0x18b   : > { %v5079_v56 = vpop.f32.mrf.mxu1 }
 0x18c   : > { %7257 = vst [vmem:[#allocation18_spill] sm:$0xff] %v6763_v46  ;;  %v6766_v14 = vpop.f32.mrf.mxu0  ;;  %v6768_v52 = vadd.f32 %v2377_v38, %v2025_v37 }
 0x18d   : > { %v2618_v43 = vpop.f32.mrf.mxu1 }
 0x18e   : > { %7258 = vst [vmem:[#allocation19_spill] sm:$0xff] %v6768_v52  ;;  %v6770_v44 = vpop.f32.mrf.mxu0 }
 0x18f   : > { %v6772_v18 = vpop.f32.mrf.mxu1 }
 0x190   : > { %v6774_v22 = vpop.f32.mrf.mxu0 }
 0x191   : > { %v6776_v13 = vpop.f32.mrf.mxu1 }
 0x192   : > { %v6778_v1 = vpop.f32.mrf.mxu0 }
 0x193   : > { %v6780_v9 = vpop.f32.mrf.mxu1 }
 0x194   : > { %v6782_v5 = vpop.f32.mrf.mxu0 }
 0x195   : > { %v6784_v20 = vpop.f32.mrf.mxu1 }
 0x196   : > { %v6786_v49 = vpop.f32.mrf.mxu0 }
 0x197   : > { %v6788_v61 = vpop.f32.mrf.mxu1 }
 0x198   : > { %v6790_v28 = vpop.f32.mrf.mxu0 }
 0x199   : > { %v6792_v60 = vpop.f32.mrf.mxu1 }
 0x19a   : > { %v6794_v19 = vpop.f32.mrf.mxu0 }
 0x19b   : > { %v6796_v25 = vpop.f32.mrf.mxu1 }
 0x19c   : > { %v6798_v30 = vpop.f32.mrf.mxu0 }
 0x19d   : > { %v6800_v27 = vpop.f32.mrf.mxu1 }
 0x19e   : > { %v6802_v10 = vpop.f32.mrf.mxu0 }
 0x19f   : > { %v6804_v47 = vpop.f32.mrf.mxu1 }
 0x1a0   : > { %v6806_v23 = vpop.f32.mrf.mxu0 }
 0x1a1   : > { %v6808_v59 = vpop.f32.mrf.mxu1 }
 0x1a2   : > { %v6810_v42 = vpop.f32.mrf.mxu0 }
 0x1a3   : > { %v6812_v39 = vpop.f32.mrf.mxu1 }
 0x1a4   : > { %v6814_v53 = vpop.f32.mrf.mxu0 }
 0x1a5   : > { %v6816_v16 = vpop.f32.mrf.mxu1 }
 0x1a6   : > { %v6818_v63 = vpop.f32.mrf.mxu0 }
 0x1a7   : > { %v6820_v4 = vpop.f32.mrf.mxu1 }
 0x1a8   : > { %v6822_v7 = vpop.f32.mrf.mxu0 }
 0x1a9   : > { %v6824_v38 = vpop.f32.mrf.mxu1 }
 0x1aa   : > { %v6826_v37 = vpop.f32.mrf.mxu0 }
 0x1ab   : > { %v6828_v52 = vpop.f32.mrf.mxu1 }
 0x1ac   : > { %v6830_v46 = vpop.f32.mrf.mxu0 }
 0x1ad   : > { %v6832_v3 = vpop.f32.mrf.mxu1 }
 0x1ae   : > { %v6834_v0 = vpop.f32.mrf.mxu0 }
 0x1af   : > { %7259 = vst [vmem:[#allocation20_spill] sm:$0xff] %v6834_v0  ;;  %v6836_v8 = vpop.f32.mrf.mxu1 }
 0x1b0   : > { %7260 = vst [vmem:[#allocation21_spill] sm:$0xff] %v6836_v8  ;;  %v6838_v51 = vpop.f32.mrf.mxu0 }
 0x1b1   : > { %7261 = vst [vmem:[#allocation22_spill] sm:$0xff] %v6838_v51  ;;  %v6840_v34 = vpop.f32.mrf.mxu1 }
 0x1b2   : > { %7262 = vst [vmem:[#allocation23_spill] sm:$0xff] %v6840_v34  ;;  %v6842_v6 = vpop.f32.mrf.mxu0 }
 0x1b3   : > { %7263 = vst [vmem:[#allocation24_spill] sm:$0xff] %v6842_v6  ;;  %v6844_v57 = vpop.f32.mrf.mxu1 }
 0x1b4   : > { %7264 = vst [vmem:[#allocation25_spill] sm:$0xff] %v6844_v57  ;;  %v6846_v62 = vpop.f32.mrf.mxu0 }
 0x1b5   : > { %7265 = vst [vmem:[#allocation26_spill] sm:$0xff] %v6846_v62  ;;  %v6848_v48 = vpop.f32.mrf.mxu1 }
 0x1b6   : > { %7266 = vst [vmem:[#allocation27_spill] sm:$0xff] %v6848_v48  ;;  %v6850_v55 = vpop.f32.mrf.mxu0 }
 0x1b7   : > { %7267 = vst [vmem:[#allocation28_spill] sm:$0xff] %v6850_v55  ;;  %v6852_v29 = vpop.f32.mrf.mxu1 }
 0x1b8   : > { %v6854_v2 = vpop.f32.mrf.mxu0 }
 0x1b9   : > { %7268 = vst [vmem:[#allocation29_spill] sm:$0xff] %v6854_v2  ;;  %v6856_v0 = vpop.f32.mrf.mxu1 }
 0x1ba   : > { %7269 = vst [vmem:[#allocation30_spill] sm:$0xff] %v6856_v0  ;;  %v6858_v8 = vpop.f32.mrf.mxu0 }
 0x1bb   : > { %7270 = vst [vmem:[#allocation31_spill] sm:$0xff] %v6858_v8  ;;  %v6860_v51 = vpop.f32.mrf.mxu1 }
 0x1bc   : > { %7271 = vst [vmem:[#allocation32_spill] sm:$0xff] %v6860_v51  ;;  %v6862_v34 = vpop.f32.mrf.mxu0 }
 0x1bd   : > { %7272 = vst [vmem:[#allocation33_spill] sm:$0xff] %v6862_v34  ;;  %v6864_v6 = vpop.f32.mrf.mxu1 }
 0x1be   : > { %7273 = vst [vmem:[#allocation34_spill] sm:$0xff] %v6864_v6  ;;  %v6866_v57 = vpop.f32.mrf.mxu0  ;;  %v2778_v6 = vadd.f32 %v5079_v56, %v6673_v33  ;;  %v2779_v56 = vadd.f32 %v6776_v13, %v6682_v45  ;;  %v2781_v45 = vadd.f32 %v6784_v20, %v6688_v12 }
 0x1bf   : > { %7274 = vst [vmem:[#allocation35_spill] sm:$0xff] %v6866_v57  ;;  %v6868_v62 = vpop.f32.mrf.mxu1 }
 0x1c0   : > { %7275 = vst [vmem:[#allocation36_spill] sm:$0xff] %v6868_v62  ;;  %v6870_v48 = vpop.f32.mrf.mxu0 }
 0x1c1   : > { %7276 = vst [vmem:[#allocation37_spill] sm:$0xff] %v6870_v48  ;;  %v6872_v55 = vpop.f32.mrf.mxu1  ;;  %v2777_v48 = vadd.f32 %v2618_v43, %v6676_v32  ;;  %v2782_v32 = vadd.f32 %v6780_v9, %v6685_v11  ;;  %v6906_v43 = vld [vmem:[%s7151_s3] ss:$0 sm:$0xff]  ;;  %v3170_v11 = vadd.f32 %v6778_v1, %v2779_v56  ;;  %v2783_v1 = vadd.f32 %v6792_v60, %v6694_v31 }
 0x1c2   : > { %7277 = vst [vmem:[#allocation38_spill] sm:$0xff] %v6872_v55  ;;  %v6874_v2 = vpop.f32.mrf.mxu0 }
 0x1c3   : > { %7278 = vst [vmem:[#allocation39_spill] sm:$0xff] %v6874_v2  ;;  %v6876_v0 = vpop.f32.mrf.mxu1  ;;  %v3168_v33 = vadd.f32 %v6770_v44, %v2777_v48 }
 0x1c4   : > { %7279 = vst [vmem:[#allocation40_spill] sm:$0xff] %v6876_v0  ;;  %v6878_v8 = vpop.f32.mrf.mxu0  ;;  %v3169_v0 = vadd.f32 %v6766_v14, %v2778_v6 }
 0x1c5   : > { %7280 = vst [vmem:[#allocation41_spill] sm:$0xff] %v6878_v8  ;;  %v6880_v51 = vpop.f32.mrf.mxu1  ;;  %v2780_v8 = vadd.f32 %v6772_v18, %v6679_v40 }
 0x1c6   : > { %7281 = vst [vmem:[#allocation42_spill] sm:$0xff] %v6880_v51  ;;  %v6882_v34 = vpop.f32.mrf.mxu0 }
 0x1c7   : > { %7282 = vst [vmem:[#allocation43_spill] sm:$0xff] %v6882_v34  ;;  %v6885_v57 = vpop.f32.mrf.mxu1  ;;  %v3171_v40 = vadd.f32 %v6774_v22, %v2780_v8  ;;  %v2784_v8 = vadd.f32 %v6788_v61, %v6691_v15 }
 0x1c8   : > { %v6887_v62 = vpop.f32.mrf.mxu0 }
 0x1c9   : > { %7283 = vst [vmem:[#allocation44_spill] sm:$0xff] %v6887_v62  ;;  %v6890_v55 = vpop.f32.mrf.mxu1 }
 0x1ca   : > { %v6892_v2 = vpop.f32.mrf.mxu0 }
 0x1cb   : > { %7284 = vst [vmem:[#allocation45_spill] sm:$0xff] %v6892_v2  ;;  %v5179_v51 = vpop.f32.mrf.mxu1  ;;  %v3173_v2 = vadd.f32 %v6782_v5, %v2782_v32 }
 0x1cc   : > { %v5229_v34 = vpop.f32.mrf.mxu0  ;;  %v3560_v62 = vadd.f32 %v5179_v51, %v3169_v0 }
 0x1cd   : > { %v3400_v6 = vpop.f32.mrf.mxu1 }
 0x1ce   : > { %v3791_v14 = vpop.f32.mrf.mxu0  ;;  %v3951_v18 = vadd.f32 %v5229_v34, %v3560_v62  ;;  %v3559_v48 = vadd.f32 %v3400_v6, %v3168_v33  ;;  %v3172_v6 = vadd.f32 %v6786_v49, %v2781_v45  ;;  %v2786_v49 = vadd.f32 %v6796_v25, %v6697_v54 }
 0x1cf   : > { %v5182_v51 = vpop.f32.mrf.mxu1 }
 0x1d0   : > { %v5232_v0 = vpop.f32.mrf.mxu0  ;;  %v3990_v44 = vadd.f32 %v6906_v43, %v3951_v18  ;;  %v3950_v13 = vadd.f32 %v3791_v14, %v3559_v48  ;;  %v3562_v9 = vadd.f32 %v5182_v51, %v3171_v40  ;;  %v3175_v40 = vadd.f32 %v6790_v28, %v2784_v8 }
 0x1d1   : > { %v3410_v22 = vpop.f32.mrf.mxu1  ;;  %v2788_v8 = vadd.f32 %v6804_v47, %v6703_v21 }
 0x1d2   : > { %v3801_v62 = vpop.f32.mrf.mxu0  ;;  %v4022_v34 = vmax.f32 %v3990_v44, 0.0  ;;  %v3989_v33 = vadd.f32 %v6906_v43, %v3950_v13  ;;  %v3953_v12 = vadd.f32 %v5232_v0, %v3562_v9  ;;  %v3561_v20 = vadd.f32 %v3410_v22, %v3170_v11 }
 0x1d3   : > { %v5185_v56 = vpop.f32.mrf.mxu1  ;;  %v3174_v0 = vadd.f32 %v6794_v19, %v2783_v1  ;;  %v3177_v9 = vadd.f32 %v6798_v30, %v2786_v49 }
 0x1d4   : > { %v5235_v14 = vpop.f32.mrf.mxu0  ;;  %4055 = vst.msk [vmem:[%s6922_s26 + $0x8] sm:$0xff] %vm4053_vm2, %v4022_v34  ;;  %v4021_v15 = vmax.f32 %v3989_v33, 0.0  ;;  %v3992_v5 = vadd.f32 %v6906_v43, %v3953_v12  ;;  %v3952_v61 = vadd.f32 %v3801_v62, %v3561_v20  ;;  %v3564_v32 = vadd.f32 %v5185_v56, %v3173_v2 }
 0x1d5   : > { %v3420_v31 = vpop.f32.mrf.mxu1  ;;  %v2785_v2 = vadd.f32 %v6800_v27, %v6700_v36  ;;  %v2787_v12 = vadd.f32 %v6808_v59, %v6706_v26  ;;  %v3179_v56 = vadd.f32 %v6806_v23, %v2788_v8 }
 0x1d6   : > { %v3811_v60 = vpop.f32.mrf.mxu0  ;;  %4054 = vst.msk [vmem:[%s6922_s26] sm:$0xff] %vm4053_vm2, %v4021_v15  ;;  %v4024_v18 = vmax.f32 %v3992_v5, 0.0  ;;  %v3991_v48 = vadd.f32 %v6906_v43, %v3952_v61  ;;  %v3955_v45 = vadd.f32 %v5235_v14, %v3564_v32  ;;  %v3563_v51 = vadd.f32 %v3420_v31, %v3172_v6 }
 0x1d7   : > { %v5188_v11 = vpop.f32.mrf.mxu1  ;;  %v3176_v33 = vadd.f32 %v6802_v10, %v2785_v2  ;;  %v2790_v14 = vadd.f32 %v6812_v39, %v6709_v35  ;;  %v3178_v32 = vadd.f32 %v6810_v42, %v2787_v12  ;;  %v7285_v12 = vld [vmem:[#allocation6_spill] sm:$0xff] }
 0x1d8   : > { %v5238_v28 = vpop.f32.mrf.mxu0  ;;  %4057 = vst.msk [vmem:[%s6922_s26 + $0x18] sm:$0xff] %vm4053_vm2, %v4024_v18  ;;  %v4023_v54 = vmax.f32 %v3991_v48, 0.0  ;;  %v3994_v25 = vadd.f32 %v6906_v43, %v3955_v45  ;;  %v3954_v44 = vadd.f32 %v3811_v60, %v3563_v51  ;;  %v3566_v13 = vadd.f32 %v5188_v11, %v3175_v40 }
 0x1d9   : > { %v3430_v22 = vpop.f32.mrf.mxu1  ;;  %v2789_v40 = vadd.f32 %v6816_v16, %v6712_v58  ;;  %v3181_v18 = vadd.f32 %v6814_v53, %v2790_v14  ;;  %v2792_v48 = vadd.f32 %v6820_v4, %v6715_v50  ;;  %v2791_v11 = vadd.f32 %v6824_v38, %v6718_v24  ;;  %v7288_v14 = vld [vmem:[#allocation7_spill] sm:$0xff] }
 0x1da   : > { %v3821_v19 = vpop.f32.mrf.mxu0  ;;  %4056 = vst.msk [vmem:[%s6922_s26 + $0x10] sm:$0xff] %vm4053_vm2, %v4023_v54  ;;  %v4026_v36 = vmax.f32 %v3994_v25, 0.0  ;;  %v3993_v27 = vadd.f32 %v6906_v43, %v3954_v44  ;;  %v3957_v62 = vadd.f32 %v5238_v28, %v3566_v13  ;;  %v3565_v34 = vadd.f32 %v3430_v22, %v3174_v0 }
 0x1db   : > { %v5191_v20 = vpop.f32.mrf.mxu1  ;;  %v3180_v2 = vadd.f32 %v6818_v63, %v2789_v40  ;;  %v3183_v44 = vadd.f32 %v6822_v7, %v2792_v48  ;;  %v2794_v13 = vadd.f32 %v6828_v52, %v6721_v41  ;;  %v7290_v40 = vld [vmem:[#allocation22_spill] sm:$0xff] }
 0x1dc   : > { %v5241_v30 = vpop.f32.mrf.mxu0  ;;  %4059 = vst.msk [vmem:[%s6922_s26 + $0x28] sm:$0xff] %vm4053_vm2, %v4026_v36  ;;  %v4025_v21 = vmax.f32 %v3993_v27, 0.0  ;;  %v3996_v47 = vadd.f32 %v6906_v43, %v3957_v62  ;;  %v3956_v6 = vadd.f32 %v3821_v19, %v3565_v34  ;;  %v3568_v1 = vadd.f32 %v5191_v20, %v3177_v9  ;;  %v7286_v20 = vld [vmem:[#allocation21_spill] sm:$0xff] }
 0x1dd   : > { %v3440_v15 = vpop.f32.mrf.mxu1  ;;  %v3182_v19 = vadd.f32 %v6826_v37, %v2791_v11  ;;  %v2793_v36 = vadd.f32 %v6832_v3, %v6724_v17 }
 0x1de   : > { %v3831_v10 = vpop.f32.mrf.mxu0  ;;  %4058 = vst.msk [vmem:[%s6922_s26 + $0x20] sm:$0xff] %vm4053_vm2, %v4025_v21  ;;  %v4028_v26 = vmax.f32 %v3996_v47, 0.0  ;;  %v3995_v59 = vadd.f32 %v6906_v43, %v3956_v6  ;;  %v3959_v5 = vadd.f32 %v5241_v30, %v3568_v1  ;;  %v3567_v61 = vadd.f32 %v3440_v15, %v3176_v33  ;;  %v7287_v1 = vld [vmem:[#allocation20_spill] sm:$0xff]  ;;  %v7289_v15 = vld [vmem:[#allocation23_spill] sm:$0xff] }
 0x1df   : > { %v5194_v49 = vpop.f32.mrf.mxu1  ;;  %v3185_v33 = vadd.f32 %v6830_v46, %v2794_v13  ;;  %v2796_v30 = vadd.f32 %v7286_v20, %v7285_v12  ;;  %v7297_v13 = vld [vmem:[#allocation10_spill] sm:$0xff] }
 0x1e0   : > { %v5244_v23 = vpop.f32.mrf.mxu0  ;;  %4061 = vst.msk [vmem:[%s6922_s26 + $0x38] sm:$0xff] %vm4053_vm2, %v4028_v26  ;;  %v4027_v35 = vmax.f32 %v3995_v59, 0.0  ;;  %v3998_v39 = vadd.f32 %v6906_v43, %v3959_v5  ;;  %v3958_v31 = vadd.f32 %v3831_v10, %v3567_v61  ;;  %v3570_v60 = vadd.f32 %v5194_v49, %v3179_v56 }
 0x1e1   : > { %v3450_v45 = vpop.f32.mrf.mxu1  ;;  %v3184_v56 = vadd.f32 %v7287_v1, %v2793_v36  ;;  %v2795_v10 = vadd.f32 %v7289_v15, %v7288_v14  ;;  %v3187_v49 = vadd.f32 %v7290_v40, %v2796_v30  ;;  %v7298_v36 = vld [vmem:[#allocation28_spill] sm:$0xff]  ;;  %v7301_v30 = vld [vmem:[#allocation29_spill] sm:$0xff] }
 0x1e2   : > { %v3841_v42 = vpop.f32.mrf.mxu0  ;;  %4060 = vst.msk [vmem:[%s6922_s26 + $0x30] sm:$0xff] %vm4053_vm2, %v4027_v35  ;;  %v4030_v58 = vmax.f32 %v3998_v39, 0.0  ;;  %v3997_v16 = vadd.f32 %v6906_v43, %v3958_v31  ;;  %v3961_v51 = vadd.f32 %v5244_v23, %v3570_v60  ;;  %v3569_v0 = vadd.f32 %v3450_v45, %v3178_v32  ;;  %v7291_v23 = vld [vmem:[#allocation8_spill] sm:$0xff]  ;;  %v7292_v35 = vld [vmem:[#allocation25_spill] sm:$0xff] }
 0x1e3   : > { %v5197_v28 = vpop.f32.mrf.mxu1  ;;  %v2798_v39 = vadd.f32 %v7292_v35, %v7291_v23 }
 0x1e4   : > { %v5247_v53 = vpop.f32.mrf.mxu0  ;;  %4063 = vst.msk [vmem:[%s6922_s26 + $0x48] sm:$0xff] %vm4053_vm2, %v4030_v58  ;;  %v4029_v50 = vmax.f32 %v3997_v16, 0.0  ;;  %v4000_v4 = vadd.f32 %v6906_v43, %v3961_v51  ;;  %v3960_v54 = vadd.f32 %v3841_v42, %v3569_v0  ;;  %v3572_v25 = vadd.f32 %v5197_v28, %v3181_v18  ;;  %v7293_v58 = vld [vmem:[#allocation24_spill] sm:$0xff]  ;;  %v7294_v51 = vld [vmem:[#allocation9_spill] sm:$0xff]  ;;  %v7295_v0 = vld [vmem:[#allocation27_spill] sm:$0xff] }
 0x1e5   : > { %v3460_v9 = vpop.f32.mrf.mxu1  ;;  %v3186_v16 = vadd.f32 %v7293_v58, %v2795_v10  ;;  %v7304_v10 = vld [vmem:[#allocation31_spill] sm:$0xff] }
 0x1e6   : > { %v3851_v63 = vpop.f32.mrf.mxu0  ;;  %4062 = vst.msk [vmem:[%s6922_s26 + $0x40] sm:$0xff] %vm4053_vm2, %v4029_v50  ;;  %v4032_v24 = vmax.f32 %v4000_v4, 0.0  ;;  %v3999_v38 = vadd.f32 %v6906_v43, %v3960_v54  ;;  %v3963_v8 = vadd.f32 %v5247_v53, %v3572_v25  ;;  %v3571_v22 = vadd.f32 %v3460_v9, %v3180_v2  ;;  %v7296_v25 = vld [vmem:[#allocation26_spill] sm:$0xff] }
 0x1e7   : > { %v5200_v27 = vpop.f32.mrf.mxu1  ;;  %v2797_v2 = vadd.f32 %v7295_v0, %v7294_v51  ;;  %v2800_v9 = vadd.f32 %v6852_v29, %v7297_v13 }
 0x1e8   : > { %v5250_v7 = vpop.f32.mrf.mxu0  ;;  %4065 = vst.msk [vmem:[%s6922_s26 + $0x58] sm:$0xff] %vm4053_vm2, %v4032_v24  ;;  %v4031_v41 = vmax.f32 %v3999_v38, 0.0  ;;  %v4002_v52 = vadd.f32 %v6906_v43, %v3963_v8  ;;  %v3962_v62 = vadd.f32 %v3851_v63, %v3571_v22  ;;  %v3574_v34 = vadd.f32 %v5200_v27, %v3183_v44 }
 0x1e9   : > { %v3470_v21 = vpop.f32.mrf.mxu1  ;;  %v3189_v44 = vadd.f32 %v7296_v25, %v2798_v39  ;;  %v3188_v27 = vadd.f32 %v7298_v36, %v2797_v2  ;;  %v7307_v39 = vld [vmem:[#allocation33_spill] sm:$0xff]  ;;  %v7310_v2 = vld [vmem:[#allocation35_spill] sm:$0xff] }
 0x1ea   : > { %v3861_v37 = vpop.f32.mrf.mxu0  ;;  %4064 = vst.msk [vmem:[%s6922_s26 + $0x50] sm:$0xff] %vm4053_vm2, %v4031_v41  ;;  %v4034_v17 = vmax.f32 %v4002_v52, 0.0  ;;  %v4001_v3 = vadd.f32 %v6906_v43, %v3962_v62  ;;  %v3965_v47 = vadd.f32 %v5250_v7, %v3574_v34  ;;  %v3573_v6 = vadd.f32 %v3470_v21, %v3182_v19  ;;  %v7299_v7 = vld [vmem:[#allocation11_spill] sm:$0xff]  ;;  %v7300_v41 = vld [vmem:[#allocation30_spill] sm:$0xff] }
 0x1eb   : > { %v5203_v26 = vpop.f32.mrf.mxu1  ;;  %v2799_v52 = vadd.f32 %v7300_v41, %v7299_v7  ;;  %v3191_v21 = vadd.f32 %v7301_v30, %v2800_v9 }
 0x1ec   : > { %v5253_v46 = vpop.f32.mrf.mxu0  ;;  %4067 = vst.msk [vmem:[%s6922_s26 + $0x68] sm:$0xff] %vm4053_vm2, %v4034_v17  ;;  %v4033_v59 = vmax.f32 %v4001_v3, 0.0  ;;  %v4004_v5 = vadd.f32 %v6906_v43, %v3965_v47  ;;  %v3964_v61 = vadd.f32 %v3861_v37, %v3573_v6  ;;  %v3576_v32 = vadd.f32 %v5203_v26, %v3185_v33  ;;  %v7302_v37 = vld [vmem:[#allocation12_spill] sm:$0xff] }
 0x1ed   : > { %v3480_v31 = vpop.f32.mrf.mxu1  ;;  %v7303_v17 = vld [vmem:[#allocation32_spill] sm:$0xff]  ;;  %v3190_v26 = vadd.f32 %v7304_v10, %v2799_v52 }
 0x1ee   : > { %v3871_v60 = vpop.f32.mrf.mxu0  ;;  %4066 = vst.msk [vmem:[%s6922_s26 + $0x60] sm:$0xff] %vm4053_vm2, %v4033_v59  ;;  %v4036_v18 = vmax.f32 %v4004_v5, 0.0  ;;  %v4003_v48 = vadd.f32 %v6906_v43, %v3964_v61  ;;  %v3967_v45 = vadd.f32 %v5253_v46, %v3576_v32  ;;  %v3575_v42 = vadd.f32 %v3480_v31, %v3184_v56  ;;  %v7305_v46 = vld [vmem:[#allocation13_spill] sm:$0xff]  ;;  %v7306_v59 = vld [vmem:[#allocation34_spill] sm:$0xff] }
 0x1ef   : > { %v5206_v11 = vpop.f32.mrf.mxu1  ;;  %v2802_v3 = vadd.f32 %v7303_v17, %v7302_v37  ;;  %v2801_v5 = vadd.f32 %v7306_v59, %v7305_v46 }
 0x1f0   : > { %v5256_v28 = vpop.f32.mrf.mxu0  ;;  %4069 = vst.msk [vmem:[%s6922_s26 + $0x78] sm:$0xff] %vm4053_vm2, %v4036_v18  ;;  %v4035_v53 = vmax.f32 %v4003_v48, 0.0  ;;  %v4006_v50 = vadd.f32 %v6906_v43, %v3967_v45  ;;  %v3966_v4 = vadd.f32 %v3871_v60, %v3575_v42  ;;  %v3578_v54 = vadd.f32 %v5206_v11, %v3187_v49  ;;  %v7308_v60 = vld [vmem:[#allocation14_spill] sm:$0xff]  ;;  %v7309_v18 = vld [vmem:[#allocation36_spill] sm:$0xff] }
 0x1f1   : > { %v3490_v63 = vpop.f32.mrf.mxu1  ;;  %v3193_v31 = vadd.f32 %v7307_v39, %v2802_v3  ;;  %v2804_v48 = vadd.f32 %v7309_v18, %v7308_v60  ;;  %v3192_v11 = vadd.f32 %v7310_v2, %v2801_v5  ;;  %v7321_v5 = vld [vmem:[#allocation43_spill] sm:$0xff]  ;;  %v7323_v60 = vld [vmem:[#allocation44_spill] sm:$0xff] }
 0x1f2   : > { %v3881_v24 = vpop.f32.mrf.mxu0  ;;  %4068 = vst.msk [vmem:[%s6922_s26 + $0x70] sm:$0xff] %vm4053_vm2, %v4035_v53  ;;  %v4038_v38 = vmax.f32 %v4006_v50, 0.0  ;;  %v4005_v8 = vadd.f32 %v6906_v43, %v3966_v4  ;;  %v3969_v22 = vadd.f32 %v5256_v28, %v3578_v54  ;;  %v3577_v19 = vadd.f32 %v3490_v63, %v3186_v16  ;;  %v7311_v28 = vld [vmem:[#allocation15_spill] sm:$0xff]  ;;  %v7312_v53 = vld [vmem:[#allocation38_spill] sm:$0xff]  ;;  %v7313_v63 = vld [vmem:[#allocation37_spill] sm:$0xff] }
 0x1f3   : > { %v5209_v62 = vpop.f32.mrf.mxu1  ;;  %v2803_v50 = vadd.f32 %v7312_v53, %v7311_v28 }
 0x1f4   : > { %v5259_v34 = vpop.f32.mrf.mxu0  ;;  %4071 = vst.msk [vmem:[%s6922_s26 + $0x88] sm:$0xff] %vm4053_vm2, %v4038_v38  ;;  %v4037_v29 = vmax.f32 %v4005_v8, 0.0  ;;  %v4008_v33 = vadd.f32 %v6906_v43, %v3969_v22  ;;  %v3968_v12 = vadd.f32 %v3881_v24, %v3577_v19  ;;  %v3580_v20 = vadd.f32 %v5209_v62, %v3189_v44  ;;  %v7314_v38 = vld [vmem:[#allocation16_spill] sm:$0xff]  ;;  %v7316_v62 = vld [vmem:[#allocation39_spill] sm:$0xff] }
 0x1f5   : > { %v3500_v47 = vpop.f32.mrf.mxu1  ;;  %v3195_v24 = vadd.f32 %v7313_v63, %v2804_v48  ;;  %v7315_v8 = vld [vmem:[#allocation40_spill] sm:$0xff] }
 0x1f6   : > { %v3891_v6 = vpop.f32.mrf.mxu0  ;;  %4070 = vst.msk [vmem:[%s6922_s26 + $0x80] sm:$0xff] %vm4053_vm2, %v4037_v29  ;;  %v4040_v1 = vmax.f32 %v4008_v33, 0.0  ;;  %v4007_v56 = vadd.f32 %v6906_v43, %v3968_v12  ;;  %v3971_v14 = vadd.f32 %v5259_v34, %v3580_v20  ;;  %v3579_v15 = vadd.f32 %v3500_v47, %v3188_v27  ;;  %v7317_v29 = vld [vmem:[#allocation17_spill] sm:$0xff]  ;;  %v7318_v33 = vld [vmem:[#allocation42_spill] sm:$0xff] }
 0x1f7   : > { %v5212_v61 = vpop.f32.mrf.mxu1  ;;  %v2806_v22 = vadd.f32 %v7315_v8, %v7314_v38  ;;  %v3194_v34 = vadd.f32 %v7316_v62, %v2803_v50  ;;  %v2805_v12 = vadd.f32 %v7318_v33, %v7317_v29  ;;  %v7319_v47 = vld [vmem:[#allocation41_spill] sm:$0xff] }
 0x1f8   : > { %v5262_v32 = vpop.f32.mrf.mxu0  ;;  %4073 = vst.msk [vmem:[%s6922_s26 + $0x98] sm:$0xff] %vm4053_vm2, %v4040_v1  ;;  %v4039_v40 = vmax.f32 %v4007_v56, 0.0  ;;  %v4010_v49 = vadd.f32 %v6906_v43, %v3971_v14  ;;  %v3970_v23 = vadd.f32 %v3891_v6, %v3579_v15  ;;  %v3582_v35 = vadd.f32 %v5212_v61, %v3191_v21  ;;  %v7320_v1 = vld [vmem:[#allocation18_spill] sm:$0xff] }
 0x1f9   : > { %v3510_v45 = vpop.f32.mrf.mxu1  ;;  %v3197_v6 = vadd.f32 %v7319_v47, %v2806_v22  ;;  %v2808_v56 = vadd.f32 %v6885_v57, %v7320_v1  ;;  %v3196_v61 = vadd.f32 %v7321_v5, %v2805_v12 }
 0x1fa   : > { %v3901_v42 = vpop.f32.mrf.mxu0  ;;  %4072 = vst.msk [vmem:[%s6922_s26 + $0x90] sm:$0xff] %vm4053_vm2, %v4039_v40  ;;  %v4042_v58 = vmax.f32 %v4010_v49, 0.0  ;;  %v4009_v16 = vadd.f32 %v6906_v43, %v3970_v23  ;;  %v3973_v51 = vadd.f32 %v5262_v32, %v3582_v35  ;;  %v3581_v0 = vadd.f32 %v3510_v45, %v3190_v26  ;;  %v7322_v32 = vld [vmem:[#allocation19_spill] sm:$0xff] }
 0x1fb   : > { %v5215_v4 = vpop.f32.mrf.mxu1  ;;  %v2807_v40 = vadd.f32 %v6890_v55, %v7322_v32  ;;  %v3199_v18 = vadd.f32 %v7323_v60, %v2808_v56 }
 0x1fc   : > { %v5265_v54 = vpop.f32.mrf.mxu0  ;;  %4075 = vst.msk [vmem:[%s6922_s26 + $0xa8] sm:$0xff] %vm4053_vm2, %v4042_v58  ;;  %v4041_v25 = vmax.f32 %v4009_v16, 0.0  ;;  %v4012_v44 = vadd.f32 %v6906_v43, %v3973_v51  ;;  %v3972_v13 = vadd.f32 %v3901_v42, %v3581_v0  ;;  %v3584_v9 = vadd.f32 %v5215_v4, %v3193_v31  ;;  %v7324_v51 = vld [vmem:[#allocation45_spill] sm:$0xff] }
 0x1fd   : > { %v3520_v19 = vpop.f32.mrf.mxu1  ;;  %v3198_v0 = vadd.f32 %v7324_v51, %v2807_v40 }
 0x1fe   : > { %v3911_v36 = vpop.f32.mrf.mxu0  ;;  %4074 = vst.msk [vmem:[%s6922_s26 + $0xa0] sm:$0xff] %vm4053_vm2, %v4041_v25  ;;  %v4044_v27 = vmax.f32 %v4012_v44, 0.0  ;;  %v4011_v7 = vadd.f32 %v6906_v43, %v3972_v13  ;;  %v3975_v41 = vadd.f32 %v5265_v54, %v3584_v9  ;;  %v3583_v52 = vadd.f32 %v3520_v19, %v3192_v11 }
 0x1ff   : > { %v5218_v20 = vpop.f32.mrf.mxu1 }
 0x200   : > { %v5268_v30 = vpop.f32.mrf.mxu0  ;;  %4077 = vst.msk [vmem:[%s6922_s26 + $0xb8] sm:$0xff] %vm4053_vm2, %v4044_v27  ;;  %v4043_v21 = vmax.f32 %v4011_v7, 0.0  ;;  %v4014_v37 = vadd.f32 %v6906_v43, %v3975_v41  ;;  %v3974_v17 = vadd.f32 %v3911_v36, %v3583_v52  ;;  %v3586_v3 = vadd.f32 %v5218_v20, %v3195_v24 }
 0x201   : > { %v3530_v14 = vpop.f32.mrf.mxu1 }
 0x202   : > { %v3921_v15 = vpop.f32.mrf.mxu0  ;;  %4076 = vst.msk [vmem:[%s6922_s26 + $0xb0] sm:$0xff] %vm4053_vm2, %v4043_v21  ;;  %v4046_v10 = vmax.f32 %v4014_v37, 0.0  ;;  %v4013_v26 = vadd.f32 %v6906_v43, %v3974_v17  ;;  %v3977_v46 = vadd.f32 %v5268_v30, %v3586_v3  ;;  %v3585_v59 = vadd.f32 %v3530_v14, %v3194_v34 }
 0x203   : > { %v5221_v49 = vpop.f32.mrf.mxu1 }
 0x204   : > { %v5271_v23 = vpop.f32.mrf.mxu0  ;;  %4079 = vst.msk [vmem:[%s6922_s26 + $0xc8] sm:$0xff] %vm4053_vm2, %v4046_v10  ;;  %v4045_v57 = vmax.f32 %v4013_v26, 0.0  ;;  %v4016_v35 = vadd.f32 %v6906_v43, %v3977_v46  ;;  %v3976_v39 = vadd.f32 %v3921_v15, %v3585_v59  ;;  %v3588_v31 = vadd.f32 %v5221_v49, %v3197_v6 }
 0x205   : > { %v3540_v48 = vpop.f32.mrf.mxu1 }
 0x206   : > { %v3931_v45 = vpop.f32.mrf.mxu0  ;;  %4078 = vst.msk [vmem:[%s6922_s26 + $0xc0] sm:$0xff] %vm4053_vm2, %v4045_v57  ;;  %v4048_v42 = vmax.f32 %v4016_v35, 0.0  ;;  %v4015_v55 = vadd.f32 %v6906_v43, %v3976_v39  ;;  %v3979_v58 = vadd.f32 %v5271_v23, %v3588_v31  ;;  %v3587_v16 = vadd.f32 %v3540_v48, %v3196_v61 }
 0x207   : > { %v5224_v2 = vpop.f32.mrf.mxu1 }
 0x208   : > { %v5274_v11 = vpop.f32.mrf.mxu0  ;;  %4081 = vst.msk [vmem:[%s6922_s26 + $0xd8] sm:$0xff] %vm4053_vm2, %v4048_v42  ;;  %v4047_v28 = vmax.f32 %v4015_v55, 0.0  ;;  %v4018_v53 = vadd.f32 %v6906_v43, %v3979_v58  ;;  %v3978_v50 = vadd.f32 %v3931_v45, %v3587_v16  ;;  %v3590_v4 = vadd.f32 %v5224_v2, %v3199_v18 }
 0x209   : > { %v3550_v54 = vpop.f32.mrf.mxu1 }
 0x20a   : > { %4080 = vst.msk [vmem:[%s6922_s26 + $0xd0] sm:$0xff] %vm4053_vm2, %v4047_v28  ;;  %v4050_v25 = vmax.f32 %v4018_v53, 0.0  ;;  %v4017_v44 = vadd.f32 %v6906_v43, %v3978_v50  ;;  %v3981_v13 = vadd.f32 %v5274_v11, %v3590_v4  ;;  %v3589_v9 = vadd.f32 %v3550_v54, %v3198_v0  ;;  %v3941_v63 = vpop.f32.mrf.mxu0 }
 0x20c   : > { %4083 = vst.msk [vmem:[%s6922_s26 + $0xe8] sm:$0xff] %vm4053_vm2, %v4050_v25  ;;  %v4049_v24 = vmax.f32 %v4017_v44, 0.0  ;;  %v4020_v38 = vadd.f32 %v6906_v43, %v3981_v13  ;;  %v3980_v8 = vadd.f32 %v3941_v63, %v3589_v9 }
 0x20e   : > { %4082 = vst.msk [vmem:[%s6922_s26 + $0xe0] sm:$0xff] %vm4053_vm2, %v4049_v24  ;;  %v4052_v22 = vmax.f32 %v4020_v38, 0.0  ;;  %v4019_v19 = vadd.f32 %v6906_v43, %v3980_v8 }
 0x210   : > { %4085 = vst.msk [vmem:[%s6922_s26 + $0xf8] sm:$0xff] %vm4053_vm2, %v4052_v22  ;;  %v4051_v36 = vmax.f32 %v4019_v19, 0.0 }
 0x212   : > { %4084 = vst.msk [vmem:[%s6922_s26 + $0xf0] sm:$0xff] %vm4053_vm2, %v4051_v36 }
 0x213   : > { %5350 = shalt.err (!%p5347_p5)
}
 0x214   : > { %s5351_s12 = scalar_lea.hbm %s7093_s7, 4096  ;;  %s5355_s21 = scalar_lea.hbm %s7152_s4, 8192 }
 0x215   : > { %p5352_p6 = scmp.ne.s32.totalorder %s7093_s7, %s5351_s12  ;;  %p5356_p10 = scmp.lt.s32.totalorder %s7093_s7, %s7152_s4 }
 0x216   : > { %p5357_p11 = scmp.lt.s32.totalorder %s5355_s21, %s5351_s12 }
 0x217   : > { %p5353_p7 = pnand %p5352_p6, %p5483_p4 }
 0x218   : > { %p5358_p12 = por %p5357_p11, %p5356_p10 }
 0x219   : > { %p5354_p9 = pneg %p5353_p7 }
 0x21b   : > { %p5359_p13 = pnand %p5358_p12, %p5354_p9 }
 0x21d   : > { %5362 = shalt.err (!%p5359_p13)
}
 0x21e   : > { %s5416_s26 = smov 128   ;;  %s5417_s29 = smov 8  }
 0x21f   : > { %5279 = dma.vmem_to_hbm [thread:$0]  (%p5483_p4), %s7095_s30, 4096, %s7093_s7, %s7103_s18, %s5416_s26, %s5416_s26, %s5417_s29  }
 0x220 PF: > { %p5286_p0 = scmp.ge.s32.totalorder %s5413_s20, 2  ;;  %s4118_s5 = sand.u32 1, %s5393_s15  }
 0x221   : > { %s4119_s6 = scalar_lea.sflag [#allocation4], %s4118_s5 }
 0x222   : > { %p5282_p1 = pnand %p5286_p0, %p5490_p8 }
 0x224   : > { %p5283_p2 = pneg %p5282_p1 }
 0x226   : > { %5388 = dma.done.wait (%p5283_p2), %s4119_s6, 4096  }
 0x227   : > { %5390 = vsyncadd (%p5283_p2), %s4119_s6, 4294963200  ;;  %s17_s20 = sadd.s32 1, %s5413_s20   ;;  %s7325_s15 = smov %s5397_s16 }
 0x228   : > { %p14_p3 = scmp.ge.s32.totalorder %s17_s20, 4   ;;  %s7326_s16 = smov %s5401_s17 }
 0x229   : > { %s7327_s17 = smov %s5496_s28  ;;  %s7328_s18 = smov %s5409_s19 }
 0x22a   : > { %s7329_s19 = smov %s7331_s23  ;;  %16 = sbr.rel (!%p14_p3) target bundleno = 4 (0x4), region = 93 }
 0x22f   :  { %4124 = vsyncpa [#allocation4], 1 }
 0x230   :  { %4126 = vsyncpa [#allocation4 + $0x1], 1 }

</bundles_post_ra>
